<compile_context>
chip_gen: v7x
topology: tpu7x:2x2x1
jax: 0.10.0
libtpu: 0.0.40
codegen_flags: <defaults>
</compile_context>

<pallas_src>
import jax
import jax.numpy as jnp
from jax.experimental import pallas as pl
from jax.experimental.pallas import tpu as pltpu

EPS = 1e-3
KH = KW = 5
PAD = 2


def _round_up(v, m):
    return (v + m - 1) // m * m


def _make_kernel(N, H, W, Wp):
    count = float(N * H * W)                     # real element count / channel

    def kernel(x_ref, g1_ref, b1_ref, w_ref, g2_ref, b2_ref, o_ref, wbc_ref):
        R, _, C = x_ref.shape                    # (N*H, Wp, cblk)
        inv_cnt = 1.0 / count
        ones_row = jnp.ones((1, R * Wp), jnp.float32)

        # ---- BatchNorm #1 statistics on the (otherwise idle) MXU -----------
        # padded W columns / channels are zero, so they add nothing to the sums
        x_all = x_ref[...].reshape(R * Wp, C)
        s1 = jnp.dot(ones_row, x_all, preferred_element_type=jnp.float32)
        q1 = jnp.dot(ones_row, x_all * x_all, preferred_element_type=jnp.float32)
        mean1 = s1 * inv_cnt
        var1 = jnp.maximum(q1 * inv_cnt - mean1 * mean1, 0.0)
        scale1 = jax.lax.rsqrt(var1 + EPS) * g1_ref[...]
        shift1 = b1_ref[...] - mean1 * scale1
        scale1b = jnp.broadcast_to(scale1, (Wp, C))       # hoisted, done once
        shift1b = jnp.broadcast_to(shift1, (Wp, C))

        # ---- pre-broadcast the 25 taps once, with the dx edge-mask folded in
        # mask_dx[w] = 1 iff output col w < W and source col w+dx-PAD in [0, W)
        widx = jax.lax.broadcasted_iota(jnp.int32, (Wp, C), 0)
        for dx in range(KW):
            lo = max(PAD - dx, 0)
            hi = min(W, W + PAD - dx)
            m = ((widx >= lo) & (widx < hi)).astype(jnp.float32)
            for dy in range(KH):
                t = dy * KW + dx
                wbc_ref[t] = jnp.broadcast_to(w_ref[pl.ds(t, 1), :], (Wp, C)) * m

        # ---- fused BN1-normalize + ReLU + depthwise 5x5 conv ----------------
        # input-row major: each input row is normalized once, rolled 4x (XLU),
        # and accumulated into the <=5 live per-output-row accumulators.
        for n in range(N):
            accs = [None] * H
            for h_in in range(H):
                raw = x_ref[n * H + h_in]                         # (Wp, C)
                xn = jnp.maximum(raw * scale1b + shift1b, 0.0)
                for dx in range(KW):
                    s = (PAD - dx) % Wp
                    rolled = xn if s == 0 else pltpu.roll(xn, shift=s, axis=0)
                    for dy in range(KH):
                        h_out = h_in - dy + PAD
                        if 0 <= h_out < H:
                            contrib = rolled * wbc_ref[dy * KW + dx]
                            accs[h_out] = (contrib if accs[h_out] is None
                                           else accs[h_out] + contrib)
                h_done = h_in - PAD                # last contributor was h_in
                if h_done >= 0:
                    o_ref[n * H + h_done] = accs[h_done]
                    accs[h_done] = None
            for h_done in range(max(H - PAD, 0), H):
                o_ref[n * H + h_done] = accs[h_done]

        # ---- BatchNorm #2: stats on MXU, then per-row normalize in place ----
        y_all = o_ref[...].reshape(R * Wp, C)     # padded cols/chans are zero
        s2 = jnp.dot(ones_row, y_all, preferred_element_type=jnp.float32)
        q2 = jnp.dot(ones_row, y_all * y_all, preferred_element_type=jnp.float32)
        mean2 = s2 * inv_cnt
        var2 = jnp.maximum(q2 * inv_cnt - mean2 * mean2, 0.0)
        scale2 = jax.lax.rsqrt(var2 + EPS) * g2_ref[...]
        shift2 = b2_ref[...] - mean2 * scale2
        scale2b = jnp.broadcast_to(scale2, (Wp, C))
        shift2b = jnp.broadcast_to(shift2, (Wp, C))
        for r in range(R):
            o_ref[r] = o_ref[r] * scale2b + shift2b

    return kernel


def module_forward(x_nchw, g1, b1, w_torch, g2, b2):
    """x_nchw: (N, C, H, W) float32; w_torch: (C, 1, 5, 5) depthwise weight."""
    N, C, H, W = x_nchw.shape
    Wp = _round_up(W, 8)                       # W padded to one sublane tile
    R = N * H

    cblk = min(384, _round_up(C, 128))         # 3-vreg-wide lane-dense blocks
    Cp = _round_up(C, cblk)
    n_cb = Cp // cblk                          # 3 channel blocks for C=1104

    # NCHW -> (N*H, Wp, Cp): channels lane-dense, W one full sublane tile.
    # (If the surrounding model is channels-last, these transposes can go.)
    x = jnp.transpose(x_nchw, (0, 2, 3, 1))
    x = jnp.pad(x, ((0, 0), (0, 0), (0, Wp - W), (0, Cp - C)))
    x = x.reshape(R, Wp, Cp)

    def _vec(v):
        return jnp.pad(v, (0, Cp - C)).reshape(1, Cp)

    g1p, b1p, g2p, b2p = _vec(g1), _vec(b1), _vec(g2), _vec(b2)

    # torch (C, 1, 5, 5) -> (25, Cp) with w2d[dy*5+dx, c] = w[c, 0, dy, dx]
    w2d = jnp.transpose(w_torch.reshape(C, KH * KW), (1, 0))
    w2d = jnp.pad(w2d, ((0, 0), (0, Cp - C)))

    act_spec = pl.BlockSpec((R, Wp, cblk), lambda c: (0, 0, c))
    vec_spec = pl.BlockSpec((1, cblk), lambda c: (0, c))
    wgt_spec = pl.BlockSpec((KH * KW, cblk), lambda c: (0, c))

    y = pl.pallas_call(
        _make_kernel(N, H, W, Wp),
        out_shape=jax.ShapeDtypeStruct((R, Wp, Cp), jnp.float32),
        grid=(n_cb,),
        in_specs=[act_spec, vec_spec, vec_spec, wgt_spec, vec_spec, vec_spec],
        out_specs=act_spec,
        scratch_shapes=[pltpu.VMEM((KH * KW, Wp, cblk), jnp.float32)],
        compiler_params=pltpu.CompilerParams(
            dimension_semantics=("parallel",),
            allow_input_fusion=[True] * 6,
        ),
    )(x, g1p, b1p, w2d, g2p, b2p)

    y = y.reshape(N, H, Wp, Cp)[:, :, :W, :C]
    return jnp.transpose(y, (0, 3, 1, 2))      # back to NCHW


def _reference(x, g1, b1, w, g2, b2):
    """Pure-JAX reference of the module forward (train-mode BN, biased var)."""
    def bn(t, g, b):
        mean = jnp.mean(t, axis=(0, 2, 3), keepdims=True)
        var = jnp.mean((t - mean) ** 2, axis=(0, 2, 3), keepdims=True)
        return ((t - mean) * jax.lax.rsqrt(var + EPS)
                * g.reshape(1, -1, 1, 1) + b.reshape(1, -1, 1, 1))

    N, C, H, W = x.shape
    h = jnp.maximum(bn(x, g1, b1), 0.0)
    hp = jnp.pad(h, ((0, 0), (0, 0), (PAD, PAD), (PAD, PAD)))
    out = jnp.zeros_like(x)
    for dy in range(KH):
        for dx in range(KW):
            out = out + (hp[:, :, dy:dy + H, dx:dx + W]
                         * w[:, 0, dy, dx].reshape(1, C, 1, 1))
    return bn(out, g2, b2)


if __name__ == "__main__":
    # Shapes implied by the module: x179 = randn([1, 1104, 7, 7])
    N, C, H, W = 1, 1104, 7, 7
    key = jax.random.PRNGKey(0)
    k1, k2, k3, k4, k5, k6 = jax.random.split(key, 6)

    x = jax.random.normal(k1, (N, C, H, W), dtype=jnp.float32)
    # deterministic synthetic parameters (BN affine + depthwise conv weight)
    g1 = 1.0 + 0.1 * jax.random.normal(k2, (C,), dtype=jnp.float32)
    b1 = 0.1 * jax.random.normal(k3, (C,), dtype=jnp.float32)
    w = 0.1 * jax.random.normal(k4, (C, 1, KH, KW), dtype=jnp.float32)
    g2 = 1.0 + 0.1 * jax.random.normal(k5, (C,), dtype=jnp.float32)
    b2 = 0.1 * jax.random.normal(k6, (C,), dtype=jnp.float32)

    y = jax.jit(module_forward)(x, g1, b1, w, g2, b2)
    jax.block_until_ready(y)
    assert y.shape == (N, C, H, W) and y.dtype == jnp.float32

    y_ref = _reference(x, g1, b1, w, g2, b2)
    err = float(jnp.max(jnp.abs(y - y_ref)))
    assert err < 5e-4, f"max abs error vs reference: {err}"
    print("KERNEL_OK")
</pallas_src>

<mosaic_0001>
module attributes {stable_mosaic.version = 11 : i64} {
  func.func @kernel(%arg0: i32, %arg1: memref<7x8x384xf32, #tpu.memory_space<vmem>>, %arg2: memref<1x384xf32, #tpu.memory_space<vmem>>, %arg3: memref<1x384xf32, #tpu.memory_space<vmem>>, %arg4: memref<25x384xf32, #tpu.memory_space<vmem>>, %arg5: memref<1x384xf32, #tpu.memory_space<vmem>>, %arg6: memref<1x384xf32, #tpu.memory_space<vmem>>, %arg7: memref<7x8x384xf32, #tpu.memory_space<vmem>>, %arg8: memref<25x8x384xf32, #tpu.memory_space<vmem>>) attributes {dimension_semantics = [#tpu.dimension_semantics<parallel>], iteration_bounds = array<i64: 3>, scalar_prefetch = 0 : i64, scratch_operands = 1 : i64, tpu.core_type = #tpu.core_type<tc>, window_params = [{transform_indices = @transform_0, window_bounds = array<i64: 7, 8, 384>}, {transform_indices = @transform_1, window_bounds = array<i64: 1, 384>}, {transform_indices = @transform_2, window_bounds = array<i64: 1, 384>}, {transform_indices = @transform_3, window_bounds = array<i64: 25, 384>}, {transform_indices = @transform_4, window_bounds = array<i64: 1, 384>}, {transform_indices = @transform_5, window_bounds = array<i64: 1, 384>}, {transform_indices = @transform_6, window_bounds = array<i64: 7, 8, 384>}]} {
    %cst = arith.constant 1.000000e+00 : f32
    %0 = vector.broadcast %cst : f32 to vector<1x56xf32>
    %c0 = arith.constant 0 : index
    %c0_0 = arith.constant 0 : index
    %c0_1 = arith.constant 0 : index
    %1 = vector.load %arg1[%c0, %c0_0, %c0_1] : memref<7x8x384xf32, #tpu.memory_space<vmem>>, vector<7x8x384xf32>
    %2 = vector.shape_cast %1 : vector<7x8x384xf32> to vector<56x384xf32>
    %cst_2 = arith.constant dense<0.000000e+00> : vector<1x384xf32>
    %3 = tpu.matmul %0, %2, %cst_2 {dimension_numbers = #tpu.dot_dimension_numbers<[1], [0], [0], [1], [0, 0, 1, 1], [], []>} : vector<1x56xf32>, vector<56x384xf32>, vector<1x384xf32> -> vector<1x384xf32>
    %4 = arith.mulf %2, %2 : vector<56x384xf32>
    %cst_3 = arith.constant dense<0.000000e+00> : vector<1x384xf32>
    %5 = tpu.matmul %0, %4, %cst_3 {dimension_numbers = #tpu.dot_dimension_numbers<[1], [0], [0], [1], [0, 0, 1, 1], [], []>} : vector<1x56xf32>, vector<56x384xf32>, vector<1x384xf32> -> vector<1x384xf32>
    %cst_4 = arith.constant 0.0204081628 : f32
    %6 = vector.broadcast %cst_4 : f32 to vector<1x384xf32>
    %7 = arith.mulf %3, %6 : vector<1x384xf32>
    %cst_5 = arith.constant 0.0204081628 : f32
    %8 = vector.broadcast %cst_5 : f32 to vector<1x384xf32>
    %9 = arith.mulf %5, %8 : vector<1x384xf32>
    %10 = arith.mulf %7, %7 : vector<1x384xf32>
    %11 = arith.subf %9, %10 : vector<1x384xf32>
    %cst_6 = arith.constant 0.000000e+00 : f32
    %12 = vector.broadcast %cst_6 : f32 to vector<1x384xf32>
    %13 = arith.maximumf %11, %12 : vector<1x384xf32>
    %cst_7 = arith.constant 1.000000e-03 : f32
    %14 = vector.broadcast %cst_7 : f32 to vector<1x384xf32>
    %15 = arith.addf %13, %14 : vector<1x384xf32>
    %16 = math.rsqrt %15 : vector<1x384xf32>
    %c0_8 = arith.constant 0 : index
    %c0_9 = arith.constant 0 : index
    %17 = vector.load %arg2[%c0_8, %c0_9] : memref<1x384xf32, #tpu.memory_space<vmem>>, vector<1x384xf32>
    %18 = arith.mulf %16, %17 : vector<1x384xf32>
    %c0_10 = arith.constant 0 : index
    %c0_11 = arith.constant 0 : index
    %19 = vector.load %arg3[%c0_10, %c0_11] : memref<1x384xf32, #tpu.memory_space<vmem>>, vector<1x384xf32>
    %20 = arith.mulf %7, %18 : vector<1x384xf32>
    %21 = arith.subf %19, %20 : vector<1x384xf32>
    %22 = vector.shape_cast %18 : vector<1x384xf32> to vector<1x384xf32>
    %23 = vector.broadcast %22 : vector<1x384xf32> to vector<8x384xf32>
    %24 = vector.shape_cast %21 : vector<1x384xf32> to vector<1x384xf32>
    %25 = vector.broadcast %24 : vector<1x384xf32> to vector<8x384xf32>
    %26 = tpu.iota {dimensions = array<i32: 0>} : vector<8x384xi32>
    %c2_i32 = arith.constant 2 : i32
    %27 = vector.broadcast %c2_i32 : i32 to vector<8x384xi32>
    %28 = arith.cmpi sge, %26, %27 : vector<8x384xi32>
    %c7_i32 = arith.constant 7 : i32
    %29 = vector.broadcast %c7_i32 : i32 to vector<8x384xi32>
    %30 = arith.cmpi slt, %26, %29 : vector<8x384xi32>
    %31 = arith.andi %28, %30 : vector<8x384xi1>
    %32 = arith.extui %31 : vector<8x384xi1> to vector<8x384xi32>
    %33 = arith.sitofp %32 : vector<8x384xi32> to vector<8x384xf32>
    %c0_12 = arith.constant 0 : index
    %c0_13 = arith.constant 0 : index
    %34 = vector.load %arg4[%c0_12, %c0_13] : memref<25x384xf32, #tpu.memory_space<vmem>>, vector<1x384xf32>
    %35 = vector.shape_cast %34 : vector<1x384xf32> to vector<1x384xf32>
    %36 = vector.broadcast %35 : vector<1x384xf32> to vector<8x384xf32>
    %37 = arith.mulf %36, %33 : vector<8x384xf32>
    %c0_14 = arith.constant 0 : index
    %c0_15 = arith.constant 0 : index
    %c0_16 = arith.constant 0 : index
    %38 = vector.load %arg8[%c0_14, %c0_15, %c0_16] : memref<25x8x384xf32, #tpu.memory_space<vmem>>, vector<1x8x384xf32>
    %39 = vector.shape_cast %38 : vector<1x8x384xf32> to vector<8x384xf32>
    %40 = vector.shape_cast %37 : vector<8x384xf32> to vector<1x8x384xf32>
    tpu.vector_store %arg8[%c0_14, %c0_15, %c0_16], %40 {strides = array<i32>} : memref<25x8x384xf32, #tpu.memory_space<vmem>>, vector<1x8x384xf32>,
    %c5 = arith.constant 5 : index
    %c0_17 = arith.constant 0 : index
    %41 = vector.load %arg4[%c5, %c0_17] : memref<25x384xf32, #tpu.memory_space<vmem>>, vector<1x384xf32>
    %42 = vector.shape_cast %41 : vector<1x384xf32> to vector<1x384xf32>
    %43 = vector.broadcast %42 : vector<1x384xf32> to vector<8x384xf32>
    %44 = arith.mulf %43, %33 : vector<8x384xf32>
    %c5_18 = arith.constant 5 : index
    %c0_19 = arith.constant 0 : index
    %c0_20 = arith.constant 0 : index
    %45 = vector.load %arg8[%c5_18, %c0_19, %c0_20] : memref<25x8x384xf32, #tpu.memory_space<vmem>>, vector<1x8x384xf32>
    %46 = vector.shape_cast %45 : vector<1x8x384xf32> to vector<8x384xf32>
    %47 = vector.shape_cast %44 : vector<8x384xf32> to vector<1x8x384xf32>
    tpu.vector_store %arg8[%c5_18, %c0_19, %c0_20], %47 {strides = array<i32>} : memref<25x8x384xf32, #tpu.memory_space<vmem>>, vector<1x8x384xf32>,
    %c10 = arith.constant 10 : index
    %c0_21 = arith.constant 0 : index
    %48 = vector.load %arg4[%c10, %c0_21] : memref<25x384xf32, #tpu.memory_space<vmem>>, vector<1x384xf32>
    %49 = vector.shape_cast %48 : vector<1x384xf32> to vector<1x384xf32>
    %50 = vector.broadcast %49 : vector<1x384xf32> to vector<8x384xf32>
    %51 = arith.mulf %50, %33 : vector<8x384xf32>
    %c10_22 = arith.constant 10 : index
    %c0_23 = arith.constant 0 : index
    %c0_24 = arith.constant 0 : index
    %52 = vector.load %arg8[%c10_22, %c0_23, %c0_24] : memref<25x8x384xf32, #tpu.memory_space<vmem>>, vector<1x8x384xf32>
    %53 = vector.shape_cast %52 : vector<1x8x384xf32> to vector<8x384xf32>
    %54 = vector.shape_cast %51 : vector<8x384xf32> to vector<1x8x384xf32>
    tpu.vector_store %arg8[%c10_22, %c0_23, %c0_24], %54 {strides = array<i32>} : memref<25x8x384xf32, #tpu.memory_space<vmem>>, vector<1x8x384xf32>,
    %c15 = arith.constant 15 : index
    %c0_25 = arith.constant 0 : index
    %55 = vector.load %arg4[%c15, %c0_25] : memref<25x384xf32, #tpu.memory_space<vmem>>, vector<1x384xf32>
    %56 = vector.shape_cast %55 : vector<1x384xf32> to vector<1x384xf32>
    %57 = vector.broadcast %56 : vector<1x384xf32> to vector<8x384xf32>
    %58 = arith.mulf %57, %33 : vector<8x384xf32>
    %c15_26 = arith.constant 15 : index
    %c0_27 = arith.constant 0 : index
    %c0_28 = arith.constant 0 : index
    %59 = vector.load %arg8[%c15_26, %c0_27, %c0_28] : memref<25x8x384xf32, #tpu.memory_space<vmem>>, vector<1x8x384xf32>
    %60 = vector.shape_cast %59 : vector<1x8x384xf32> to vector<8x384xf32>
    %61 = vector.shape_cast %58 : vector<8x384xf32> to vector<1x8x384xf32>
    tpu.vector_store %arg8[%c15_26, %c0_27, %c0_28], %61 {strides = array<i32>} : memref<25x8x384xf32, #tpu.memory_space<vmem>>, vector<1x8x384xf32>,
    %c20 = arith.constant 20 : index
    %c0_29 = arith.constant 0 : index
    %62 = vector.load %arg4[%c20, %c0_29] : memref<25x384xf32, #tpu.memory_space<vmem>>, vector<1x384xf32>
    %63 = vector.shape_cast %62 : vector<1x384xf32> to vector<1x384xf32>
    %64 = vector.broadcast %63 : vector<1x384xf32> to vector<8x384xf32>
    %65 = arith.mulf %64, %33 : vector<8x384xf32>
    %c20_30 = arith.constant 20 : index
    %c0_31 = arith.constant 0 : index
    %c0_32 = arith.constant 0 : index
    %66 = vector.load %arg8[%c20_30, %c0_31, %c0_32] : memref<25x8x384xf32, #tpu.memory_space<vmem>>, vector<1x8x384xf32>
    %67 = vector.shape_cast %66 : vector<1x8x384xf32> to vector<8x384xf32>
    %68 = vector.shape_cast %65 : vector<8x384xf32> to vector<1x8x384xf32>
    tpu.vector_store %arg8[%c20_30, %c0_31, %c0_32], %68 {strides = array<i32>} : memref<25x8x384xf32, #tpu.memory_space<vmem>>, vector<1x8x384xf32>,
    %c1_i32 = arith.constant 1 : i32
    %69 = vector.broadcast %c1_i32 : i32 to vector<8x384xi32>
    %70 = arith.cmpi sge, %26, %69 : vector<8x384xi32>
    %c7_i32_33 = arith.constant 7 : i32
    %71 = vector.broadcast %c7_i32_33 : i32 to vector<8x384xi32>
    %72 = arith.cmpi slt, %26, %71 : vector<8x384xi32>
    %73 = arith.andi %70, %72 : vector<8x384xi1>
    %74 = arith.extui %73 : vector<8x384xi1> to vector<8x384xi32>
    %75 = arith.sitofp %74 : vector<8x384xi32> to vector<8x384xf32>
    %c1 = arith.constant 1 : index
    %c0_34 = arith.constant 0 : index
    %76 = vector.load %arg4[%c1, %c0_34] : memref<25x384xf32, #tpu.memory_space<vmem>>, vector<1x384xf32>
    %77 = vector.shape_cast %76 : vector<1x384xf32> to vector<1x384xf32>
    %78 = vector.broadcast %77 : vector<1x384xf32> to vector<8x384xf32>
    %79 = arith.mulf %78, %75 : vector<8x384xf32>
    %c1_35 = arith.constant 1 : index
    %c0_36 = arith.constant 0 : index
    %c0_37 = arith.constant 0 : index
    %80 = vector.load %arg8[%c1_35, %c0_36, %c0_37] : memref<25x8x384xf32, #tpu.memory_space<vmem>>, vector<1x8x384xf32>
    %81 = vector.shape_cast %80 : vector<1x8x384xf32> to vector<8x384xf32>
    %82 = vector.shape_cast %79 : vector<8x384xf32> to vector<1x8x384xf32>
    tpu.vector_store %arg8[%c1_35, %c0_36, %c0_37], %82 {strides = array<i32>} : memref<25x8x384xf32, #tpu.memory_space<vmem>>, vector<1x8x384xf32>,
    %c6 = arith.constant 6 : index
    %c0_38 = arith.constant 0 : index
    %83 = vector.load %arg4[%c6, %c0_38] : memref<25x384xf32, #tpu.memory_space<vmem>>, vector<1x384xf32>
    %84 = vector.shape_cast %83 : vector<1x384xf32> to vector<1x384xf32>
    %85 = vector.broadcast %84 : vector<1x384xf32> to vector<8x384xf32>
    %86 = arith.mulf %85, %75 : vector<8x384xf32>
    %c6_39 = arith.constant 6 : index
    %c0_40 = arith.constant 0 : index
    %c0_41 = arith.constant 0 : index
    %87 = vector.load %arg8[%c6_39, %c0_40, %c0_41] : memref<25x8x384xf32, #tpu.memory_space<vmem>>, vector<1x8x384xf32>
    %88 = vector.shape_cast %87 : vector<1x8x384xf32> to vector<8x384xf32>
    %89 = vector.shape_cast %86 : vector<8x384xf32> to vector<1x8x384xf32>
    tpu.vector_store %arg8[%c6_39, %c0_40, %c0_41], %89 {strides = array<i32>} : memref<25x8x384xf32, #tpu.memory_space<vmem>>, vector<1x8x384xf32>,
    %c11 = arith.constant 11 : index
    %c0_42 = arith.constant 0 : index
    %90 = vector.load %arg4[%c11, %c0_42] : memref<25x384xf32, #tpu.memory_space<vmem>>, vector<1x384xf32>
    %91 = vector.shape_cast %90 : vector<1x384xf32> to vector<1x384xf32>
    %92 = vector.broadcast %91 : vector<1x384xf32> to vector<8x384xf32>
    %93 = arith.mulf %92, %75 : vector<8x384xf32>
    %c11_43 = arith.constant 11 : index
    %c0_44 = arith.constant 0 : index
    %c0_45 = arith.constant 0 : index
    %94 = vector.load %arg8[%c11_43, %c0_44, %c0_45] : memref<25x8x384xf32, #tpu.memory_space<vmem>>, vector<1x8x384xf32>
    %95 = vector.shape_cast %94 : vector<1x8x384xf32> to vector<8x384xf32>
    %96 = vector.shape_cast %93 : vector<8x384xf32> to vector<1x8x384xf32>
    tpu.vector_store %arg8[%c11_43, %c0_44, %c0_45], %96 {strides = array<i32>} : memref<25x8x384xf32, #tpu.memory_space<vmem>>, vector<1x8x384xf32>,
    %c16 = arith.constant 16 : index
    %c0_46 = arith.constant 0 : index
    %97 = vector.load %arg4[%c16, %c0_46] : memref<25x384xf32, #tpu.memory_space<vmem>>, vector<1x384xf32>
    %98 = vector.shape_cast %97 : vector<1x384xf32> to vector<1x384xf32>
    %99 = vector.broadcast %98 : vector<1x384xf32> to vector<8x384xf32>
    %100 = arith.mulf %99, %75 : vector<8x384xf32>
    %c16_47 = arith.constant 16 : index
    %c0_48 = arith.constant 0 : index
    %c0_49 = arith.constant 0 : index
    %101 = vector.load %arg8[%c16_47, %c0_48, %c0_49] : memref<25x8x384xf32, #tpu.memory_space<vmem>>, vector<1x8x384xf32>
    %102 = vector.shape_cast %101 : vector<1x8x384xf32> to vector<8x384xf32>
    %103 = vector.shape_cast %100 : vector<8x384xf32> to vector<1x8x384xf32>
    tpu.vector_store %arg8[%c16_47, %c0_48, %c0_49], %103 {strides = array<i32>} : memref<25x8x384xf32, #tpu.memory_space<vmem>>, vector<1x8x384xf32>,
    %c21 = arith.constant 21 : index
    %c0_50 = arith.constant 0 : index
    %104 = vector.load %arg4[%c21, %c0_50] : memref<25x384xf32, #tpu.memory_space<vmem>>, vector<1x384xf32>
    %105 = vector.shape_cast %104 : vector<1x384xf32> to vector<1x384xf32>
    %106 = vector.broadcast %105 : vector<1x384xf32> to vector<8x384xf32>
    %107 = arith.mulf %106, %75 : vector<8x384xf32>
    %c21_51 = arith.constant 21 : index
    %c0_52 = arith.constant 0 : index
    %c0_53 = arith.constant 0 : index
    %108 = vector.load %arg8[%c21_51, %c0_52, %c0_53] : memref<25x8x384xf32, #tpu.memory_space<vmem>>, vector<1x8x384xf32>
    %109 = vector.shape_cast %108 : vector<1x8x384xf32> to vector<8x384xf32>
    %110 = vector.shape_cast %107 : vector<8x384xf32> to vector<1x8x384xf32>
    tpu.vector_store %arg8[%c21_51, %c0_52, %c0_53], %110 {strides = array<i32>} : memref<25x8x384xf32, #tpu.memory_space<vmem>>, vector<1x8x384xf32>,
    %c0_i32 = arith.constant 0 : i32
    %111 = vector.broadcast %c0_i32 : i32 to vector<8x384xi32>
    %112 = arith.cmpi sge, %26, %111 : vector<8x384xi32>
    %c7_i32_54 = arith.constant 7 : i32
    %113 = vector.broadcast %c7_i32_54 : i32 to vector<8x384xi32>
    %114 = arith.cmpi slt, %26, %113 : vector<8x384xi32>
    %115 = arith.andi %112, %114 : vector<8x384xi1>
    %116 = arith.extui %115 : vector<8x384xi1> to vector<8x384xi32>
    %117 = arith.sitofp %116 : vector<8x384xi32> to vector<8x384xf32>
    %c2 = arith.constant 2 : index
    %c0_55 = arith.constant 0 : index
    %118 = vector.load %arg4[%c2, %c0_55] : memref<25x384xf32, #tpu.memory_space<vmem>>, vector<1x384xf32>
    %119 = vector.shape_cast %118 : vector<1x384xf32> to vector<1x384xf32>
    %120 = vector.broadcast %119 : vector<1x384xf32> to vector<8x384xf32>
    %121 = arith.mulf %120, %117 : vector<8x384xf32>
    %c2_56 = arith.constant 2 : index
    %c0_57 = arith.constant 0 : index
    %c0_58 = arith.constant 0 : index
    %122 = vector.load %arg8[%c2_56, %c0_57, %c0_58] : memref<25x8x384xf32, #tpu.memory_space<vmem>>, vector<1x8x384xf32>
    %123 = vector.shape_cast %122 : vector<1x8x384xf32> to vector<8x384xf32>
    %124 = vector.shape_cast %121 : vector<8x384xf32> to vector<1x8x384xf32>
    tpu.vector_store %arg8[%c2_56, %c0_57, %c0_58], %124 {strides = array<i32>} : memref<25x8x384xf32, #tpu.memory_space<vmem>>, vector<1x8x384xf32>,
    %c7 = arith.constant 7 : index
    %c0_59 = arith.constant 0 : index
    %125 = vector.load %arg4[%c7, %c0_59] : memref<25x384xf32, #tpu.memory_space<vmem>>, vector<1x384xf32>
    %126 = vector.shape_cast %125 : vector<1x384xf32> to vector<1x384xf32>
    %127 = vector.broadcast %126 : vector<1x384xf32> to vector<8x384xf32>
    %128 = arith.mulf %127, %117 : vector<8x384xf32>
    %c7_60 = arith.constant 7 : index
    %c0_61 = arith.constant 0 : index
    %c0_62 = arith.constant 0 : index
    %129 = vector.load %arg8[%c7_60, %c0_61, %c0_62] : memref<25x8x384xf32, #tpu.memory_space<vmem>>, vector<1x8x384xf32>
    %130 = vector.shape_cast %129 : vector<1x8x384xf32> to vector<8x384xf32>
    %131 = vector.shape_cast %128 : vector<8x384xf32> to vector<1x8x384xf32>
    tpu.vector_store %arg8[%c7_60, %c0_61, %c0_62], %131 {strides = array<i32>} : memref<25x8x384xf32, #tpu.memory_space<vmem>>, vector<1x8x384xf32>,
    %c12 = arith.constant 12 : index
    %c0_63 = arith.constant 0 : index
    %132 = vector.load %arg4[%c12, %c0_63] : memref<25x384xf32, #tpu.memory_space<vmem>>, vector<1x384xf32>
    %133 = vector.shape_cast %132 : vector<1x384xf32> to vector<1x384xf32>
    %134 = vector.broadcast %133 : vector<1x384xf32> to vector<8x384xf32>
    %135 = arith.mulf %134, %117 : vector<8x384xf32>
    %c12_64 = arith.constant 12 : index
    %c0_65 = arith.constant 0 : index
    %c0_66 = arith.constant 0 : index
    %136 = vector.load %arg8[%c12_64, %c0_65, %c0_66] : memref<25x8x384xf32, #tpu.memory_space<vmem>>, vector<1x8x384xf32>
    %137 = vector.shape_cast %136 : vector<1x8x384xf32> to vector<8x384xf32>
    %138 = vector.shape_cast %135 : vector<8x384xf32> to vector<1x8x384xf32>
    tpu.vector_store %arg8[%c12_64, %c0_65, %c0_66], %138 {strides = array<i32>} : memref<25x8x384xf32, #tpu.memory_space<vmem>>, vector<1x8x384xf32>,
    %c17 = arith.constant 17 : index
    %c0_67 = arith.constant 0 : index
    %139 = vector.load %arg4[%c17, %c0_67] : memref<25x384xf32, #tpu.memory_space<vmem>>, vector<1x384xf32>
    %140 = vector.shape_cast %139 : vector<1x384xf32> to vector<1x384xf32>
    %141 = vector.broadcast %140 : vector<1x384xf32> to vector<8x384xf32>
    %142 = arith.mulf %141, %117 : vector<8x384xf32>
    %c17_68 = arith.constant 17 : index
    %c0_69 = arith.constant 0 : index
    %c0_70 = arith.constant 0 : index
    %143 = vector.load %arg8[%c17_68, %c0_69, %c0_70] : memref<25x8x384xf32, #tpu.memory_space<vmem>>, vector<1x8x384xf32>
    %144 = vector.shape_cast %143 : vector<1x8x384xf32> to vector<8x384xf32>
    %145 = vector.shape_cast %142 : vector<8x384xf32> to vector<1x8x384xf32>
    tpu.vector_store %arg8[%c17_68, %c0_69, %c0_70], %145 {strides = array<i32>} : memref<25x8x384xf32, #tpu.memory_space<vmem>>, vector<1x8x384xf32>,
    %c22 = arith.constant 22 : index
    %c0_71 = arith.constant 0 : index
    %146 = vector.load %arg4[%c22, %c0_71] : memref<25x384xf32, #tpu.memory_space<vmem>>, vector<1x384xf32>
    %147 = vector.shape_cast %146 : vector<1x384xf32> to vector<1x384xf32>
    %148 = vector.broadcast %147 : vector<1x384xf32> to vector<8x384xf32>
    %149 = arith.mulf %148, %117 : vector<8x384xf32>
    %c22_72 = arith.constant 22 : index
    %c0_73 = arith.constant 0 : index
    %c0_74 = arith.constant 0 : index
    %150 = vector.load %arg8[%c22_72, %c0_73, %c0_74] : memref<25x8x384xf32, #tpu.memory_space<vmem>>, vector<1x8x384xf32>
    %151 = vector.shape_cast %150 : vector<1x8x384xf32> to vector<8x384xf32>
    %152 = vector.shape_cast %149 : vector<8x384xf32> to vector<1x8x384xf32>
    tpu.vector_store %arg8[%c22_72, %c0_73, %c0_74], %152 {strides = array<i32>} : memref<25x8x384xf32, #tpu.memory_space<vmem>>, vector<1x8x384xf32>,
    %c0_i32_75 = arith.constant 0 : i32
    %153 = vector.broadcast %c0_i32_75 : i32 to vector<8x384xi32>
    %154 = arith.cmpi sge, %26, %153 : vector<8x384xi32>
    %c6_i32 = arith.constant 6 : i32
    %155 = vector.broadcast %c6_i32 : i32 to vector<8x384xi32>
    %156 = arith.cmpi slt, %26, %155 : vector<8x384xi32>
    %157 = arith.andi %154, %156 : vector<8x384xi1>
    %158 = arith.extui %157 : vector<8x384xi1> to vector<8x384xi32>
    %159 = arith.sitofp %158 : vector<8x384xi32> to vector<8x384xf32>
    %c3 = arith.constant 3 : index
    %c0_76 = arith.constant 0 : index
    %160 = vector.load %arg4[%c3, %c0_76] : memref<25x384xf32, #tpu.memory_space<vmem>>, vector<1x384xf32>
    %161 = vector.shape_cast %160 : vector<1x384xf32> to vector<1x384xf32>
    %162 = vector.broadcast %161 : vector<1x384xf32> to vector<8x384xf32>
    %163 = arith.mulf %162, %159 : vector<8x384xf32>
    %c3_77 = arith.constant 3 : index
    %c0_78 = arith.constant 0 : index
    %c0_79 = arith.constant 0 : index
    %164 = vector.load %arg8[%c3_77, %c0_78, %c0_79] : memref<25x8x384xf32, #tpu.memory_space<vmem>>, vector<1x8x384xf32>
    %165 = vector.shape_cast %164 : vector<1x8x384xf32> to vector<8x384xf32>
    %166 = vector.shape_cast %163 : vector<8x384xf32> to vector<1x8x384xf32>
    tpu.vector_store %arg8[%c3_77, %c0_78, %c0_79], %166 {strides = array<i32>} : memref<25x8x384xf32, #tpu.memory_space<vmem>>, vector<1x8x384xf32>,
    %c8 = arith.constant 8 : index
    %c0_80 = arith.constant 0 : index
    %167 = vector.load %arg4[%c8, %c0_80] : memref<25x384xf32, #tpu.memory_space<vmem>>, vector<1x384xf32>
    %168 = vector.shape_cast %167 : vector<1x384xf32> to vector<1x384xf32>
    %169 = vector.broadcast %168 : vector<1x384xf32> to vector<8x384xf32>
    %170 = arith.mulf %169, %159 : vector<8x384xf32>
    %c8_81 = arith.constant 8 : index
    %c0_82 = arith.constant 0 : index
    %c0_83 = arith.constant 0 : index
    %171 = vector.load %arg8[%c8_81, %c0_82, %c0_83] : memref<25x8x384xf32, #tpu.memory_space<vmem>>, vector<1x8x384xf32>
    %172 = vector.shape_cast %171 : vector<1x8x384xf32> to vector<8x384xf32>
    %173 = vector.shape_cast %170 : vector<8x384xf32> to vector<1x8x384xf32>
    tpu.vector_store %arg8[%c8_81, %c0_82, %c0_83], %173 {strides = array<i32>} : memref<25x8x384xf32, #tpu.memory_space<vmem>>, vector<1x8x384xf32>,
    %c13 = arith.constant 13 : index
    %c0_84 = arith.constant 0 : index
    %174 = vector.load %arg4[%c13, %c0_84] : memref<25x384xf32, #tpu.memory_space<vmem>>, vector<1x384xf32>
    %175 = vector.shape_cast %174 : vector<1x384xf32> to vector<1x384xf32>
    %176 = vector.broadcast %175 : vector<1x384xf32> to vector<8x384xf32>
    %177 = arith.mulf %176, %159 : vector<8x384xf32>
    %c13_85 = arith.constant 13 : index
    %c0_86 = arith.constant 0 : index
    %c0_87 = arith.constant 0 : index
    %178 = vector.load %arg8[%c13_85, %c0_86, %c0_87] : memref<25x8x384xf32, #tpu.memory_space<vmem>>, vector<1x8x384xf32>
    %179 = vector.shape_cast %178 : vector<1x8x384xf32> to vector<8x384xf32>
    %180 = vector.shape_cast %177 : vector<8x384xf32> to vector<1x8x384xf32>
    tpu.vector_store %arg8[%c13_85, %c0_86, %c0_87], %180 {strides = array<i32>} : memref<25x8x384xf32, #tpu.memory_space<vmem>>, vector<1x8x384xf32>,
    %c18 = arith.constant 18 : index
    %c0_88 = arith.constant 0 : index
    %181 = vector.load %arg4[%c18, %c0_88] : memref<25x384xf32, #tpu.memory_space<vmem>>, vector<1x384xf32>
    %182 = vector.shape_cast %181 : vector<1x384xf32> to vector<1x384xf32>
    %183 = vector.broadcast %182 : vector<1x384xf32> to vector<8x384xf32>
    %184 = arith.mulf %183, %159 : vector<8x384xf32>
    %c18_89 = arith.constant 18 : index
    %c0_90 = arith.constant 0 : index
    %c0_91 = arith.constant 0 : index
    %185 = vector.load %arg8[%c18_89, %c0_90, %c0_91] : memref<25x8x384xf32, #tpu.memory_space<vmem>>, vector<1x8x384xf32>
    %186 = vector.shape_cast %185 : vector<1x8x384xf32> to vector<8x384xf32>
    %187 = vector.shape_cast %184 : vector<8x384xf32> to vector<1x8x384xf32>
    tpu.vector_store %arg8[%c18_89, %c0_90, %c0_91], %187 {strides = array<i32>} : memref<25x8x384xf32, #tpu.memory_space<vmem>>, vector<1x8x384xf32>,
    %c23 = arith.constant 23 : index
    %c0_92 = arith.constant 0 : index
    %188 = vector.load %arg4[%c23, %c0_92] : memref<25x384xf32, #tpu.memory_space<vmem>>, vector<1x384xf32>
    %189 = vector.shape_cast %188 : vector<1x384xf32> to vector<1x384xf32>
    %190 = vector.broadcast %189 : vector<1x384xf32> to vector<8x384xf32>
    %191 = arith.mulf %190, %159 : vector<8x384xf32>
    %c23_93 = arith.constant 23 : index
    %c0_94 = arith.constant 0 : index
    %c0_95 = arith.constant 0 : index
    %192 = vector.load %arg8[%c23_93, %c0_94, %c0_95] : memref<25x8x384xf32, #tpu.memory_space<vmem>>, vector<1x8x384xf32>
    %193 = vector.shape_cast %192 : vector<1x8x384xf32> to vector<8x384xf32>
    %194 = vector.shape_cast %191 : vector<8x384xf32> to vector<1x8x384xf32>
    tpu.vector_store %arg8[%c23_93, %c0_94, %c0_95], %194 {strides = array<i32>} : memref<25x8x384xf32, #tpu.memory_space<vmem>>, vector<1x8x384xf32>,
    %c0_i32_96 = arith.constant 0 : i32
    %195 = vector.broadcast %c0_i32_96 : i32 to vector<8x384xi32>
    %196 = arith.cmpi sge, %26, %195 : vector<8x384xi32>
    %c5_i32 = arith.constant 5 : i32
    %197 = vector.broadcast %c5_i32 : i32 to vector<8x384xi32>
    %198 = arith.cmpi slt, %26, %197 : vector<8x384xi32>
    %199 = arith.andi %196, %198 : vector<8x384xi1>
    %200 = arith.extui %199 : vector<8x384xi1> to vector<8x384xi32>
    %201 = arith.sitofp %200 : vector<8x384xi32> to vector<8x384xf32>
    %c4 = arith.constant 4 : index
    %c0_97 = arith.constant 0 : index
    %202 = vector.load %arg4[%c4, %c0_97] : memref<25x384xf32, #tpu.memory_space<vmem>>, vector<1x384xf32>
    %203 = vector.shape_cast %202 : vector<1x384xf32> to vector<1x384xf32>
    %204 = vector.broadcast %203 : vector<1x384xf32> to vector<8x384xf32>
    %205 = arith.mulf %204, %201 : vector<8x384xf32>
    %c4_98 = arith.constant 4 : index
    %c0_99 = arith.constant 0 : index
    %c0_100 = arith.constant 0 : index
    %206 = vector.load %arg8[%c4_98, %c0_99, %c0_100] : memref<25x8x384xf32, #tpu.memory_space<vmem>>, vector<1x8x384xf32>
    %207 = vector.shape_cast %206 : vector<1x8x384xf32> to vector<8x384xf32>
    %208 = vector.shape_cast %205 : vector<8x384xf32> to vector<1x8x384xf32>
    tpu.vector_store %arg8[%c4_98, %c0_99, %c0_100], %208 {strides = array<i32>} : memref<25x8x384xf32, #tpu.memory_space<vmem>>, vector<1x8x384xf32>,
    %c9 = arith.constant 9 : index
    %c0_101 = arith.constant 0 : index
    %209 = vector.load %arg4[%c9, %c0_101] : memref<25x384xf32, #tpu.memory_space<vmem>>, vector<1x384xf32>
    %210 = vector.shape_cast %209 : vector<1x384xf32> to vector<1x384xf32>
    %211 = vector.broadcast %210 : vector<1x384xf32> to vector<8x384xf32>
    %212 = arith.mulf %211, %201 : vector<8x384xf32>
    %c9_102 = arith.constant 9 : index
    %c0_103 = arith.constant 0 : index
    %c0_104 = arith.constant 0 : index
    %213 = vector.load %arg8[%c9_102, %c0_103, %c0_104] : memref<25x8x384xf32, #tpu.memory_space<vmem>>, vector<1x8x384xf32>
    %214 = vector.shape_cast %213 : vector<1x8x384xf32> to vector<8x384xf32>
    %215 = vector.shape_cast %212 : vector<8x384xf32> to vector<1x8x384xf32>
    tpu.vector_store %arg8[%c9_102, %c0_103, %c0_104], %215 {strides = array<i32>} : memref<25x8x384xf32, #tpu.memory_space<vmem>>, vector<1x8x384xf32>,
    %c14 = arith.constant 14 : index
    %c0_105 = arith.constant 0 : index
    %216 = vector.load %arg4[%c14, %c0_105] : memref<25x384xf32, #tpu.memory_space<vmem>>, vector<1x384xf32>
    %217 = vector.shape_cast %216 : vector<1x384xf32> to vector<1x384xf32>
    %218 = vector.broadcast %217 : vector<1x384xf32> to vector<8x384xf32>
    %219 = arith.mulf %218, %201 : vector<8x384xf32>
    %c14_106 = arith.constant 14 : index
    %c0_107 = arith.constant 0 : index
    %c0_108 = arith.constant 0 : index
    %220 = vector.load %arg8[%c14_106, %c0_107, %c0_108] : memref<25x8x384xf32, #tpu.memory_space<vmem>>, vector<1x8x384xf32>
    %221 = vector.shape_cast %220 : vector<1x8x384xf32> to vector<8x384xf32>
    %222 = vector.shape_cast %219 : vector<8x384xf32> to vector<1x8x384xf32>
    tpu.vector_store %arg8[%c14_106, %c0_107, %c0_108], %222 {strides = array<i32>} : memref<25x8x384xf32, #tpu.memory_space<vmem>>, vector<1x8x384xf32>,
    %c19 = arith.constant 19 : index
    %c0_109 = arith.constant 0 : index
    %223 = vector.load %arg4[%c19, %c0_109] : memref<25x384xf32, #tpu.memory_space<vmem>>, vector<1x384xf32>
    %224 = vector.shape_cast %223 : vector<1x384xf32> to vector<1x384xf32>
    %225 = vector.broadcast %224 : vector<1x384xf32> to vector<8x384xf32>
    %226 = arith.mulf %225, %201 : vector<8x384xf32>
    %c19_110 = arith.constant 19 : index
    %c0_111 = arith.constant 0 : index
    %c0_112 = arith.constant 0 : index
    %227 = vector.load %arg8[%c19_110, %c0_111, %c0_112] : memref<25x8x384xf32, #tpu.memory_space<vmem>>, vector<1x8x384xf32>
    %228 = vector.shape_cast %227 : vector<1x8x384xf32> to vector<8x384xf32>
    %229 = vector.shape_cast %226 : vector<8x384xf32> to vector<1x8x384xf32>
    tpu.vector_store %arg8[%c19_110, %c0_111, %c0_112], %229 {strides = array<i32>} : memref<25x8x384xf32, #tpu.memory_space<vmem>>, vector<1x8x384xf32>,
    %c24 = arith.constant 24 : index
    %c0_113 = arith.constant 0 : index
    %230 = vector.load %arg4[%c24, %c0_113] : memref<25x384xf32, #tpu.memory_space<vmem>>, vector<1x384xf32>
    %231 = vector.shape_cast %230 : vector<1x384xf32> to vector<1x384xf32>
    %232 = vector.broadcast %231 : vector<1x384xf32> to vector<8x384xf32>
    %233 = arith.mulf %232, %201 : vector<8x384xf32>
    %c24_114 = arith.constant 24 : index
    %c0_115 = arith.constant 0 : index
    %c0_116 = arith.constant 0 : index
    %234 = vector.load %arg8[%c24_114, %c0_115, %c0_116] : memref<25x8x384xf32, #tpu.memory_space<vmem>>, vector<1x8x384xf32>
    %235 = vector.shape_cast %234 : vector<1x8x384xf32> to vector<8x384xf32>
    %236 = vector.shape_cast %233 : vector<8x384xf32> to vector<1x8x384xf32>
    tpu.vector_store %arg8[%c24_114, %c0_115, %c0_116], %236 {strides = array<i32>} : memref<25x8x384xf32, #tpu.memory_space<vmem>>, vector<1x8x384xf32>,
    %c0_117 = arith.constant 0 : index
    %c0_118 = arith.constant 0 : index
    %c0_119 = arith.constant 0 : index
    %237 = vector.load %arg1[%c0_117, %c0_118, %c0_119] : memref<7x8x384xf32, #tpu.memory_space<vmem>>, vector<1x8x384xf32>
    %238 = vector.shape_cast %237 : vector<1x8x384xf32> to vector<8x384xf32>
    %239 = arith.mulf %238, %23 : vector<8x384xf32>
    %240 = arith.addf %239, %25 : vector<8x384xf32>
    %cst_120 = arith.constant 0.000000e+00 : f32
    %241 = vector.broadcast %cst_120 : f32 to vector<8x384xf32>
    %242 = arith.maximumf %240, %241 : vector<8x384xf32>
    %c2_i32_121 = arith.constant 2 : i32
    %243 = tpu.dynamic_rotate %242 by %c2_i32_121 dim 0 : vector<8x384xf32>, i32 -> vector<8x384xf32>
    %c0_122 = arith.constant 0 : index
    %c0_123 = arith.constant 0 : index
    %c0_124 = arith.constant 0 : index
    %244 = vector.load %arg8[%c0_122, %c0_123, %c0_124] : memref<25x8x384xf32, #tpu.memory_space<vmem>>, vector<1x8x384xf32>
    %245 = vector.shape_cast %244 : vector<1x8x384xf32> to vector<8x384xf32>
    %246 = arith.mulf %243, %245 : vector<8x384xf32>
    %c5_125 = arith.constant 5 : index
    %c0_126 = arith.constant 0 : index
    %c0_127 = arith.constant 0 : index
    %247 = vector.load %arg8[%c5_125, %c0_126, %c0_127] : memref<25x8x384xf32, #tpu.memory_space<vmem>>, vector<1x8x384xf32>
    %248 = vector.shape_cast %247 : vector<1x8x384xf32> to vector<8x384xf32>
    %249 = arith.mulf %243, %248 : vector<8x384xf32>
    %c10_128 = arith.constant 10 : index
    %c0_129 = arith.constant 0 : index
    %c0_130 = arith.constant 0 : index
    %250 = vector.load %arg8[%c10_128, %c0_129, %c0_130] : memref<25x8x384xf32, #tpu.memory_space<vmem>>, vector<1x8x384xf32>
    %251 = vector.shape_cast %250 : vector<1x8x384xf32> to vector<8x384xf32>
    %252 = arith.mulf %243, %251 : vector<8x384xf32>
    %c1_i32_131 = arith.constant 1 : i32
    %253 = tpu.dynamic_rotate %242 by %c1_i32_131 dim 0 : vector<8x384xf32>, i32 -> vector<8x384xf32>
    %c1_132 = arith.constant 1 : index
    %c0_133 = arith.constant 0 : index
    %c0_134 = arith.constant 0 : index
    %254 = vector.load %arg8[%c1_132, %c0_133, %c0_134] : memref<25x8x384xf32, #tpu.memory_space<vmem>>, vector<1x8x384xf32>
    %255 = vector.shape_cast %254 : vector<1x8x384xf32> to vector<8x384xf32>
    %256 = arith.mulf %253, %255 : vector<8x384xf32>
    %257 = arith.addf %246, %256 : vector<8x384xf32>
    %c6_135 = arith.constant 6 : index
    %c0_136 = arith.constant 0 : index
    %c0_137 = arith.constant 0 : index
    %258 = vector.load %arg8[%c6_135, %c0_136, %c0_137] : memref<25x8x384xf32, #tpu.memory_space<vmem>>, vector<1x8x384xf32>
    %259 = vector.shape_cast %258 : vector<1x8x384xf32> to vector<8x384xf32>
    %260 = arith.mulf %253, %259 : vector<8x384xf32>
    %261 = arith.addf %249, %260 : vector<8x384xf32>
    %c11_138 = arith.constant 11 : index
    %c0_139 = arith.constant 0 : index
    %c0_140 = arith.constant 0 : index
    %262 = vector.load %arg8[%c11_138, %c0_139, %c0_140] : memref<25x8x384xf32, #tpu.memory_space<vmem>>, vector<1x8x384xf32>
    %263 = vector.shape_cast %262 : vector<1x8x384xf32> to vector<8x384xf32>
    %264 = arith.mulf %253, %263 : vector<8x384xf32>
    %265 = arith.addf %252, %264 : vector<8x384xf32>
    %c2_141 = arith.constant 2 : index
    %c0_142 = arith.constant 0 : index
    %c0_143 = arith.constant 0 : index
    %266 = vector.load %arg8[%c2_141, %c0_142, %c0_143] : memref<25x8x384xf32, #tpu.memory_space<vmem>>, vector<1x8x384xf32>
    %267 = vector.shape_cast %266 : vector<1x8x384xf32> to vector<8x384xf32>
    %268 = arith.mulf %242, %267 : vector<8x384xf32>
    %269 = arith.addf %257, %268 : vector<8x384xf32>
    %c7_144 = arith.constant 7 : index
    %c0_145 = arith.constant 0 : index
    %c0_146 = arith.constant 0 : index
    %270 = vector.load %arg8[%c7_144, %c0_145, %c0_146] : memref<25x8x384xf32, #tpu.memory_space<vmem>>, vector<1x8x384xf32>
    %271 = vector.shape_cast %270 : vector<1x8x384xf32> to vector<8x384xf32>
    %272 = arith.mulf %242, %271 : vector<8x384xf32>
    %273 = arith.addf %261, %272 : vector<8x384xf32>
    %c12_147 = arith.constant 12 : index
    %c0_148 = arith.constant 0 : index
    %c0_149 = arith.constant 0 : index
    %274 = vector.load %arg8[%c12_147, %c0_148, %c0_149] : memref<25x8x384xf32, #tpu.memory_space<vmem>>, vector<1x8x384xf32>
    %275 = vector.shape_cast %274 : vector<1x8x384xf32> to vector<8x384xf32>
    %276 = arith.mulf %242, %275 : vector<8x384xf32>
    %277 = arith.addf %265, %276 : vector<8x384xf32>
    %c7_i32_150 = arith.constant 7 : i32
    %278 = tpu.dynamic_rotate %242 by %c7_i32_150 dim 0 : vector<8x384xf32>, i32 -> vector<8x384xf32>
    %c3_151 = arith.constant 3 : index
    %c0_152 = arith.constant 0 : index
    %c0_153 = arith.constant 0 : index
    %279 = vector.load %arg8[%c3_151, %c0_152, %c0_153] : memref<25x8x384xf32, #tpu.memory_space<vmem>>, vector<1x8x384xf32>
    %280 = vector.shape_cast %279 : vector<1x8x384xf32> to vector<8x384xf32>
    %281 = arith.mulf %278, %280 : vector<8x384xf32>
    %282 = arith.addf %269, %281 : vector<8x384xf32>
    %c8_154 = arith.constant 8 : index
    %c0_155 = arith.constant 0 : index
    %c0_156 = arith.constant 0 : index
    %283 = vector.load %arg8[%c8_154, %c0_155, %c0_156] : memref<25x8x384xf32, #tpu.memory_space<vmem>>, vector<1x8x384xf32>
    %284 = vector.shape_cast %283 : vector<1x8x384xf32> to vector<8x384xf32>
    %285 = arith.mulf %278, %284 : vector<8x384xf32>
    %286 = arith.addf %273, %285 : vector<8x384xf32>
    %c13_157 = arith.constant 13 : index
    %c0_158 = arith.constant 0 : index
    %c0_159 = arith.constant 0 : index
    %287 = vector.load %arg8[%c13_157, %c0_158, %c0_159] : memref<25x8x384xf32, #tpu.memory_space<vmem>>, vector<1x8x384xf32>
    %288 = vector.shape_cast %287 : vector<1x8x384xf32> to vector<8x384xf32>
    %289 = arith.mulf %278, %288 : vector<8x384xf32>
    %290 = arith.addf %277, %289 : vector<8x384xf32>
    %c6_i32_160 = arith.constant 6 : i32
    %291 = tpu.dynamic_rotate %242 by %c6_i32_160 dim 0 : vector<8x384xf32>, i32 -> vector<8x384xf32>
    %c4_161 = arith.constant 4 : index
    %c0_162 = arith.constant 0 : index
    %c0_163 = arith.constant 0 : index
    %292 = vector.load %arg8[%c4_161, %c0_162, %c0_163] : memref<25x8x384xf32, #tpu.memory_space<vmem>>, vector<1x8x384xf32>
    %293 = vector.shape_cast %292 : vector<1x8x384xf32> to vector<8x384xf32>
    %294 = arith.mulf %291, %293 : vector<8x384xf32>
    %295 = arith.addf %282, %294 : vector<8x384xf32>
    %c9_164 = arith.constant 9 : index
    %c0_165 = arith.constant 0 : index
    %c0_166 = arith.constant 0 : index
    %296 = vector.load %arg8[%c9_164, %c0_165, %c0_166] : memref<25x8x384xf32, #tpu.memory_space<vmem>>, vector<1x8x384xf32>
    %297 = vector.shape_cast %296 : vector<1x8x384xf32> to vector<8x384xf32>
    %298 = arith.mulf %291, %297 : vector<8x384xf32>
    %299 = arith.addf %286, %298 : vector<8x384xf32>
    %c14_167 = arith.constant 14 : index
    %c0_168 = arith.constant 0 : index
    %c0_169 = arith.constant 0 : index
    %300 = vector.load %arg8[%c14_167, %c0_168, %c0_169] : memref<25x8x384xf32, #tpu.memory_space<vmem>>, vector<1x8x384xf32>
    %301 = vector.shape_cast %300 : vector<1x8x384xf32> to vector<8x384xf32>
    %302 = arith.mulf %291, %301 : vector<8x384xf32>
    %303 = arith.addf %290, %302 : vector<8x384xf32>
    %c1_170 = arith.constant 1 : index
    %c0_171 = arith.constant 0 : index
    %c0_172 = arith.constant 0 : index
    %304 = vector.load %arg1[%c1_170, %c0_171, %c0_172] : memref<7x8x384xf32, #tpu.memory_space<vmem>>, vector<1x8x384xf32>
    %305 = vector.shape_cast %304 : vector<1x8x384xf32> to vector<8x384xf32>
    %306 = arith.mulf %305, %23 : vector<8x384xf32>
    %307 = arith.addf %306, %25 : vector<8x384xf32>
    %cst_173 = arith.constant 0.000000e+00 : f32
    %308 = vector.broadcast %cst_173 : f32 to vector<8x384xf32>
    %309 = arith.maximumf %307, %308 : vector<8x384xf32>
    %c2_i32_174 = arith.constant 2 : i32
    %310 = tpu.dynamic_rotate %309 by %c2_i32_174 dim 0 : vector<8x384xf32>, i32 -> vector<8x384xf32>
    %c0_175 = arith.constant 0 : index
    %c0_176 = arith.constant 0 : index
    %c0_177 = arith.constant 0 : index
    %311 = vector.load %arg8[%c0_175, %c0_176, %c0_177] : memref<25x8x384xf32, #tpu.memory_space<vmem>>, vector<1x8x384xf32>
    %312 = vector.shape_cast %311 : vector<1x8x384xf32> to vector<8x384xf32>
    %313 = arith.mulf %310, %312 : vector<8x384xf32>
    %c5_178 = arith.constant 5 : index
    %c0_179 = arith.constant 0 : index
    %c0_180 = arith.constant 0 : index
    %314 = vector.load %arg8[%c5_178, %c0_179, %c0_180] : memref<25x8x384xf32, #tpu.memory_space<vmem>>, vector<1x8x384xf32>
    %315 = vector.shape_cast %314 : vector<1x8x384xf32> to vector<8x384xf32>
    %316 = arith.mulf %310, %315 : vector<8x384xf32>
    %317 = arith.addf %295, %316 : vector<8x384xf32>
    %c10_181 = arith.constant 10 : index
    %c0_182 = arith.constant 0 : index
    %c0_183 = arith.constant 0 : index
    %318 = vector.load %arg8[%c10_181, %c0_182, %c0_183] : memref<25x8x384xf32, #tpu.memory_space<vmem>>, vector<1x8x384xf32>
    %319 = vector.shape_cast %318 : vector<1x8x384xf32> to vector<8x384xf32>
    %320 = arith.mulf %310, %319 : vector<8x384xf32>
    %321 = arith.addf %299, %320 : vector<8x384xf32>
    %c15_184 = arith.constant 15 : index
    %c0_185 = arith.constant 0 : index
    %c0_186 = arith.constant 0 : index
    %322 = vector.load %arg8[%c15_184, %c0_185, %c0_186] : memref<25x8x384xf32, #tpu.memory_space<vmem>>, vector<1x8x384xf32>
    %323 = vector.shape_cast %322 : vector<1x8x384xf32> to vector<8x384xf32>
    %324 = arith.mulf %310, %323 : vector<8x384xf32>
    %325 = arith.addf %303, %324 : vector<8x384xf32>
    %c1_i32_187 = arith.constant 1 : i32
    %326 = tpu.dynamic_rotate %309 by %c1_i32_187 dim 0 : vector<8x384xf32>, i32 -> vector<8x384xf32>
    %c1_188 = arith.constant 1 : index
    %c0_189 = arith.constant 0 : index
    %c0_190 = arith.constant 0 : index
    %327 = vector.load %arg8[%c1_188, %c0_189, %c0_190] : memref<25x8x384xf32, #tpu.memory_space<vmem>>, vector<1x8x384xf32>
    %328 = vector.shape_cast %327 : vector<1x8x384xf32> to vector<8x384xf32>
    %329 = arith.mulf %326, %328 : vector<8x384xf32>
    %330 = arith.addf %313, %329 : vector<8x384xf32>
    %c6_191 = arith.constant 6 : index
    %c0_192 = arith.constant 0 : index
    %c0_193 = arith.constant 0 : index
    %331 = vector.load %arg8[%c6_191, %c0_192, %c0_193] : memref<25x8x384xf32, #tpu.memory_space<vmem>>, vector<1x8x384xf32>
    %332 = vector.shape_cast %331 : vector<1x8x384xf32> to vector<8x384xf32>
    %333 = arith.mulf %326, %332 : vector<8x384xf32>
    %334 = arith.addf %317, %333 : vector<8x384xf32>
    %c11_194 = arith.constant 11 : index
    %c0_195 = arith.constant 0 : index
    %c0_196 = arith.constant 0 : index
    %335 = vector.load %arg8[%c11_194, %c0_195, %c0_196] : memref<25x8x384xf32, #tpu.memory_space<vmem>>, vector<1x8x384xf32>
    %336 = vector.shape_cast %335 : vector<1x8x384xf32> to vector<8x384xf32>
    %337 = arith.mulf %326, %336 : vector<8x384xf32>
    %338 = arith.addf %321, %337 : vector<8x384xf32>
    %c16_197 = arith.constant 16 : index
    %c0_198 = arith.constant 0 : index
    %c0_199 = arith.constant 0 : index
    %339 = vector.load %arg8[%c16_197, %c0_198, %c0_199] : memref<25x8x384xf32, #tpu.memory_space<vmem>>, vector<1x8x384xf32>
    %340 = vector.shape_cast %339 : vector<1x8x384xf32> to vector<8x384xf32>
    %341 = arith.mulf %326, %340 : vector<8x384xf32>
    %342 = arith.addf %325, %341 : vector<8x384xf32>
    %c2_200 = arith.constant 2 : index
    %c0_201 = arith.constant 0 : index
    %c0_202 = arith.constant 0 : index
    %343 = vector.load %arg8[%c2_200, %c0_201, %c0_202] : memref<25x8x384xf32, #tpu.memory_space<vmem>>, vector<1x8x384xf32>
    %344 = vector.shape_cast %343 : vector<1x8x384xf32> to vector<8x384xf32>
    %345 = arith.mulf %309, %344 : vector<8x384xf32>
    %346 = arith.addf %330, %345 : vector<8x384xf32>
    %c7_203 = arith.constant 7 : index
    %c0_204 = arith.constant 0 : index
    %c0_205 = arith.constant 0 : index
    %347 = vector.load %arg8[%c7_203, %c0_204, %c0_205] : memref<25x8x384xf32, #tpu.memory_space<vmem>>, vector<1x8x384xf32>
    %348 = vector.shape_cast %347 : vector<1x8x384xf32> to vector<8x384xf32>
    %349 = arith.mulf %309, %348 : vector<8x384xf32>
    %350 = arith.addf %334, %349 : vector<8x384xf32>
    %c12_206 = arith.constant 12 : index
    %c0_207 = arith.constant 0 : index
    %c0_208 = arith.constant 0 : index
    %351 = vector.load %arg8[%c12_206, %c0_207, %c0_208] : memref<25x8x384xf32, #tpu.memory_space<vmem>>, vector<1x8x384xf32>
    %352 = vector.shape_cast %351 : vector<1x8x384xf32> to vector<8x384xf32>
    %353 = arith.mulf %309, %352 : vector<8x384xf32>
    %354 = arith.addf %338, %353 : vector<8x384xf32>
    %c17_209 = arith.constant 17 : index
    %c0_210 = arith.constant 0 : index
    %c0_211 = arith.constant 0 : index
    %355 = vector.load %arg8[%c17_209, %c0_210, %c0_211] : memref<25x8x384xf32, #tpu.memory_space<vmem>>, vector<1x8x384xf32>
    %356 = vector.shape_cast %355 : vector<1x8x384xf32> to vector<8x384xf32>
    %357 = arith.mulf %309, %356 : vector<8x384xf32>
    %358 = arith.addf %342, %357 : vector<8x384xf32>
    %c7_i32_212 = arith.constant 7 : i32
    %359 = tpu.dynamic_rotate %309 by %c7_i32_212 dim 0 : vector<8x384xf32>, i32 -> vector<8x384xf32>
    %c3_213 = arith.constant 3 : index
    %c0_214 = arith.constant 0 : index
    %c0_215 = arith.constant 0 : index
    %360 = vector.load %arg8[%c3_213, %c0_214, %c0_215] : memref<25x8x384xf32, #tpu.memory_space<vmem>>, vector<1x8x384xf32>
    %361 = vector.shape_cast %360 : vector<1x8x384xf32> to vector<8x384xf32>
    %362 = arith.mulf %359, %361 : vector<8x384xf32>
    %363 = arith.addf %346, %362 : vector<8x384xf32>
    %c8_216 = arith.constant 8 : index
    %c0_217 = arith.constant 0 : index
    %c0_218 = arith.constant 0 : index
    %364 = vector.load %arg8[%c8_216, %c0_217, %c0_218] : memref<25x8x384xf32, #tpu.memory_space<vmem>>, vector<1x8x384xf32>
    %365 = vector.shape_cast %364 : vector<1x8x384xf32> to vector<8x384xf32>
    %366 = arith.mulf %359, %365 : vector<8x384xf32>
    %367 = arith.addf %350, %366 : vector<8x384xf32>
    %c13_219 = arith.constant 13 : index
    %c0_220 = arith.constant 0 : index
    %c0_221 = arith.constant 0 : index
    %368 = vector.load %arg8[%c13_219, %c0_220, %c0_221] : memref<25x8x384xf32, #tpu.memory_space<vmem>>, vector<1x8x384xf32>
    %369 = vector.shape_cast %368 : vector<1x8x384xf32> to vector<8x384xf32>
    %370 = arith.mulf %359, %369 : vector<8x384xf32>
    %371 = arith.addf %354, %370 : vector<8x384xf32>
    %c18_222 = arith.constant 18 : index
    %c0_223 = arith.constant 0 : index
    %c0_224 = arith.constant 0 : index
    %372 = vector.load %arg8[%c18_222, %c0_223, %c0_224] : memref<25x8x384xf32, #tpu.memory_space<vmem>>, vector<1x8x384xf32>
    %373 = vector.shape_cast %372 : vector<1x8x384xf32> to vector<8x384xf32>
    %374 = arith.mulf %359, %373 : vector<8x384xf32>
    %375 = arith.addf %358, %374 : vector<8x384xf32>
    %c6_i32_225 = arith.constant 6 : i32
    %376 = tpu.dynamic_rotate %309 by %c6_i32_225 dim 0 : vector<8x384xf32>, i32 -> vector<8x384xf32>
    %c4_226 = arith.constant 4 : index
    %c0_227 = arith.constant 0 : index
    %c0_228 = arith.constant 0 : index
    %377 = vector.load %arg8[%c4_226, %c0_227, %c0_228] : memref<25x8x384xf32, #tpu.memory_space<vmem>>, vector<1x8x384xf32>
    %378 = vector.shape_cast %377 : vector<1x8x384xf32> to vector<8x384xf32>
    %379 = arith.mulf %376, %378 : vector<8x384xf32>
    %380 = arith.addf %363, %379 : vector<8x384xf32>
    %c9_229 = arith.constant 9 : index
    %c0_230 = arith.constant 0 : index
    %c0_231 = arith.constant 0 : index
    %381 = vector.load %arg8[%c9_229, %c0_230, %c0_231] : memref<25x8x384xf32, #tpu.memory_space<vmem>>, vector<1x8x384xf32>
    %382 = vector.shape_cast %381 : vector<1x8x384xf32> to vector<8x384xf32>
    %383 = arith.mulf %376, %382 : vector<8x384xf32>
    %384 = arith.addf %367, %383 : vector<8x384xf32>
    %c14_232 = arith.constant 14 : index
    %c0_233 = arith.constant 0 : index
    %c0_234 = arith.constant 0 : index
    %385 = vector.load %arg8[%c14_232, %c0_233, %c0_234] : memref<25x8x384xf32, #tpu.memory_space<vmem>>, vector<1x8x384xf32>
    %386 = vector.shape_cast %385 : vector<1x8x384xf32> to vector<8x384xf32>
    %387 = arith.mulf %376, %386 : vector<8x384xf32>
    %388 = arith.addf %371, %387 : vector<8x384xf32>
    %c19_235 = arith.constant 19 : index
    %c0_236 = arith.constant 0 : index
    %c0_237 = arith.constant 0 : index
    %389 = vector.load %arg8[%c19_235, %c0_236, %c0_237] : memref<25x8x384xf32, #tpu.memory_space<vmem>>, vector<1x8x384xf32>
    %390 = vector.shape_cast %389 : vector<1x8x384xf32> to vector<8x384xf32>
    %391 = arith.mulf %376, %390 : vector<8x384xf32>
    %392 = arith.addf %375, %391 : vector<8x384xf32>
    %c2_238 = arith.constant 2 : index
    %c0_239 = arith.constant 0 : index
    %c0_240 = arith.constant 0 : index
    %393 = vector.load %arg1[%c2_238, %c0_239, %c0_240] : memref<7x8x384xf32, #tpu.memory_space<vmem>>, vector<1x8x384xf32>
    %394 = vector.shape_cast %393 : vector<1x8x384xf32> to vector<8x384xf32>
    %395 = arith.mulf %394, %23 : vector<8x384xf32>
    %396 = arith.addf %395, %25 : vector<8x384xf32>
    %cst_241 = arith.constant 0.000000e+00 : f32
    %397 = vector.broadcast %cst_241 : f32 to vector<8x384xf32>
    %398 = arith.maximumf %396, %397 : vector<8x384xf32>
    %c2_i32_242 = arith.constant 2 : i32
    %399 = tpu.dynamic_rotate %398 by %c2_i32_242 dim 0 : vector<8x384xf32>, i32 -> vector<8x384xf32>
    %c0_243 = arith.constant 0 : index
    %c0_244 = arith.constant 0 : index
    %c0_245 = arith.constant 0 : index
    %400 = vector.load %arg8[%c0_243, %c0_244, %c0_245] : memref<25x8x384xf32, #tpu.memory_space<vmem>>, vector<1x8x384xf32>
    %401 = vector.shape_cast %400 : vector<1x8x384xf32> to vector<8x384xf32>
    %402 = arith.mulf %399, %401 : vector<8x384xf32>
    %c5_246 = arith.constant 5 : index
    %c0_247 = arith.constant 0 : index
    %c0_248 = arith.constant 0 : index
    %403 = vector.load %arg8[%c5_246, %c0_247, %c0_248] : memref<25x8x384xf32, #tpu.memory_space<vmem>>, vector<1x8x384xf32>
    %404 = vector.shape_cast %403 : vector<1x8x384xf32> to vector<8x384xf32>
    %405 = arith.mulf %399, %404 : vector<8x384xf32>
    %406 = arith.addf %380, %405 : vector<8x384xf32>
    %c10_249 = arith.constant 10 : index
    %c0_250 = arith.constant 0 : index
    %c0_251 = arith.constant 0 : index
    %407 = vector.load %arg8[%c10_249, %c0_250, %c0_251] : memref<25x8x384xf32, #tpu.memory_space<vmem>>, vector<1x8x384xf32>
    %408 = vector.shape_cast %407 : vector<1x8x384xf32> to vector<8x384xf32>
    %409 = arith.mulf %399, %408 : vector<8x384xf32>
    %410 = arith.addf %384, %409 : vector<8x384xf32>
    %c15_252 = arith.constant 15 : index
    %c0_253 = arith.constant 0 : index
    %c0_254 = arith.constant 0 : index
    %411 = vector.load %arg8[%c15_252, %c0_253, %c0_254] : memref<25x8x384xf32, #tpu.memory_space<vmem>>, vector<1x8x384xf32>
    %412 = vector.shape_cast %411 : vector<1x8x384xf32> to vector<8x384xf32>
    %413 = arith.mulf %399, %412 : vector<8x384xf32>
    %414 = arith.addf %388, %413 : vector<8x384xf32>
    %c20_255 = arith.constant 20 : index
    %c0_256 = arith.constant 0 : index
    %c0_257 = arith.constant 0 : index
    %415 = vector.load %arg8[%c20_255, %c0_256, %c0_257] : memref<25x8x384xf32, #tpu.memory_space<vmem>>, vector<1x8x384xf32>
    %416 = vector.shape_cast %415 : vector<1x8x384xf32> to vector<8x384xf32>
    %417 = arith.mulf %399, %416 : vector<8x384xf32>
    %418 = arith.addf %392, %417 : vector<8x384xf32>
    %c1_i32_258 = arith.constant 1 : i32
    %419 = tpu.dynamic_rotate %398 by %c1_i32_258 dim 0 : vector<8x384xf32>, i32 -> vector<8x384xf32>
    %c1_259 = arith.constant 1 : index
    %c0_260 = arith.constant 0 : index
    %c0_261 = arith.constant 0 : index
    %420 = vector.load %arg8[%c1_259, %c0_260, %c0_261] : memref<25x8x384xf32, #tpu.memory_space<vmem>>, vector<1x8x384xf32>
    %421 = vector.shape_cast %420 : vector<1x8x384xf32> to vector<8x384xf32>
    %422 = arith.mulf %419, %421 : vector<8x384xf32>
    %423 = arith.addf %402, %422 : vector<8x384xf32>
    %c6_262 = arith.constant 6 : index
    %c0_263 = arith.constant 0 : index
    %c0_264 = arith.constant 0 : index
    %424 = vector.load %arg8[%c6_262, %c0_263, %c0_264] : memref<25x8x384xf32, #tpu.memory_space<vmem>>, vector<1x8x384xf32>
    %425 = vector.shape_cast %424 : vector<1x8x384xf32> to vector<8x384xf32>
    %426 = arith.mulf %419, %425 : vector<8x384xf32>
    %427 = arith.addf %406, %426 : vector<8x384xf32>
    %c11_265 = arith.constant 11 : index
    %c0_266 = arith.constant 0 : index
    %c0_267 = arith.constant 0 : index
    %428 = vector.load %arg8[%c11_265, %c0_266, %c0_267] : memref<25x8x384xf32, #tpu.memory_space<vmem>>, vector<1x8x384xf32>
    %429 = vector.shape_cast %428 : vector<1x8x384xf32> to vector<8x384xf32>
    %430 = arith.mulf %419, %429 : vector<8x384xf32>
    %431 = arith.addf %410, %430 : vector<8x384xf32>
    %c16_268 = arith.constant 16 : index
    %c0_269 = arith.constant 0 : index
    %c0_270 = arith.constant 0 : index
    %432 = vector.load %arg8[%c16_268, %c0_269, %c0_270] : memref<25x8x384xf32, #tpu.memory_space<vmem>>, vector<1x8x384xf32>
    %433 = vector.shape_cast %432 : vector<1x8x384xf32> to vector<8x384xf32>
    %434 = arith.mulf %419, %433 : vector<8x384xf32>
    %435 = arith.addf %414, %434 : vector<8x384xf32>
    %c21_271 = arith.constant 21 : index
    %c0_272 = arith.constant 0 : index
    %c0_273 = arith.constant 0 : index
    %436 = vector.load %arg8[%c21_271, %c0_272, %c0_273] : memref<25x8x384xf32, #tpu.memory_space<vmem>>, vector<1x8x384xf32>
    %437 = vector.shape_cast %436 : vector<1x8x384xf32> to vector<8x384xf32>
    %438 = arith.mulf %419, %437 : vector<8x384xf32>
    %439 = arith.addf %418, %438 : vector<8x384xf32>
    %c2_274 = arith.constant 2 : index
    %c0_275 = arith.constant 0 : index
    %c0_276 = arith.constant 0 : index
    %440 = vector.load %arg8[%c2_274, %c0_275, %c0_276] : memref<25x8x384xf32, #tpu.memory_space<vmem>>, vector<1x8x384xf32>
    %441 = vector.shape_cast %440 : vector<1x8x384xf32> to vector<8x384xf32>
    %442 = arith.mulf %398, %441 : vector<8x384xf32>
    %443 = arith.addf %423, %442 : vector<8x384xf32>
    %c7_277 = arith.constant 7 : index
    %c0_278 = arith.constant 0 : index
    %c0_279 = arith.constant 0 : index
    %444 = vector.load %arg8[%c7_277, %c0_278, %c0_279] : memref<25x8x384xf32, #tpu.memory_space<vmem>>, vector<1x8x384xf32>
    %445 = vector.shape_cast %444 : vector<1x8x384xf32> to vector<8x384xf32>
    %446 = arith.mulf %398, %445 : vector<8x384xf32>
    %447 = arith.addf %427, %446 : vector<8x384xf32>
    %c12_280 = arith.constant 12 : index
    %c0_281 = arith.constant 0 : index
    %c0_282 = arith.constant 0 : index
    %448 = vector.load %arg8[%c12_280, %c0_281, %c0_282] : memref<25x8x384xf32, #tpu.memory_space<vmem>>, vector<1x8x384xf32>
    %449 = vector.shape_cast %448 : vector<1x8x384xf32> to vector<8x384xf32>
    %450 = arith.mulf %398, %449 : vector<8x384xf32>
    %451 = arith.addf %431, %450 : vector<8x384xf32>
    %c17_283 = arith.constant 17 : index
    %c0_284 = arith.constant 0 : index
    %c0_285 = arith.constant 0 : index
    %452 = vector.load %arg8[%c17_283, %c0_284, %c0_285] : memref<25x8x384xf32, #tpu.memory_space<vmem>>, vector<1x8x384xf32>
    %453 = vector.shape_cast %452 : vector<1x8x384xf32> to vector<8x384xf32>
    %454 = arith.mulf %398, %453 : vector<8x384xf32>
    %455 = arith.addf %435, %454 : vector<8x384xf32>
    %c22_286 = arith.constant 22 : index
    %c0_287 = arith.constant 0 : index
    %c0_288 = arith.constant 0 : index
    %456 = vector.load %arg8[%c22_286, %c0_287, %c0_288] : memref<25x8x384xf32, #tpu.memory_space<vmem>>, vector<1x8x384xf32>
    %457 = vector.shape_cast %456 : vector<1x8x384xf32> to vector<8x384xf32>
    %458 = arith.mulf %398, %457 : vector<8x384xf32>
    %459 = arith.addf %439, %458 : vector<8x384xf32>
    %c7_i32_289 = arith.constant 7 : i32
    %460 = tpu.dynamic_rotate %398 by %c7_i32_289 dim 0 : vector<8x384xf32>, i32 -> vector<8x384xf32>
    %c3_290 = arith.constant 3 : index
    %c0_291 = arith.constant 0 : index
    %c0_292 = arith.constant 0 : index
    %461 = vector.load %arg8[%c3_290, %c0_291, %c0_292] : memref<25x8x384xf32, #tpu.memory_space<vmem>>, vector<1x8x384xf32>
    %462 = vector.shape_cast %461 : vector<1x8x384xf32> to vector<8x384xf32>
    %463 = arith.mulf %460, %462 : vector<8x384xf32>
    %464 = arith.addf %443, %463 : vector<8x384xf32>
    %c8_293 = arith.constant 8 : index
    %c0_294 = arith.constant 0 : index
    %c0_295 = arith.constant 0 : index
    %465 = vector.load %arg8[%c8_293, %c0_294, %c0_295] : memref<25x8x384xf32, #tpu.memory_space<vmem>>, vector<1x8x384xf32>
    %466 = vector.shape_cast %465 : vector<1x8x384xf32> to vector<8x384xf32>
    %467 = arith.mulf %460, %466 : vector<8x384xf32>
    %468 = arith.addf %447, %467 : vector<8x384xf32>
    %c13_296 = arith.constant 13 : index
    %c0_297 = arith.constant 0 : index
    %c0_298 = arith.constant 0 : index
    %469 = vector.load %arg8[%c13_296, %c0_297, %c0_298] : memref<25x8x384xf32, #tpu.memory_space<vmem>>, vector<1x8x384xf32>
    %470 = vector.shape_cast %469 : vector<1x8x384xf32> to vector<8x384xf32>
    %471 = arith.mulf %460, %470 : vector<8x384xf32>
    %472 = arith.addf %451, %471 : vector<8x384xf32>
    %c18_299 = arith.constant 18 : index
    %c0_300 = arith.constant 0 : index
    %c0_301 = arith.constant 0 : index
    %473 = vector.load %arg8[%c18_299, %c0_300, %c0_301] : memref<25x8x384xf32, #tpu.memory_space<vmem>>, vector<1x8x384xf32>
    %474 = vector.shape_cast %473 : vector<1x8x384xf32> to vector<8x384xf32>
    %475 = arith.mulf %460, %474 : vector<8x384xf32>
    %476 = arith.addf %455, %475 : vector<8x384xf32>
    %c23_302 = arith.constant 23 : index
    %c0_303 = arith.constant 0 : index
    %c0_304 = arith.constant 0 : index
    %477 = vector.load %arg8[%c23_302, %c0_303, %c0_304] : memref<25x8x384xf32, #tpu.memory_space<vmem>>, vector<1x8x384xf32>
    %478 = vector.shape_cast %477 : vector<1x8x384xf32> to vector<8x384xf32>
    %479 = arith.mulf %460, %478 : vector<8x384xf32>
    %480 = arith.addf %459, %479 : vector<8x384xf32>
    %c6_i32_305 = arith.constant 6 : i32
    %481 = tpu.dynamic_rotate %398 by %c6_i32_305 dim 0 : vector<8x384xf32>, i32 -> vector<8x384xf32>
    %c4_306 = arith.constant 4 : index
    %c0_307 = arith.constant 0 : index
    %c0_308 = arith.constant 0 : index
    %482 = vector.load %arg8[%c4_306, %c0_307, %c0_308] : memref<25x8x384xf32, #tpu.memory_space<vmem>>, vector<1x8x384xf32>
    %483 = vector.shape_cast %482 : vector<1x8x384xf32> to vector<8x384xf32>
    %484 = arith.mulf %481, %483 : vector<8x384xf32>
    %485 = arith.addf %464, %484 : vector<8x384xf32>
    %c9_309 = arith.constant 9 : index
    %c0_310 = arith.constant 0 : index
    %c0_311 = arith.constant 0 : index
    %486 = vector.load %arg8[%c9_309, %c0_310, %c0_311] : memref<25x8x384xf32, #tpu.memory_space<vmem>>, vector<1x8x384xf32>
    %487 = vector.shape_cast %486 : vector<1x8x384xf32> to vector<8x384xf32>
    %488 = arith.mulf %481, %487 : vector<8x384xf32>
    %489 = arith.addf %468, %488 : vector<8x384xf32>
    %c14_312 = arith.constant 14 : index
    %c0_313 = arith.constant 0 : index
    %c0_314 = arith.constant 0 : index
    %490 = vector.load %arg8[%c14_312, %c0_313, %c0_314] : memref<25x8x384xf32, #tpu.memory_space<vmem>>, vector<1x8x384xf32>
    %491 = vector.shape_cast %490 : vector<1x8x384xf32> to vector<8x384xf32>
    %492 = arith.mulf %481, %491 : vector<8x384xf32>
    %493 = arith.addf %472, %492 : vector<8x384xf32>
    %c19_315 = arith.constant 19 : index
    %c0_316 = arith.constant 0 : index
    %c0_317 = arith.constant 0 : index
    %494 = vector.load %arg8[%c19_315, %c0_316, %c0_317] : memref<25x8x384xf32, #tpu.memory_space<vmem>>, vector<1x8x384xf32>
    %495 = vector.shape_cast %494 : vector<1x8x384xf32> to vector<8x384xf32>
    %496 = arith.mulf %481, %495 : vector<8x384xf32>
    %497 = arith.addf %476, %496 : vector<8x384xf32>
    %c24_318 = arith.constant 24 : index
    %c0_319 = arith.constant 0 : index
    %c0_320 = arith.constant 0 : index
    %498 = vector.load %arg8[%c24_318, %c0_319, %c0_320] : memref<25x8x384xf32, #tpu.memory_space<vmem>>, vector<1x8x384xf32>
    %499 = vector.shape_cast %498 : vector<1x8x384xf32> to vector<8x384xf32>
    %500 = arith.mulf %481, %499 : vector<8x384xf32>
    %501 = arith.addf %480, %500 : vector<8x384xf32>
    %c0_321 = arith.constant 0 : index
    %c0_322 = arith.constant 0 : index
    %c0_323 = arith.constant 0 : index
    %502 = vector.load %arg7[%c0_321, %c0_322, %c0_323] : memref<7x8x384xf32, #tpu.memory_space<vmem>>, vector<1x8x384xf32>
    %503 = vector.shape_cast %502 : vector<1x8x384xf32> to vector<8x384xf32>
    %504 = vector.shape_cast %501 : vector<8x384xf32> to vector<1x8x384xf32>
    tpu.vector_store %arg7[%c0_321, %c0_322, %c0_323], %504 {strides = array<i32>} : memref<7x8x384xf32, #tpu.memory_space<vmem>>, vector<1x8x384xf32>,
    %c3_324 = arith.constant 3 : index
    %c0_325 = arith.constant 0 : index
    %c0_326 = arith.constant 0 : index
    %505 = vector.load %arg1[%c3_324, %c0_325, %c0_326] : memref<7x8x384xf32, #tpu.memory_space<vmem>>, vector<1x8x384xf32>
    %506 = vector.shape_cast %505 : vector<1x8x384xf32> to vector<8x384xf32>
    %507 = arith.mulf %506, %23 : vector<8x384xf32>
    %508 = arith.addf %507, %25 : vector<8x384xf32>
    %cst_327 = arith.constant 0.000000e+00 : f32
    %509 = vector.broadcast %cst_327 : f32 to vector<8x384xf32>
    %510 = arith.maximumf %508, %509 : vector<8x384xf32>
    %c2_i32_328 = arith.constant 2 : i32
    %511 = tpu.dynamic_rotate %510 by %c2_i32_328 dim 0 : vector<8x384xf32>, i32 -> vector<8x384xf32>
    %c0_329 = arith.constant 0 : index
    %c0_330 = arith.constant 0 : index
    %c0_331 = arith.constant 0 : index
    %512 = vector.load %arg8[%c0_329, %c0_330, %c0_331] : memref<25x8x384xf32, #tpu.memory_space<vmem>>, vector<1x8x384xf32>
    %513 = vector.shape_cast %512 : vector<1x8x384xf32> to vector<8x384xf32>
    %514 = arith.mulf %511, %513 : vector<8x384xf32>
    %c5_332 = arith.constant 5 : index
    %c0_333 = arith.constant 0 : index
    %c0_334 = arith.constant 0 : index
    %515 = vector.load %arg8[%c5_332, %c0_333, %c0_334] : memref<25x8x384xf32, #tpu.memory_space<vmem>>, vector<1x8x384xf32>
    %516 = vector.shape_cast %515 : vector<1x8x384xf32> to vector<8x384xf32>
    %517 = arith.mulf %511, %516 : vector<8x384xf32>
    %518 = arith.addf %485, %517 : vector<8x384xf32>
    %c10_335 = arith.constant 10 : index
    %c0_336 = arith.constant 0 : index
    %c0_337 = arith.constant 0 : index
    %519 = vector.load %arg8[%c10_335, %c0_336, %c0_337] : memref<25x8x384xf32, #tpu.memory_space<vmem>>, vector<1x8x384xf32>
    %520 = vector.shape_cast %519 : vector<1x8x384xf32> to vector<8x384xf32>
    %521 = arith.mulf %511, %520 : vector<8x384xf32>
    %522 = arith.addf %489, %521 : vector<8x384xf32>
    %c15_338 = arith.constant 15 : index
    %c0_339 = arith.constant 0 : index
    %c0_340 = arith.constant 0 : index
    %523 = vector.load %arg8[%c15_338, %c0_339, %c0_340] : memref<25x8x384xf32, #tpu.memory_space<vmem>>, vector<1x8x384xf32>
    %524 = vector.shape_cast %523 : vector<1x8x384xf32> to vector<8x384xf32>
    %525 = arith.mulf %511, %524 : vector<8x384xf32>
    %526 = arith.addf %493, %525 : vector<8x384xf32>
    %c20_341 = arith.constant 20 : index
    %c0_342 = arith.constant 0 : index
    %c0_343 = arith.constant 0 : index
    %527 = vector.load %arg8[%c20_341, %c0_342, %c0_343] : memref<25x8x384xf32, #tpu.memory_space<vmem>>, vector<1x8x384xf32>
    %528 = vector.shape_cast %527 : vector<1x8x384xf32> to vector<8x384xf32>
    %529 = arith.mulf %511, %528 : vector<8x384xf32>
    %530 = arith.addf %497, %529 : vector<8x384xf32>
    %c1_i32_344 = arith.constant 1 : i32
    %531 = tpu.dynamic_rotate %510 by %c1_i32_344 dim 0 : vector<8x384xf32>, i32 -> vector<8x384xf32>
    %c1_345 = arith.constant 1 : index
    %c0_346 = arith.constant 0 : index
    %c0_347 = arith.constant 0 : index
    %532 = vector.load %arg8[%c1_345, %c0_346, %c0_347] : memref<25x8x384xf32, #tpu.memory_space<vmem>>, vector<1x8x384xf32>
    %533 = vector.shape_cast %532 : vector<1x8x384xf32> to vector<8x384xf32>
    %534 = arith.mulf %531, %533 : vector<8x384xf32>
    %535 = arith.addf %514, %534 : vector<8x384xf32>
    %c6_348 = arith.constant 6 : index
    %c0_349 = arith.constant 0 : index
    %c0_350 = arith.constant 0 : index
    %536 = vector.load %arg8[%c6_348, %c0_349, %c0_350] : memref<25x8x384xf32, #tpu.memory_space<vmem>>, vector<1x8x384xf32>
    %537 = vector.shape_cast %536 : vector<1x8x384xf32> to vector<8x384xf32>
    %538 = arith.mulf %531, %537 : vector<8x384xf32>
    %539 = arith.addf %518, %538 : vector<8x384xf32>
    %c11_351 = arith.constant 11 : index
    %c0_352 = arith.constant 0 : index
    %c0_353 = arith.constant 0 : index
    %540 = vector.load %arg8[%c11_351, %c0_352, %c0_353] : memref<25x8x384xf32, #tpu.memory_space<vmem>>, vector<1x8x384xf32>
    %541 = vector.shape_cast %540 : vector<1x8x384xf32> to vector<8x384xf32>
    %542 = arith.mulf %531, %541 : vector<8x384xf32>
    %543 = arith.addf %522, %542 : vector<8x384xf32>
    %c16_354 = arith.constant 16 : index
    %c0_355 = arith.constant 0 : index
    %c0_356 = arith.constant 0 : index
    %544 = vector.load %arg8[%c16_354, %c0_355, %c0_356] : memref<25x8x384xf32, #tpu.memory_space<vmem>>, vector<1x8x384xf32>
    %545 = vector.shape_cast %544 : vector<1x8x384xf32> to vector<8x384xf32>
    %546 = arith.mulf %531, %545 : vector<8x384xf32>
    %547 = arith.addf %526, %546 : vector<8x384xf32>
    %c21_357 = arith.constant 21 : index
    %c0_358 = arith.constant 0 : index
    %c0_359 = arith.constant 0 : index
    %548 = vector.load %arg8[%c21_357, %c0_358, %c0_359] : memref<25x8x384xf32, #tpu.memory_space<vmem>>, vector<1x8x384xf32>
    %549 = vector.shape_cast %548 : vector<1x8x384xf32> to vector<8x384xf32>
    %550 = arith.mulf %531, %549 : vector<8x384xf32>
    %551 = arith.addf %530, %550 : vector<8x384xf32>
    %c2_360 = arith.constant 2 : index
    %c0_361 = arith.constant 0 : index
    %c0_362 = arith.constant 0 : index
    %552 = vector.load %arg8[%c2_360, %c0_361, %c0_362] : memref<25x8x384xf32, #tpu.memory_space<vmem>>, vector<1x8x384xf32>
    %553 = vector.shape_cast %552 : vector<1x8x384xf32> to vector<8x384xf32>
    %554 = arith.mulf %510, %553 : vector<8x384xf32>
    %555 = arith.addf %535, %554 : vector<8x384xf32>
    %c7_363 = arith.constant 7 : index
    %c0_364 = arith.constant 0 : index
    %c0_365 = arith.constant 0 : index
    %556 = vector.load %arg8[%c7_363, %c0_364, %c0_365] : memref<25x8x384xf32, #tpu.memory_space<vmem>>, vector<1x8x384xf32>
    %557 = vector.shape_cast %556 : vector<1x8x384xf32> to vector<8x384xf32>
    %558 = arith.mulf %510, %557 : vector<8x384xf32>
    %559 = arith.addf %539, %558 : vector<8x384xf32>
    %c12_366 = arith.constant 12 : index
    %c0_367 = arith.constant 0 : index
    %c0_368 = arith.constant 0 : index
    %560 = vector.load %arg8[%c12_366, %c0_367, %c0_368] : memref<25x8x384xf32, #tpu.memory_space<vmem>>, vector<1x8x384xf32>
    %561 = vector.shape_cast %560 : vector<1x8x384xf32> to vector<8x384xf32>
    %562 = arith.mulf %510, %561 : vector<8x384xf32>
    %563 = arith.addf %543, %562 : vector<8x384xf32>
    %c17_369 = arith.constant 17 : index
    %c0_370 = arith.constant 0 : index
    %c0_371 = arith.constant 0 : index
    %564 = vector.load %arg8[%c17_369, %c0_370, %c0_371] : memref<25x8x384xf32, #tpu.memory_space<vmem>>, vector<1x8x384xf32>
    %565 = vector.shape_cast %564 : vector<1x8x384xf32> to vector<8x384xf32>
    %566 = arith.mulf %510, %565 : vector<8x384xf32>
    %567 = arith.addf %547, %566 : vector<8x384xf32>
    %c22_372 = arith.constant 22 : index
    %c0_373 = arith.constant 0 : index
    %c0_374 = arith.constant 0 : index
    %568 = vector.load %arg8[%c22_372, %c0_373, %c0_374] : memref<25x8x384xf32, #tpu.memory_space<vmem>>, vector<1x8x384xf32>
    %569 = vector.shape_cast %568 : vector<1x8x384xf32> to vector<8x384xf32>
    %570 = arith.mulf %510, %569 : vector<8x384xf32>
    %571 = arith.addf %551, %570 : vector<8x384xf32>
    %c7_i32_375 = arith.constant 7 : i32
    %572 = tpu.dynamic_rotate %510 by %c7_i32_375 dim 0 : vector<8x384xf32>, i32 -> vector<8x384xf32>
    %c3_376 = arith.constant 3 : index
    %c0_377 = arith.constant 0 : index
    %c0_378 = arith.constant 0 : index
    %573 = vector.load %arg8[%c3_376, %c0_377, %c0_378] : memref<25x8x384xf32, #tpu.memory_space<vmem>>, vector<1x8x384xf32>
    %574 = vector.shape_cast %573 : vector<1x8x384xf32> to vector<8x384xf32>
    %575 = arith.mulf %572, %574 : vector<8x384xf32>
    %576 = arith.addf %555, %575 : vector<8x384xf32>
    %c8_379 = arith.constant 8 : index
    %c0_380 = arith.constant 0 : index
    %c0_381 = arith.constant 0 : index
    %577 = vector.load %arg8[%c8_379, %c0_380, %c0_381] : memref<25x8x384xf32, #tpu.memory_space<vmem>>, vector<1x8x384xf32>
    %578 = vector.shape_cast %577 : vector<1x8x384xf32> to vector<8x384xf32>
    %579 = arith.mulf %572, %578 : vector<8x384xf32>
    %580 = arith.addf %559, %579 : vector<8x384xf32>
    %c13_382 = arith.constant 13 : index
    %c0_383 = arith.constant 0 : index
    %c0_384 = arith.constant 0 : index
    %581 = vector.load %arg8[%c13_382, %c0_383, %c0_384] : memref<25x8x384xf32, #tpu.memory_space<vmem>>, vector<1x8x384xf32>
    %582 = vector.shape_cast %581 : vector<1x8x384xf32> to vector<8x384xf32>
    %583 = arith.mulf %572, %582 : vector<8x384xf32>
    %584 = arith.addf %563, %583 : vector<8x384xf32>
    %c18_385 = arith.constant 18 : index
    %c0_386 = arith.constant 0 : index
    %c0_387 = arith.constant 0 : index
    %585 = vector.load %arg8[%c18_385, %c0_386, %c0_387] : memref<25x8x384xf32, #tpu.memory_space<vmem>>, vector<1x8x384xf32>
    %586 = vector.shape_cast %585 : vector<1x8x384xf32> to vector<8x384xf32>
    %587 = arith.mulf %572, %586 : vector<8x384xf32>
    %588 = arith.addf %567, %587 : vector<8x384xf32>
    %c23_388 = arith.constant 23 : index
    %c0_389 = arith.constant 0 : index
    %c0_390 = arith.constant 0 : index
    %589 = vector.load %arg8[%c23_388, %c0_389, %c0_390] : memref<25x8x384xf32, #tpu.memory_space<vmem>>, vector<1x8x384xf32>
    %590 = vector.shape_cast %589 : vector<1x8x384xf32> to vector<8x384xf32>
    %591 = arith.mulf %572, %590 : vector<8x384xf32>
    %592 = arith.addf %571, %591 : vector<8x384xf32>
    %c6_i32_391 = arith.constant 6 : i32
    %593 = tpu.dynamic_rotate %510 by %c6_i32_391 dim 0 : vector<8x384xf32>, i32 -> vector<8x384xf32>
    %c4_392 = arith.constant 4 : index
    %c0_393 = arith.constant 0 : index
    %c0_394 = arith.constant 0 : index
    %594 = vector.load %arg8[%c4_392, %c0_393, %c0_394] : memref<25x8x384xf32, #tpu.memory_space<vmem>>, vector<1x8x384xf32>
    %595 = vector.shape_cast %594 : vector<1x8x384xf32> to vector<8x384xf32>
    %596 = arith.mulf %593, %595 : vector<8x384xf32>
    %597 = arith.addf %576, %596 : vector<8x384xf32>
    %c9_395 = arith.constant 9 : index
    %c0_396 = arith.constant 0 : index
    %c0_397 = arith.constant 0 : index
    %598 = vector.load %arg8[%c9_395, %c0_396, %c0_397] : memref<25x8x384xf32, #tpu.memory_space<vmem>>, vector<1x8x384xf32>
    %599 = vector.shape_cast %598 : vector<1x8x384xf32> to vector<8x384xf32>
    %600 = arith.mulf %593, %599 : vector<8x384xf32>
    %601 = arith.addf %580, %600 : vector<8x384xf32>
    %c14_398 = arith.constant 14 : index
    %c0_399 = arith.constant 0 : index
    %c0_400 = arith.constant 0 : index
    %602 = vector.load %arg8[%c14_398, %c0_399, %c0_400] : memref<25x8x384xf32, #tpu.memory_space<vmem>>, vector<1x8x384xf32>
    %603 = vector.shape_cast %602 : vector<1x8x384xf32> to vector<8x384xf32>
    %604 = arith.mulf %593, %603 : vector<8x384xf32>
    %605 = arith.addf %584, %604 : vector<8x384xf32>
    %c19_401 = arith.constant 19 : index
    %c0_402 = arith.constant 0 : index
    %c0_403 = arith.constant 0 : index
    %606 = vector.load %arg8[%c19_401, %c0_402, %c0_403] : memref<25x8x384xf32, #tpu.memory_space<vmem>>, vector<1x8x384xf32>
    %607 = vector.shape_cast %606 : vector<1x8x384xf32> to vector<8x384xf32>
    %608 = arith.mulf %593, %607 : vector<8x384xf32>
    %609 = arith.addf %588, %608 : vector<8x384xf32>
    %c24_404 = arith.constant 24 : index
    %c0_405 = arith.constant 0 : index
    %c0_406 = arith.constant 0 : index
    %610 = vector.load %arg8[%c24_404, %c0_405, %c0_406] : memref<25x8x384xf32, #tpu.memory_space<vmem>>, vector<1x8x384xf32>
    %611 = vector.shape_cast %610 : vector<1x8x384xf32> to vector<8x384xf32>
    %612 = arith.mulf %593, %611 : vector<8x384xf32>
    %613 = arith.addf %592, %612 : vector<8x384xf32>
    %c1_407 = arith.constant 1 : index
    %c0_408 = arith.constant 0 : index
    %c0_409 = arith.constant 0 : index
    %614 = vector.load %arg7[%c1_407, %c0_408, %c0_409] : memref<7x8x384xf32, #tpu.memory_space<vmem>>, vector<1x8x384xf32>
    %615 = vector.shape_cast %614 : vector<1x8x384xf32> to vector<8x384xf32>
    %616 = vector.shape_cast %613 : vector<8x384xf32> to vector<1x8x384xf32>
    tpu.vector_store %arg7[%c1_407, %c0_408, %c0_409], %616 {strides = array<i32>} : memref<7x8x384xf32, #tpu.memory_space<vmem>>, vector<1x8x384xf32>,
    %c4_410 = arith.constant 4 : index
    %c0_411 = arith.constant 0 : index
    %c0_412 = arith.constant 0 : index
    %617 = vector.load %arg1[%c4_410, %c0_411, %c0_412] : memref<7x8x384xf32, #tpu.memory_space<vmem>>, vector<1x8x384xf32>
    %618 = vector.shape_cast %617 : vector<1x8x384xf32> to vector<8x384xf32>
    %619 = arith.mulf %618, %23 : vector<8x384xf32>
    %620 = arith.addf %619, %25 : vector<8x384xf32>
    %cst_413 = arith.constant 0.000000e+00 : f32
    %621 = vector.broadcast %cst_413 : f32 to vector<8x384xf32>
    %622 = arith.maximumf %620, %621 : vector<8x384xf32>
    %c2_i32_414 = arith.constant 2 : i32
    %623 = tpu.dynamic_rotate %622 by %c2_i32_414 dim 0 : vector<8x384xf32>, i32 -> vector<8x384xf32>
    %c0_415 = arith.constant 0 : index
    %c0_416 = arith.constant 0 : index
    %c0_417 = arith.constant 0 : index
    %624 = vector.load %arg8[%c0_415, %c0_416, %c0_417] : memref<25x8x384xf32, #tpu.memory_space<vmem>>, vector<1x8x384xf32>
    %625 = vector.shape_cast %624 : vector<1x8x384xf32> to vector<8x384xf32>
    %626 = arith.mulf %623, %625 : vector<8x384xf32>
    %c5_418 = arith.constant 5 : index
    %c0_419 = arith.constant 0 : index
    %c0_420 = arith.constant 0 : index
    %627 = vector.load %arg8[%c5_418, %c0_419, %c0_420] : memref<25x8x384xf32, #tpu.memory_space<vmem>>, vector<1x8x384xf32>
    %628 = vector.shape_cast %627 : vector<1x8x384xf32> to vector<8x384xf32>
    %629 = arith.mulf %623, %628 : vector<8x384xf32>
    %630 = arith.addf %597, %629 : vector<8x384xf32>
    %c10_421 = arith.constant 10 : index
    %c0_422 = arith.constant 0 : index
    %c0_423 = arith.constant 0 : index
    %631 = vector.load %arg8[%c10_421, %c0_422, %c0_423] : memref<25x8x384xf32, #tpu.memory_space<vmem>>, vector<1x8x384xf32>
    %632 = vector.shape_cast %631 : vector<1x8x384xf32> to vector<8x384xf32>
    %633 = arith.mulf %623, %632 : vector<8x384xf32>
    %634 = arith.addf %601, %633 : vector<8x384xf32>
    %c15_424 = arith.constant 15 : index
    %c0_425 = arith.constant 0 : index
    %c0_426 = arith.constant 0 : index
    %635 = vector.load %arg8[%c15_424, %c0_425, %c0_426] : memref<25x8x384xf32, #tpu.memory_space<vmem>>, vector<1x8x384xf32>
    %636 = vector.shape_cast %635 : vector<1x8x384xf32> to vector<8x384xf32>
    %637 = arith.mulf %623, %636 : vector<8x384xf32>
    %638 = arith.addf %605, %637 : vector<8x384xf32>
    %c20_427 = arith.constant 20 : index
    %c0_428 = arith.constant 0 : index
    %c0_429 = arith.constant 0 : index
    %639 = vector.load %arg8[%c20_427, %c0_428, %c0_429] : memref<25x8x384xf32, #tpu.memory_space<vmem>>, vector<1x8x384xf32>
    %640 = vector.shape_cast %639 : vector<1x8x384xf32> to vector<8x384xf32>
    %641 = arith.mulf %623, %640 : vector<8x384xf32>
    %642 = arith.addf %609, %641 : vector<8x384xf32>
    %c1_i32_430 = arith.constant 1 : i32
    %643 = tpu.dynamic_rotate %622 by %c1_i32_430 dim 0 : vector<8x384xf32>, i32 -> vector<8x384xf32>
    %c1_431 = arith.constant 1 : index
    %c0_432 = arith.constant 0 : index
    %c0_433 = arith.constant 0 : index
    %644 = vector.load %arg8[%c1_431, %c0_432, %c0_433] : memref<25x8x384xf32, #tpu.memory_space<vmem>>, vector<1x8x384xf32>
    %645 = vector.shape_cast %644 : vector<1x8x384xf32> to vector<8x384xf32>
    %646 = arith.mulf %643, %645 : vector<8x384xf32>
    %647 = arith.addf %626, %646 : vector<8x384xf32>
    %c6_434 = arith.constant 6 : index
    %c0_435 = arith.constant 0 : index
    %c0_436 = arith.constant 0 : index
    %648 = vector.load %arg8[%c6_434, %c0_435, %c0_436] : memref<25x8x384xf32, #tpu.memory_space<vmem>>, vector<1x8x384xf32>
    %649 = vector.shape_cast %648 : vector<1x8x384xf32> to vector<8x384xf32>
    %650 = arith.mulf %643, %649 : vector<8x384xf32>
    %651 = arith.addf %630, %650 : vector<8x384xf32>
    %c11_437 = arith.constant 11 : index
    %c0_438 = arith.constant 0 : index
    %c0_439 = arith.constant 0 : index
    %652 = vector.load %arg8[%c11_437, %c0_438, %c0_439] : memref<25x8x384xf32, #tpu.memory_space<vmem>>, vector<1x8x384xf32>
    %653 = vector.shape_cast %652 : vector<1x8x384xf32> to vector<8x384xf32>
    %654 = arith.mulf %643, %653 : vector<8x384xf32>
    %655 = arith.addf %634, %654 : vector<8x384xf32>
    %c16_440 = arith.constant 16 : index
    %c0_441 = arith.constant 0 : index
    %c0_442 = arith.constant 0 : index
    %656 = vector.load %arg8[%c16_440, %c0_441, %c0_442] : memref<25x8x384xf32, #tpu.memory_space<vmem>>, vector<1x8x384xf32>
    %657 = vector.shape_cast %656 : vector<1x8x384xf32> to vector<8x384xf32>
    %658 = arith.mulf %643, %657 : vector<8x384xf32>
    %659 = arith.addf %638, %658 : vector<8x384xf32>
    %c21_443 = arith.constant 21 : index
    %c0_444 = arith.constant 0 : index
    %c0_445 = arith.constant 0 : index
    %660 = vector.load %arg8[%c21_443, %c0_444, %c0_445] : memref<25x8x384xf32, #tpu.memory_space<vmem>>, vector<1x8x384xf32>
    %661 = vector.shape_cast %660 : vector<1x8x384xf32> to vector<8x384xf32>
    %662 = arith.mulf %643, %661 : vector<8x384xf32>
    %663 = arith.addf %642, %662 : vector<8x384xf32>
    %c2_446 = arith.constant 2 : index
    %c0_447 = arith.constant 0 : index
    %c0_448 = arith.constant 0 : index
    %664 = vector.load %arg8[%c2_446, %c0_447, %c0_448] : memref<25x8x384xf32, #tpu.memory_space<vmem>>, vector<1x8x384xf32>
    %665 = vector.shape_cast %664 : vector<1x8x384xf32> to vector<8x384xf32>
    %666 = arith.mulf %622, %665 : vector<8x384xf32>
    %667 = arith.addf %647, %666 : vector<8x384xf32>
    %c7_449 = arith.constant 7 : index
    %c0_450 = arith.constant 0 : index
    %c0_451 = arith.constant 0 : index
    %668 = vector.load %arg8[%c7_449, %c0_450, %c0_451] : memref<25x8x384xf32, #tpu.memory_space<vmem>>, vector<1x8x384xf32>
    %669 = vector.shape_cast %668 : vector<1x8x384xf32> to vector<8x384xf32>
    %670 = arith.mulf %622, %669 : vector<8x384xf32>
    %671 = arith.addf %651, %670 : vector<8x384xf32>
    %c12_452 = arith.constant 12 : index
    %c0_453 = arith.constant 0 : index
    %c0_454 = arith.constant 0 : index
    %672 = vector.load %arg8[%c12_452, %c0_453, %c0_454] : memref<25x8x384xf32, #tpu.memory_space<vmem>>, vector<1x8x384xf32>
    %673 = vector.shape_cast %672 : vector<1x8x384xf32> to vector<8x384xf32>
    %674 = arith.mulf %622, %673 : vector<8x384xf32>
    %675 = arith.addf %655, %674 : vector<8x384xf32>
    %c17_455 = arith.constant 17 : index
    %c0_456 = arith.constant 0 : index
    %c0_457 = arith.constant 0 : index
    %676 = vector.load %arg8[%c17_455, %c0_456, %c0_457] : memref<25x8x384xf32, #tpu.memory_space<vmem>>, vector<1x8x384xf32>
    %677 = vector.shape_cast %676 : vector<1x8x384xf32> to vector<8x384xf32>
    %678 = arith.mulf %622, %677 : vector<8x384xf32>
    %679 = arith.addf %659, %678 : vector<8x384xf32>
    %c22_458 = arith.constant 22 : index
    %c0_459 = arith.constant 0 : index
    %c0_460 = arith.constant 0 : index
    %680 = vector.load %arg8[%c22_458, %c0_459, %c0_460] : memref<25x8x384xf32, #tpu.memory_space<vmem>>, vector<1x8x384xf32>
    %681 = vector.shape_cast %680 : vector<1x8x384xf32> to vector<8x384xf32>
    %682 = arith.mulf %622, %681 : vector<8x384xf32>
    %683 = arith.addf %663, %682 : vector<8x384xf32>
    %c7_i32_461 = arith.constant 7 : i32
    %684 = tpu.dynamic_rotate %622 by %c7_i32_461 dim 0 : vector<8x384xf32>, i32 -> vector<8x384xf32>
    %c3_462 = arith.constant 3 : index
    %c0_463 = arith.constant 0 : index
    %c0_464 = arith.constant 0 : index
    %685 = vector.load %arg8[%c3_462, %c0_463, %c0_464] : memref<25x8x384xf32, #tpu.memory_space<vmem>>, vector<1x8x384xf32>
    %686 = vector.shape_cast %685 : vector<1x8x384xf32> to vector<8x384xf32>
    %687 = arith.mulf %684, %686 : vector<8x384xf32>
    %688 = arith.addf %667, %687 : vector<8x384xf32>
    %c8_465 = arith.constant 8 : index
    %c0_466 = arith.constant 0 : index
    %c0_467 = arith.constant 0 : index
    %689 = vector.load %arg8[%c8_465, %c0_466, %c0_467] : memref<25x8x384xf32, #tpu.memory_space<vmem>>, vector<1x8x384xf32>
    %690 = vector.shape_cast %689 : vector<1x8x384xf32> to vector<8x384xf32>
    %691 = arith.mulf %684, %690 : vector<8x384xf32>
    %692 = arith.addf %671, %691 : vector<8x384xf32>
    %c13_468 = arith.constant 13 : index
    %c0_469 = arith.constant 0 : index
    %c0_470 = arith.constant 0 : index
    %693 = vector.load %arg8[%c13_468, %c0_469, %c0_470] : memref<25x8x384xf32, #tpu.memory_space<vmem>>, vector<1x8x384xf32>
    %694 = vector.shape_cast %693 : vector<1x8x384xf32> to vector<8x384xf32>
    %695 = arith.mulf %684, %694 : vector<8x384xf32>
    %696 = arith.addf %675, %695 : vector<8x384xf32>
    %c18_471 = arith.constant 18 : index
    %c0_472 = arith.constant 0 : index
    %c0_473 = arith.constant 0 : index
    %697 = vector.load %arg8[%c18_471, %c0_472, %c0_473] : memref<25x8x384xf32, #tpu.memory_space<vmem>>, vector<1x8x384xf32>
    %698 = vector.shape_cast %697 : vector<1x8x384xf32> to vector<8x384xf32>
    %699 = arith.mulf %684, %698 : vector<8x384xf32>
    %700 = arith.addf %679, %699 : vector<8x384xf32>
    %c23_474 = arith.constant 23 : index
    %c0_475 = arith.constant 0 : index
    %c0_476 = arith.constant 0 : index
    %701 = vector.load %arg8[%c23_474, %c0_475, %c0_476] : memref<25x8x384xf32, #tpu.memory_space<vmem>>, vector<1x8x384xf32>
    %702 = vector.shape_cast %701 : vector<1x8x384xf32> to vector<8x384xf32>
    %703 = arith.mulf %684, %702 : vector<8x384xf32>
    %704 = arith.addf %683, %703 : vector<8x384xf32>
    %c6_i32_477 = arith.constant 6 : i32
    %705 = tpu.dynamic_rotate %622 by %c6_i32_477 dim 0 : vector<8x384xf32>, i32 -> vector<8x384xf32>
    %c4_478 = arith.constant 4 : index
    %c0_479 = arith.constant 0 : index
    %c0_480 = arith.constant 0 : index
    %706 = vector.load %arg8[%c4_478, %c0_479, %c0_480] : memref<25x8x384xf32, #tpu.memory_space<vmem>>, vector<1x8x384xf32>
    %707 = vector.shape_cast %706 : vector<1x8x384xf32> to vector<8x384xf32>
    %708 = arith.mulf %705, %707 : vector<8x384xf32>
    %709 = arith.addf %688, %708 : vector<8x384xf32>
    %c9_481 = arith.constant 9 : index
    %c0_482 = arith.constant 0 : index
    %c0_483 = arith.constant 0 : index
    %710 = vector.load %arg8[%c9_481, %c0_482, %c0_483] : memref<25x8x384xf32, #tpu.memory_space<vmem>>, vector<1x8x384xf32>
    %711 = vector.shape_cast %710 : vector<1x8x384xf32> to vector<8x384xf32>
    %712 = arith.mulf %705, %711 : vector<8x384xf32>
    %713 = arith.addf %692, %712 : vector<8x384xf32>
    %c14_484 = arith.constant 14 : index
    %c0_485 = arith.constant 0 : index
    %c0_486 = arith.constant 0 : index
    %714 = vector.load %arg8[%c14_484, %c0_485, %c0_486] : memref<25x8x384xf32, #tpu.memory_space<vmem>>, vector<1x8x384xf32>
    %715 = vector.shape_cast %714 : vector<1x8x384xf32> to vector<8x384xf32>
    %716 = arith.mulf %705, %715 : vector<8x384xf32>
    %717 = arith.addf %696, %716 : vector<8x384xf32>
    %c19_487 = arith.constant 19 : index
    %c0_488 = arith.constant 0 : index
    %c0_489 = arith.constant 0 : index
    %718 = vector.load %arg8[%c19_487, %c0_488, %c0_489] : memref<25x8x384xf32, #tpu.memory_space<vmem>>, vector<1x8x384xf32>
    %719 = vector.shape_cast %718 : vector<1x8x384xf32> to vector<8x384xf32>
    %720 = arith.mulf %705, %719 : vector<8x384xf32>
    %721 = arith.addf %700, %720 : vector<8x384xf32>
    %c24_490 = arith.constant 24 : index
    %c0_491 = arith.constant 0 : index
    %c0_492 = arith.constant 0 : index
    %722 = vector.load %arg8[%c24_490, %c0_491, %c0_492] : memref<25x8x384xf32, #tpu.memory_space<vmem>>, vector<1x8x384xf32>
    %723 = vector.shape_cast %722 : vector<1x8x384xf32> to vector<8x384xf32>
    %724 = arith.mulf %705, %723 : vector<8x384xf32>
    %725 = arith.addf %704, %724 : vector<8x384xf32>
    %c2_493 = arith.constant 2 : index
    %c0_494 = arith.constant 0 : index
    %c0_495 = arith.constant 0 : index
    %726 = vector.load %arg7[%c2_493, %c0_494, %c0_495] : memref<7x8x384xf32, #tpu.memory_space<vmem>>, vector<1x8x384xf32>
    %727 = vector.shape_cast %726 : vector<1x8x384xf32> to vector<8x384xf32>
    %728 = vector.shape_cast %725 : vector<8x384xf32> to vector<1x8x384xf32>
    tpu.vector_store %arg7[%c2_493, %c0_494, %c0_495], %728 {strides = array<i32>} : memref<7x8x384xf32, #tpu.memory_space<vmem>>, vector<1x8x384xf32>,
    %c5_496 = arith.constant 5 : index
    %c0_497 = arith.constant 0 : index
    %c0_498 = arith.constant 0 : index
    %729 = vector.load %arg1[%c5_496, %c0_497, %c0_498] : memref<7x8x384xf32, #tpu.memory_space<vmem>>, vector<1x8x384xf32>
    %730 = vector.shape_cast %729 : vector<1x8x384xf32> to vector<8x384xf32>
    %731 = arith.mulf %730, %23 : vector<8x384xf32>
    %732 = arith.addf %731, %25 : vector<8x384xf32>
    %cst_499 = arith.constant 0.000000e+00 : f32
    %733 = vector.broadcast %cst_499 : f32 to vector<8x384xf32>
    %734 = arith.maximumf %732, %733 : vector<8x384xf32>
    %c2_i32_500 = arith.constant 2 : i32
    %735 = tpu.dynamic_rotate %734 by %c2_i32_500 dim 0 : vector<8x384xf32>, i32 -> vector<8x384xf32>
    %c5_501 = arith.constant 5 : index
    %c0_502 = arith.constant 0 : index
    %c0_503 = arith.constant 0 : index
    %736 = vector.load %arg8[%c5_501, %c0_502, %c0_503] : memref<25x8x384xf32, #tpu.memory_space<vmem>>, vector<1x8x384xf32>
    %737 = vector.shape_cast %736 : vector<1x8x384xf32> to vector<8x384xf32>
    %738 = arith.mulf %735, %737 : vector<8x384xf32>
    %739 = arith.addf %709, %738 : vector<8x384xf32>
    %c10_504 = arith.constant 10 : index
    %c0_505 = arith.constant 0 : index
    %c0_506 = arith.constant 0 : index
    %740 = vector.load %arg8[%c10_504, %c0_505, %c0_506] : memref<25x8x384xf32, #tpu.memory_space<vmem>>, vector<1x8x384xf32>
    %741 = vector.shape_cast %740 : vector<1x8x384xf32> to vector<8x384xf32>
    %742 = arith.mulf %735, %741 : vector<8x384xf32>
    %743 = arith.addf %713, %742 : vector<8x384xf32>
    %c15_507 = arith.constant 15 : index
    %c0_508 = arith.constant 0 : index
    %c0_509 = arith.constant 0 : index
    %744 = vector.load %arg8[%c15_507, %c0_508, %c0_509] : memref<25x8x384xf32, #tpu.memory_space<vmem>>, vector<1x8x384xf32>
    %745 = vector.shape_cast %744 : vector<1x8x384xf32> to vector<8x384xf32>
    %746 = arith.mulf %735, %745 : vector<8x384xf32>
    %747 = arith.addf %717, %746 : vector<8x384xf32>
    %c20_510 = arith.constant 20 : index
    %c0_511 = arith.constant 0 : index
    %c0_512 = arith.constant 0 : index
    %748 = vector.load %arg8[%c20_510, %c0_511, %c0_512] : memref<25x8x384xf32, #tpu.memory_space<vmem>>, vector<1x8x384xf32>
    %749 = vector.shape_cast %748 : vector<1x8x384xf32> to vector<8x384xf32>
    %750 = arith.mulf %735, %749 : vector<8x384xf32>
    %751 = arith.addf %721, %750 : vector<8x384xf32>
    %c1_i32_513 = arith.constant 1 : i32
    %752 = tpu.dynamic_rotate %734 by %c1_i32_513 dim 0 : vector<8x384xf32>, i32 -> vector<8x384xf32>
    %c6_514 = arith.constant 6 : index
    %c0_515 = arith.constant 0 : index
    %c0_516 = arith.constant 0 : index
    %753 = vector.load %arg8[%c6_514, %c0_515, %c0_516] : memref<25x8x384xf32, #tpu.memory_space<vmem>>, vector<1x8x384xf32>
    %754 = vector.shape_cast %753 : vector<1x8x384xf32> to vector<8x384xf32>
    %755 = arith.mulf %752, %754 : vector<8x384xf32>
    %756 = arith.addf %739, %755 : vector<8x384xf32>
    %c11_517 = arith.constant 11 : index
    %c0_518 = arith.constant 0 : index
    %c0_519 = arith.constant 0 : index
    %757 = vector.load %arg8[%c11_517, %c0_518, %c0_519] : memref<25x8x384xf32, #tpu.memory_space<vmem>>, vector<1x8x384xf32>
    %758 = vector.shape_cast %757 : vector<1x8x384xf32> to vector<8x384xf32>
    %759 = arith.mulf %752, %758 : vector<8x384xf32>
    %760 = arith.addf %743, %759 : vector<8x384xf32>
    %c16_520 = arith.constant 16 : index
    %c0_521 = arith.constant 0 : index
    %c0_522 = arith.constant 0 : index
    %761 = vector.load %arg8[%c16_520, %c0_521, %c0_522] : memref<25x8x384xf32, #tpu.memory_space<vmem>>, vector<1x8x384xf32>
    %762 = vector.shape_cast %761 : vector<1x8x384xf32> to vector<8x384xf32>
    %763 = arith.mulf %752, %762 : vector<8x384xf32>
    %764 = arith.addf %747, %763 : vector<8x384xf32>
    %c21_523 = arith.constant 21 : index
    %c0_524 = arith.constant 0 : index
    %c0_525 = arith.constant 0 : index
    %765 = vector.load %arg8[%c21_523, %c0_524, %c0_525] : memref<25x8x384xf32, #tpu.memory_space<vmem>>, vector<1x8x384xf32>
    %766 = vector.shape_cast %765 : vector<1x8x384xf32> to vector<8x384xf32>
    %767 = arith.mulf %752, %766 : vector<8x384xf32>
    %768 = arith.addf %751, %767 : vector<8x384xf32>
    %c7_526 = arith.constant 7 : index
    %c0_527 = arith.constant 0 : index
    %c0_528 = arith.constant 0 : index
    %769 = vector.load %arg8[%c7_526, %c0_527, %c0_528] : memref<25x8x384xf32, #tpu.memory_space<vmem>>, vector<1x8x384xf32>
    %770 = vector.shape_cast %769 : vector<1x8x384xf32> to vector<8x384xf32>
    %771 = arith.mulf %734, %770 : vector<8x384xf32>
    %772 = arith.addf %756, %771 : vector<8x384xf32>
    %c12_529 = arith.constant 12 : index
    %c0_530 = arith.constant 0 : index
    %c0_531 = arith.constant 0 : index
    %773 = vector.load %arg8[%c12_529, %c0_530, %c0_531] : memref<25x8x384xf32, #tpu.memory_space<vmem>>, vector<1x8x384xf32>
    %774 = vector.shape_cast %773 : vector<1x8x384xf32> to vector<8x384xf32>
    %775 = arith.mulf %734, %774 : vector<8x384xf32>
    %776 = arith.addf %760, %775 : vector<8x384xf32>
    %c17_532 = arith.constant 17 : index
    %c0_533 = arith.constant 0 : index
    %c0_534 = arith.constant 0 : index
    %777 = vector.load %arg8[%c17_532, %c0_533, %c0_534] : memref<25x8x384xf32, #tpu.memory_space<vmem>>, vector<1x8x384xf32>
    %778 = vector.shape_cast %777 : vector<1x8x384xf32> to vector<8x384xf32>
    %779 = arith.mulf %734, %778 : vector<8x384xf32>
    %780 = arith.addf %764, %779 : vector<8x384xf32>
    %c22_535 = arith.constant 22 : index
    %c0_536 = arith.constant 0 : index
    %c0_537 = arith.constant 0 : index
    %781 = vector.load %arg8[%c22_535, %c0_536, %c0_537] : memref<25x8x384xf32, #tpu.memory_space<vmem>>, vector<1x8x384xf32>
    %782 = vector.shape_cast %781 : vector<1x8x384xf32> to vector<8x384xf32>
    %783 = arith.mulf %734, %782 : vector<8x384xf32>
    %784 = arith.addf %768, %783 : vector<8x384xf32>
    %c7_i32_538 = arith.constant 7 : i32
    %785 = tpu.dynamic_rotate %734 by %c7_i32_538 dim 0 : vector<8x384xf32>, i32 -> vector<8x384xf32>
    %c8_539 = arith.constant 8 : index
    %c0_540 = arith.constant 0 : index
    %c0_541 = arith.constant 0 : index
    %786 = vector.load %arg8[%c8_539, %c0_540, %c0_541] : memref<25x8x384xf32, #tpu.memory_space<vmem>>, vector<1x8x384xf32>
    %787 = vector.shape_cast %786 : vector<1x8x384xf32> to vector<8x384xf32>
    %788 = arith.mulf %785, %787 : vector<8x384xf32>
    %789 = arith.addf %772, %788 : vector<8x384xf32>
    %c13_542 = arith.constant 13 : index
    %c0_543 = arith.constant 0 : index
    %c0_544 = arith.constant 0 : index
    %790 = vector.load %arg8[%c13_542, %c0_543, %c0_544] : memref<25x8x384xf32, #tpu.memory_space<vmem>>, vector<1x8x384xf32>
    %791 = vector.shape_cast %790 : vector<1x8x384xf32> to vector<8x384xf32>
    %792 = arith.mulf %785, %791 : vector<8x384xf32>
    %793 = arith.addf %776, %792 : vector<8x384xf32>
    %c18_545 = arith.constant 18 : index
    %c0_546 = arith.constant 0 : index
    %c0_547 = arith.constant 0 : index
    %794 = vector.load %arg8[%c18_545, %c0_546, %c0_547] : memref<25x8x384xf32, #tpu.memory_space<vmem>>, vector<1x8x384xf32>
    %795 = vector.shape_cast %794 : vector<1x8x384xf32> to vector<8x384xf32>
    %796 = arith.mulf %785, %795 : vector<8x384xf32>
    %797 = arith.addf %780, %796 : vector<8x384xf32>
    %c23_548 = arith.constant 23 : index
    %c0_549 = arith.constant 0 : index
    %c0_550 = arith.constant 0 : index
    %798 = vector.load %arg8[%c23_548, %c0_549, %c0_550] : memref<25x8x384xf32, #tpu.memory_space<vmem>>, vector<1x8x384xf32>
    %799 = vector.shape_cast %798 : vector<1x8x384xf32> to vector<8x384xf32>
    %800 = arith.mulf %785, %799 : vector<8x384xf32>
    %801 = arith.addf %784, %800 : vector<8x384xf32>
    %c6_i32_551 = arith.constant 6 : i32
    %802 = tpu.dynamic_rotate %734 by %c6_i32_551 dim 0 : vector<8x384xf32>, i32 -> vector<8x384xf32>
    %c9_552 = arith.constant 9 : index
    %c0_553 = arith.constant 0 : index
    %c0_554 = arith.constant 0 : index
    %803 = vector.load %arg8[%c9_552, %c0_553, %c0_554] : memref<25x8x384xf32, #tpu.memory_space<vmem>>, vector<1x8x384xf32>
    %804 = vector.shape_cast %803 : vector<1x8x384xf32> to vector<8x384xf32>
    %805 = arith.mulf %802, %804 : vector<8x384xf32>
    %806 = arith.addf %789, %805 : vector<8x384xf32>
    %c14_555 = arith.constant 14 : index
    %c0_556 = arith.constant 0 : index
    %c0_557 = arith.constant 0 : index
    %807 = vector.load %arg8[%c14_555, %c0_556, %c0_557] : memref<25x8x384xf32, #tpu.memory_space<vmem>>, vector<1x8x384xf32>
    %808 = vector.shape_cast %807 : vector<1x8x384xf32> to vector<8x384xf32>
    %809 = arith.mulf %802, %808 : vector<8x384xf32>
    %810 = arith.addf %793, %809 : vector<8x384xf32>
    %c19_558 = arith.constant 19 : index
    %c0_559 = arith.constant 0 : index
    %c0_560 = arith.constant 0 : index
    %811 = vector.load %arg8[%c19_558, %c0_559, %c0_560] : memref<25x8x384xf32, #tpu.memory_space<vmem>>, vector<1x8x384xf32>
    %812 = vector.shape_cast %811 : vector<1x8x384xf32> to vector<8x384xf32>
    %813 = arith.mulf %802, %812 : vector<8x384xf32>
    %814 = arith.addf %797, %813 : vector<8x384xf32>
    %c24_561 = arith.constant 24 : index
    %c0_562 = arith.constant 0 : index
    %c0_563 = arith.constant 0 : index
    %815 = vector.load %arg8[%c24_561, %c0_562, %c0_563] : memref<25x8x384xf32, #tpu.memory_space<vmem>>, vector<1x8x384xf32>
    %816 = vector.shape_cast %815 : vector<1x8x384xf32> to vector<8x384xf32>
    %817 = arith.mulf %802, %816 : vector<8x384xf32>
    %818 = arith.addf %801, %817 : vector<8x384xf32>
    %c3_564 = arith.constant 3 : index
    %c0_565 = arith.constant 0 : index
    %c0_566 = arith.constant 0 : index
    %819 = vector.load %arg7[%c3_564, %c0_565, %c0_566] : memref<7x8x384xf32, #tpu.memory_space<vmem>>, vector<1x8x384xf32>
    %820 = vector.shape_cast %819 : vector<1x8x384xf32> to vector<8x384xf32>
    %821 = vector.shape_cast %818 : vector<8x384xf32> to vector<1x8x384xf32>
    tpu.vector_store %arg7[%c3_564, %c0_565, %c0_566], %821 {strides = array<i32>} : memref<7x8x384xf32, #tpu.memory_space<vmem>>, vector<1x8x384xf32>,
    %c6_567 = arith.constant 6 : index
    %c0_568 = arith.constant 0 : index
    %c0_569 = arith.constant 0 : index
    %822 = vector.load %arg1[%c6_567, %c0_568, %c0_569] : memref<7x8x384xf32, #tpu.memory_space<vmem>>, vector<1x8x384xf32>
    %823 = vector.shape_cast %822 : vector<1x8x384xf32> to vector<8x384xf32>
    %824 = arith.mulf %823, %23 : vector<8x384xf32>
    %825 = arith.addf %824, %25 : vector<8x384xf32>
    %cst_570 = arith.constant 0.000000e+00 : f32
    %826 = vector.broadcast %cst_570 : f32 to vector<8x384xf32>
    %827 = arith.maximumf %825, %826 : vector<8x384xf32>
    %c2_i32_571 = arith.constant 2 : i32
    %828 = tpu.dynamic_rotate %827 by %c2_i32_571 dim 0 : vector<8x384xf32>, i32 -> vector<8x384xf32>
    %c10_572 = arith.constant 10 : index
    %c0_573 = arith.constant 0 : index
    %c0_574 = arith.constant 0 : index
    %829 = vector.load %arg8[%c10_572, %c0_573, %c0_574] : memref<25x8x384xf32, #tpu.memory_space<vmem>>, vector<1x8x384xf32>
    %830 = vector.shape_cast %829 : vector<1x8x384xf32> to vector<8x384xf32>
    %831 = arith.mulf %828, %830 : vector<8x384xf32>
    %832 = arith.addf %806, %831 : vector<8x384xf32>
    %c15_575 = arith.constant 15 : index
    %c0_576 = arith.constant 0 : index
    %c0_577 = arith.constant 0 : index
    %833 = vector.load %arg8[%c15_575, %c0_576, %c0_577] : memref<25x8x384xf32, #tpu.memory_space<vmem>>, vector<1x8x384xf32>
    %834 = vector.shape_cast %833 : vector<1x8x384xf32> to vector<8x384xf32>
    %835 = arith.mulf %828, %834 : vector<8x384xf32>
    %836 = arith.addf %810, %835 : vector<8x384xf32>
    %c20_578 = arith.constant 20 : index
    %c0_579 = arith.constant 0 : index
    %c0_580 = arith.constant 0 : index
    %837 = vector.load %arg8[%c20_578, %c0_579, %c0_580] : memref<25x8x384xf32, #tpu.memory_space<vmem>>, vector<1x8x384xf32>
    %838 = vector.shape_cast %837 : vector<1x8x384xf32> to vector<8x384xf32>
    %839 = arith.mulf %828, %838 : vector<8x384xf32>
    %840 = arith.addf %814, %839 : vector<8x384xf32>
    %c1_i32_581 = arith.constant 1 : i32
    %841 = tpu.dynamic_rotate %827 by %c1_i32_581 dim 0 : vector<8x384xf32>, i32 -> vector<8x384xf32>
    %c11_582 = arith.constant 11 : index
    %c0_583 = arith.constant 0 : index
    %c0_584 = arith.constant 0 : index
    %842 = vector.load %arg8[%c11_582, %c0_583, %c0_584] : memref<25x8x384xf32, #tpu.memory_space<vmem>>, vector<1x8x384xf32>
    %843 = vector.shape_cast %842 : vector<1x8x384xf32> to vector<8x384xf32>
    %844 = arith.mulf %841, %843 : vector<8x384xf32>
    %845 = arith.addf %832, %844 : vector<8x384xf32>
    %c16_585 = arith.constant 16 : index
    %c0_586 = arith.constant 0 : index
    %c0_587 = arith.constant 0 : index
    %846 = vector.load %arg8[%c16_585, %c0_586, %c0_587] : memref<25x8x384xf32, #tpu.memory_space<vmem>>, vector<1x8x384xf32>
    %847 = vector.shape_cast %846 : vector<1x8x384xf32> to vector<8x384xf32>
    %848 = arith.mulf %841, %847 : vector<8x384xf32>
    %849 = arith.addf %836, %848 : vector<8x384xf32>
    %c21_588 = arith.constant 21 : index
    %c0_589 = arith.constant 0 : index
    %c0_590 = arith.constant 0 : index
    %850 = vector.load %arg8[%c21_588, %c0_589, %c0_590] : memref<25x8x384xf32, #tpu.memory_space<vmem>>, vector<1x8x384xf32>
    %851 = vector.shape_cast %850 : vector<1x8x384xf32> to vector<8x384xf32>
    %852 = arith.mulf %841, %851 : vector<8x384xf32>
    %853 = arith.addf %840, %852 : vector<8x384xf32>
    %c12_591 = arith.constant 12 : index
    %c0_592 = arith.constant 0 : index
    %c0_593 = arith.constant 0 : index
    %854 = vector.load %arg8[%c12_591, %c0_592, %c0_593] : memref<25x8x384xf32, #tpu.memory_space<vmem>>, vector<1x8x384xf32>
    %855 = vector.shape_cast %854 : vector<1x8x384xf32> to vector<8x384xf32>
    %856 = arith.mulf %827, %855 : vector<8x384xf32>
    %857 = arith.addf %845, %856 : vector<8x384xf32>
    %c17_594 = arith.constant 17 : index
    %c0_595 = arith.constant 0 : index
    %c0_596 = arith.constant 0 : index
    %858 = vector.load %arg8[%c17_594, %c0_595, %c0_596] : memref<25x8x384xf32, #tpu.memory_space<vmem>>, vector<1x8x384xf32>
    %859 = vector.shape_cast %858 : vector<1x8x384xf32> to vector<8x384xf32>
    %860 = arith.mulf %827, %859 : vector<8x384xf32>
    %861 = arith.addf %849, %860 : vector<8x384xf32>
    %c22_597 = arith.constant 22 : index
    %c0_598 = arith.constant 0 : index
    %c0_599 = arith.constant 0 : index
    %862 = vector.load %arg8[%c22_597, %c0_598, %c0_599] : memref<25x8x384xf32, #tpu.memory_space<vmem>>, vector<1x8x384xf32>
    %863 = vector.shape_cast %862 : vector<1x8x384xf32> to vector<8x384xf32>
    %864 = arith.mulf %827, %863 : vector<8x384xf32>
    %865 = arith.addf %853, %864 : vector<8x384xf32>
    %c7_i32_600 = arith.constant 7 : i32
    %866 = tpu.dynamic_rotate %827 by %c7_i32_600 dim 0 : vector<8x384xf32>, i32 -> vector<8x384xf32>
    %c13_601 = arith.constant 13 : index
    %c0_602 = arith.constant 0 : index
    %c0_603 = arith.constant 0 : index
    %867 = vector.load %arg8[%c13_601, %c0_602, %c0_603] : memref<25x8x384xf32, #tpu.memory_space<vmem>>, vector<1x8x384xf32>
    %868 = vector.shape_cast %867 : vector<1x8x384xf32> to vector<8x384xf32>
    %869 = arith.mulf %866, %868 : vector<8x384xf32>
    %870 = arith.addf %857, %869 : vector<8x384xf32>
    %c18_604 = arith.constant 18 : index
    %c0_605 = arith.constant 0 : index
    %c0_606 = arith.constant 0 : index
    %871 = vector.load %arg8[%c18_604, %c0_605, %c0_606] : memref<25x8x384xf32, #tpu.memory_space<vmem>>, vector<1x8x384xf32>
    %872 = vector.shape_cast %871 : vector<1x8x384xf32> to vector<8x384xf32>
    %873 = arith.mulf %866, %872 : vector<8x384xf32>
    %874 = arith.addf %861, %873 : vector<8x384xf32>
    %c23_607 = arith.constant 23 : index
    %c0_608 = arith.constant 0 : index
    %c0_609 = arith.constant 0 : index
    %875 = vector.load %arg8[%c23_607, %c0_608, %c0_609] : memref<25x8x384xf32, #tpu.memory_space<vmem>>, vector<1x8x384xf32>
    %876 = vector.shape_cast %875 : vector<1x8x384xf32> to vector<8x384xf32>
    %877 = arith.mulf %866, %876 : vector<8x384xf32>
    %878 = arith.addf %865, %877 : vector<8x384xf32>
    %c6_i32_610 = arith.constant 6 : i32
    %879 = tpu.dynamic_rotate %827 by %c6_i32_610 dim 0 : vector<8x384xf32>, i32 -> vector<8x384xf32>
    %c14_611 = arith.constant 14 : index
    %c0_612 = arith.constant 0 : index
    %c0_613 = arith.constant 0 : index
    %880 = vector.load %arg8[%c14_611, %c0_612, %c0_613] : memref<25x8x384xf32, #tpu.memory_space<vmem>>, vector<1x8x384xf32>
    %881 = vector.shape_cast %880 : vector<1x8x384xf32> to vector<8x384xf32>
    %882 = arith.mulf %879, %881 : vector<8x384xf32>
    %883 = arith.addf %870, %882 : vector<8x384xf32>
    %c19_614 = arith.constant 19 : index
    %c0_615 = arith.constant 0 : index
    %c0_616 = arith.constant 0 : index
    %884 = vector.load %arg8[%c19_614, %c0_615, %c0_616] : memref<25x8x384xf32, #tpu.memory_space<vmem>>, vector<1x8x384xf32>
    %885 = vector.shape_cast %884 : vector<1x8x384xf32> to vector<8x384xf32>
    %886 = arith.mulf %879, %885 : vector<8x384xf32>
    %887 = arith.addf %874, %886 : vector<8x384xf32>
    %c24_617 = arith.constant 24 : index
    %c0_618 = arith.constant 0 : index
    %c0_619 = arith.constant 0 : index
    %888 = vector.load %arg8[%c24_617, %c0_618, %c0_619] : memref<25x8x384xf32, #tpu.memory_space<vmem>>, vector<1x8x384xf32>
    %889 = vector.shape_cast %888 : vector<1x8x384xf32> to vector<8x384xf32>
    %890 = arith.mulf %879, %889 : vector<8x384xf32>
    %891 = arith.addf %878, %890 : vector<8x384xf32>
    %c4_620 = arith.constant 4 : index
    %c0_621 = arith.constant 0 : index
    %c0_622 = arith.constant 0 : index
    %892 = vector.load %arg7[%c4_620, %c0_621, %c0_622] : memref<7x8x384xf32, #tpu.memory_space<vmem>>, vector<1x8x384xf32>
    %893 = vector.shape_cast %892 : vector<1x8x384xf32> to vector<8x384xf32>
    %894 = vector.shape_cast %891 : vector<8x384xf32> to vector<1x8x384xf32>
    tpu.vector_store %arg7[%c4_620, %c0_621, %c0_622], %894 {strides = array<i32>} : memref<7x8x384xf32, #tpu.memory_space<vmem>>, vector<1x8x384xf32>,
    %c5_623 = arith.constant 5 : index
    %c0_624 = arith.constant 0 : index
    %c0_625 = arith.constant 0 : index
    %895 = vector.load %arg7[%c5_623, %c0_624, %c0_625] : memref<7x8x384xf32, #tpu.memory_space<vmem>>, vector<1x8x384xf32>
    %896 = vector.shape_cast %895 : vector<1x8x384xf32> to vector<8x384xf32>
    %897 = vector.shape_cast %887 : vector<8x384xf32> to vector<1x8x384xf32>
    tpu.vector_store %arg7[%c5_623, %c0_624, %c0_625], %897 {strides = array<i32>} : memref<7x8x384xf32, #tpu.memory_space<vmem>>, vector<1x8x384xf32>,
    %c6_626 = arith.constant 6 : index
    %c0_627 = arith.constant 0 : index
    %c0_628 = arith.constant 0 : index
    %898 = vector.load %arg7[%c6_626, %c0_627, %c0_628] : memref<7x8x384xf32, #tpu.memory_space<vmem>>, vector<1x8x384xf32>
    %899 = vector.shape_cast %898 : vector<1x8x384xf32> to vector<8x384xf32>
    %900 = vector.shape_cast %883 : vector<8x384xf32> to vector<1x8x384xf32>
    tpu.vector_store %arg7[%c6_626, %c0_627, %c0_628], %900 {strides = array<i32>} : memref<7x8x384xf32, #tpu.memory_space<vmem>>, vector<1x8x384xf32>,
    %c0_629 = arith.constant 0 : index
    %c0_630 = arith.constant 0 : index
    %c0_631 = arith.constant 0 : index
    %901 = vector.load %arg7[%c0_629, %c0_630, %c0_631] : memref<7x8x384xf32, #tpu.memory_space<vmem>>, vector<7x8x384xf32>
    %902 = vector.shape_cast %901 : vector<7x8x384xf32> to vector<56x384xf32>
    %cst_632 = arith.constant dense<0.000000e+00> : vector<1x384xf32>
    %903 = tpu.matmul %0, %902, %cst_632 {dimension_numbers = #tpu.dot_dimension_numbers<[1], [0], [0], [1], [0, 0, 1, 1], [], []>} : vector<1x56xf32>, vector<56x384xf32>, vector<1x384xf32> -> vector<1x384xf32>
    %904 = arith.mulf %902, %902 : vector<56x384xf32>
    %cst_633 = arith.constant dense<0.000000e+00> : vector<1x384xf32>
    %905 = tpu.matmul %0, %904, %cst_633 {dimension_numbers = #tpu.dot_dimension_numbers<[1], [0], [0], [1], [0, 0, 1, 1], [], []>} : vector<1x56xf32>, vector<56x384xf32>, vector<1x384xf32> -> vector<1x384xf32>
    %cst_634 = arith.constant 0.0204081628 : f32
    %906 = vector.broadcast %cst_634 : f32 to vector<1x384xf32>
    %907 = arith.mulf %903, %906 : vector<1x384xf32>
    %cst_635 = arith.constant 0.0204081628 : f32
    %908 = vector.broadcast %cst_635 : f32 to vector<1x384xf32>
    %909 = arith.mulf %905, %908 : vector<1x384xf32>
    %910 = arith.mulf %907, %907 : vector<1x384xf32>
    %911 = arith.subf %909, %910 : vector<1x384xf32>
    %cst_636 = arith.constant 0.000000e+00 : f32
    %912 = vector.broadcast %cst_636 : f32 to vector<1x384xf32>
    %913 = arith.maximumf %911, %912 : vector<1x384xf32>
    %cst_637 = arith.constant 1.000000e-03 : f32
    %914 = vector.broadcast %cst_637 : f32 to vector<1x384xf32>
    %915 = arith.addf %913, %914 : vector<1x384xf32>
    %916 = math.rsqrt %915 : vector<1x384xf32>
    %c0_638 = arith.constant 0 : index
    %c0_639 = arith.constant 0 : index
    %917 = vector.load %arg5[%c0_638, %c0_639] : memref<1x384xf32, #tpu.memory_space<vmem>>, vector<1x384xf32>
    %918 = arith.mulf %916, %917 : vector<1x384xf32>
    %c0_640 = arith.constant 0 : index
    %c0_641 = arith.constant 0 : index
    %919 = vector.load %arg6[%c0_640, %c0_641] : memref<1x384xf32, #tpu.memory_space<vmem>>, vector<1x384xf32>
    %920 = arith.mulf %907, %918 : vector<1x384xf32>
    %921 = arith.subf %919, %920 : vector<1x384xf32>
    %922 = vector.shape_cast %918 : vector<1x384xf32> to vector<1x384xf32>
    %923 = vector.broadcast %922 : vector<1x384xf32> to vector<8x384xf32>
    %924 = vector.shape_cast %921 : vector<1x384xf32> to vector<1x384xf32>
    %925 = vector.broadcast %924 : vector<1x384xf32> to vector<8x384xf32>
    %c0_642 = arith.constant 0 : index
    %c0_643 = arith.constant 0 : index
    %c0_644 = arith.constant 0 : index
    %926 = vector.load %arg7[%c0_642, %c0_643, %c0_644] : memref<7x8x384xf32, #tpu.memory_space<vmem>>, vector<1x8x384xf32>
    %927 = vector.shape_cast %926 : vector<1x8x384xf32> to vector<8x384xf32>
    %928 = arith.mulf %927, %923 : vector<8x384xf32>
    %929 = arith.addf %928, %925 : vector<8x384xf32>
    %c0_645 = arith.constant 0 : index
    %c0_646 = arith.constant 0 : index
    %c0_647 = arith.constant 0 : index
    %930 = vector.load %arg7[%c0_645, %c0_646, %c0_647] : memref<7x8x384xf32, #tpu.memory_space<vmem>>, vector<1x8x384xf32>
    %931 = vector.shape_cast %930 : vector<1x8x384xf32> to vector<8x384xf32>
    %932 = vector.shape_cast %929 : vector<8x384xf32> to vector<1x8x384xf32>
    tpu.vector_store %arg7[%c0_645, %c0_646, %c0_647], %932 {strides = array<i32>} : memref<7x8x384xf32, #tpu.memory_space<vmem>>, vector<1x8x384xf32>,
    %c1_648 = arith.constant 1 : index
    %c0_649 = arith.constant 0 : index
    %c0_650 = arith.constant 0 : index
    %933 = vector.load %arg7[%c1_648, %c0_649, %c0_650] : memref<7x8x384xf32, #tpu.memory_space<vmem>>, vector<1x8x384xf32>
    %934 = vector.shape_cast %933 : vector<1x8x384xf32> to vector<8x384xf32>
    %935 = arith.mulf %934, %923 : vector<8x384xf32>
    %936 = arith.addf %935, %925 : vector<8x384xf32>
    %c1_651 = arith.constant 1 : index
    %c0_652 = arith.constant 0 : index
    %c0_653 = arith.constant 0 : index
    %937 = vector.load %arg7[%c1_651, %c0_652, %c0_653] : memref<7x8x384xf32, #tpu.memory_space<vmem>>, vector<1x8x384xf32>
    %938 = vector.shape_cast %937 : vector<1x8x384xf32> to vector<8x384xf32>
    %939 = vector.shape_cast %936 : vector<8x384xf32> to vector<1x8x384xf32>
    tpu.vector_store %arg7[%c1_651, %c0_652, %c0_653], %939 {strides = array<i32>} : memref<7x8x384xf32, #tpu.memory_space<vmem>>, vector<1x8x384xf32>,
    %c2_654 = arith.constant 2 : index
    %c0_655 = arith.constant 0 : index
    %c0_656 = arith.constant 0 : index
    %940 = vector.load %arg7[%c2_654, %c0_655, %c0_656] : memref<7x8x384xf32, #tpu.memory_space<vmem>>, vector<1x8x384xf32>
    %941 = vector.shape_cast %940 : vector<1x8x384xf32> to vector<8x384xf32>
    %942 = arith.mulf %941, %923 : vector<8x384xf32>
    %943 = arith.addf %942, %925 : vector<8x384xf32>
    %c2_657 = arith.constant 2 : index
    %c0_658 = arith.constant 0 : index
    %c0_659 = arith.constant 0 : index
    %944 = vector.load %arg7[%c2_657, %c0_658, %c0_659] : memref<7x8x384xf32, #tpu.memory_space<vmem>>, vector<1x8x384xf32>
    %945 = vector.shape_cast %944 : vector<1x8x384xf32> to vector<8x384xf32>
    %946 = vector.shape_cast %943 : vector<8x384xf32> to vector<1x8x384xf32>
    tpu.vector_store %arg7[%c2_657, %c0_658, %c0_659], %946 {strides = array<i32>} : memref<7x8x384xf32, #tpu.memory_space<vmem>>, vector<1x8x384xf32>,
    %c3_660 = arith.constant 3 : index
    %c0_661 = arith.constant 0 : index
    %c0_662 = arith.constant 0 : index
    %947 = vector.load %arg7[%c3_660, %c0_661, %c0_662] : memref<7x8x384xf32, #tpu.memory_space<vmem>>, vector<1x8x384xf32>
    %948 = vector.shape_cast %947 : vector<1x8x384xf32> to vector<8x384xf32>
    %949 = arith.mulf %948, %923 : vector<8x384xf32>
    %950 = arith.addf %949, %925 : vector<8x384xf32>
    %c3_663 = arith.constant 3 : index
    %c0_664 = arith.constant 0 : index
    %c0_665 = arith.constant 0 : index
    %951 = vector.load %arg7[%c3_663, %c0_664, %c0_665] : memref<7x8x384xf32, #tpu.memory_space<vmem>>, vector<1x8x384xf32>
    %952 = vector.shape_cast %951 : vector<1x8x384xf32> to vector<8x384xf32>
    %953 = vector.shape_cast %950 : vector<8x384xf32> to vector<1x8x384xf32>
    tpu.vector_store %arg7[%c3_663, %c0_664, %c0_665], %953 {strides = array<i32>} : memref<7x8x384xf32, #tpu.memory_space<vmem>>, vector<1x8x384xf32>,
    %c4_666 = arith.constant 4 : index
    %c0_667 = arith.constant 0 : index
    %c0_668 = arith.constant 0 : index
    %954 = vector.load %arg7[%c4_666, %c0_667, %c0_668] : memref<7x8x384xf32, #tpu.memory_space<vmem>>, vector<1x8x384xf32>
    %955 = vector.shape_cast %954 : vector<1x8x384xf32> to vector<8x384xf32>
    %956 = arith.mulf %955, %923 : vector<8x384xf32>
    %957 = arith.addf %956, %925 : vector<8x384xf32>
    %c4_669 = arith.constant 4 : index
    %c0_670 = arith.constant 0 : index
    %c0_671 = arith.constant 0 : index
    %958 = vector.load %arg7[%c4_669, %c0_670, %c0_671] : memref<7x8x384xf32, #tpu.memory_space<vmem>>, vector<1x8x384xf32>
    %959 = vector.shape_cast %958 : vector<1x8x384xf32> to vector<8x384xf32>
    %960 = vector.shape_cast %957 : vector<8x384xf32> to vector<1x8x384xf32>
    tpu.vector_store %arg7[%c4_669, %c0_670, %c0_671], %960 {strides = array<i32>} : memref<7x8x384xf32, #tpu.memory_space<vmem>>, vector<1x8x384xf32>,
    %c5_672 = arith.constant 5 : index
    %c0_673 = arith.constant 0 : index
    %c0_674 = arith.constant 0 : index
    %961 = vector.load %arg7[%c5_672, %c0_673, %c0_674] : memref<7x8x384xf32, #tpu.memory_space<vmem>>, vector<1x8x384xf32>
    %962 = vector.shape_cast %961 : vector<1x8x384xf32> to vector<8x384xf32>
    %963 = arith.mulf %962, %923 : vector<8x384xf32>
    %964 = arith.addf %963, %925 : vector<8x384xf32>
    %c5_675 = arith.constant 5 : index
    %c0_676 = arith.constant 0 : index
    %c0_677 = arith.constant 0 : index
    %965 = vector.load %arg7[%c5_675, %c0_676, %c0_677] : memref<7x8x384xf32, #tpu.memory_space<vmem>>, vector<1x8x384xf32>
    %966 = vector.shape_cast %965 : vector<1x8x384xf32> to vector<8x384xf32>
    %967 = vector.shape_cast %964 : vector<8x384xf32> to vector<1x8x384xf32>
    tpu.vector_store %arg7[%c5_675, %c0_676, %c0_677], %967 {strides = array<i32>} : memref<7x8x384xf32, #tpu.memory_space<vmem>>, vector<1x8x384xf32>,
    %c6_678 = arith.constant 6 : index
    %c0_679 = arith.constant 0 : index
    %c0_680 = arith.constant 0 : index
    %968 = vector.load %arg7[%c6_678, %c0_679, %c0_680] : memref<7x8x384xf32, #tpu.memory_space<vmem>>, vector<1x8x384xf32>
    %969 = vector.shape_cast %968 : vector<1x8x384xf32> to vector<8x384xf32>
    %970 = arith.mulf %969, %923 : vector<8x384xf32>
    %971 = arith.addf %970, %925 : vector<8x384xf32>
    %c6_681 = arith.constant 6 : index
    %c0_682 = arith.constant 0 : index
    %c0_683 = arith.constant 0 : index
    %972 = vector.load %arg7[%c6_681, %c0_682, %c0_683] : memref<7x8x384xf32, #tpu.memory_space<vmem>>, vector<1x8x384xf32>
    %973 = vector.shape_cast %972 : vector<1x8x384xf32> to vector<8x384xf32>
    %974 = vector.shape_cast %971 : vector<8x384xf32> to vector<1x8x384xf32>
    tpu.vector_store %arg7[%c6_681, %c0_682, %c0_683], %974 {strides = array<i32>} : memref<7x8x384xf32, #tpu.memory_space<vmem>>, vector<1x8x384xf32>,
    return
  }
  func.func @transform_0(%arg0: i32) -> (i32, i32, i32) {
    %c0_i32 = arith.constant 0 : i32
    %c0_i32_0 = arith.constant 0 : i32
    %c0_i32_1 = arith.constant 0 : i32
    return %c0_i32, %c0_i32_0, %arg0 : i32, i32, i32
  }
  func.func @transform_1(%arg0: i32) -> (i32, i32) {
    %c0_i32 = arith.constant 0 : i32
    %c0_i32_0 = arith.constant 0 : i32
    return %c0_i32, %arg0 : i32, i32
  }
  func.func @transform_2(%arg0: i32) -> (i32, i32) {
    %c0_i32 = arith.constant 0 : i32
    %c0_i32_0 = arith.constant 0 : i32
    return %c0_i32, %arg0 : i32, i32
  }
  func.func @transform_3(%arg0: i32) -> (i32, i32) {
    %c0_i32 = arith.constant 0 : i32
    %c0_i32_0 = arith.constant 0 : i32
    return %c0_i32, %arg0 : i32, i32
  }
  func.func @transform_4(%arg0: i32) -> (i32, i32) {
    %c0_i32 = arith.constant 0 : i32
    %c0_i32_0 = arith.constant 0 : i32
    return %c0_i32, %arg0 : i32, i32
  }
  func.func @transform_5(%arg0: i32) -> (i32, i32) {
    %c0_i32 = arith.constant 0 : i32
    %c0_i32_0 = arith.constant 0 : i32
    return %c0_i32, %arg0 : i32, i32
  }
  func.func @transform_6(%arg0: i32) -> (i32, i32, i32) {
    %c0_i32 = arith.constant 0 : i32
    %c0_i32_0 = arith.constant 0 : i32
    %c0_i32_1 = arith.constant 0 : i32
    return %c0_i32, %c0_i32_0, %arg0 : i32, i32, i32
  }
}

</mosaic_0001>

<bundles_post_ra>
// kernel: module_forward.2
= control target key start
LH: loop header
LB: loop body
LE: loop exit
PB: predicated region body
PF: predicated region fallthrough
CT: control target
= control target key end

     0   :  { %s7814_s0 = inlined_call_operand.vmem [shape: f32[1,7,7,1104], index: 0, kind: input, shape index: {}]   ;;  %s7815_s1 = inlined_call_operand.<no memory space> [shape: f32[], index: 1, kind: input, shape index: {}]   ;;  %s7816_s2 = inlined_call_operand.vmem [shape: f32[25,1104], index: 2, kind: input, shape index: {}]   ;;  %s7817_s3 = inlined_call_operand.vmem [shape: f32[1152], index: 3, kind: input, shape index: {}]   ;;  %s7818_s4 = inlined_call_operand.vmem [shape: f32[1152], index: 4, kind: input, shape index: {}]   ;;  %s7819_s5 = inlined_call_operand.vmem [shape: f32[1152], index: 5, kind: input, shape index: {}]   ;;  %s7820_s6 = inlined_call_operand.vmem [shape: f32[1152], index: 6, kind: input, shape index: {}]   ;;  %s7821_s7 = inlined_call_operand.vmem [shape: f32[7,8,1152], index: 7, kind: output, shape index: {}]  }
   0x1   :  { %v5072_v0 = vstv %s7815_s1 }
   0x2   :  { %8127 = vst [vmem:[#allocation20_spill] sm:$0xff] %v5072_v0 }
   0x3   :  { %s5074_s26 = smov 0   ;;  %s5076_s27 = smov 0  }
   0x4   :  { %s5078_s28 = smov 0  }
   0x5 LB: > { %s5087_s1 = sadd.s32 4294967295, %s5022_s28   ;;  %s5089_s29 = sadd.s32 1, %s5022_s28   ;;  %s5014_s26 = sphi %s5074_s26, %s8646_s26   ;;  %s5022_s28 = sphi %s5078_s28, %s8648_s28   ;;  %s5018_s27 = sphi %s5076_s27, %s8647_s27  }
   0x6   : > { %s195_s30 = ssub.s32 %s5022_s28, %s5089_s29  ;;  %s198_s8 = sadd.s32 1, %s5018_s27 }
   0x7   : > { %p196_p0 = scmp.eq.s32.totalorder %s195_s30, 0  ;;  %p208_p1 = scmp.ne.s32.totalorder %s5018_s27, %s5014_s26 }
   0x8   : > { %p209_p2 = scmp.eq.s32.totalorder %s5087_s1, 2  ;;  %p4524_p3 = scmp.ge.s32.totalorder %s5022_s28, 1 }
   0x9   : > { %v8128_v0 = vld [vmem:[#allocation20_spill] sm:$0xff]  ;;  %s5097_s9 = scalar_select %p196_p0, %s5018_s27, %s198_s8  }
   0xa   : > { %p5099_p4 = por %p209_p2, %p208_p1  ;;  %p327_p5 = scmp.lt.s32.totalorder %s5022_s28, 4 }
   0xc   : > { %p328_p6 = pnand %p4524_p3, %p327_p5 }
   0xe   : > { %331 = sbr.rel (%p328_p6) target bundleno = 891 (0x37b), region = 44 }
  0x15   : > { %s401_s11 = smul.u32 3, %s5087_s1  ;;  %v479_v1 = vlaneseq  ;;  %v7824_v2 = vmov 0.0|0.0   ;;  %v7830_v3 = vmov 0.0   ;;  %vm5026_vm0 = vmmov 0  }
  0x16   : > { %s5105_s12 = smul.u32 384, %s5087_s1  ;;  %4879 = vmatprep.subr.bf16.mxu1 %v7824_v2  ;;  %1432 = vmatprep.mubr.f32.mxu0 %v7830_v3  ;;  %vm1364_vm7 = vcmask 457728  }
  0x17   : > { %p406_p7 = scmp.lt.s32.totalorder %s401_s11, 8  ;;  %v5109_v4 = vshrl.u32 %v479_v1, 7  ;;  %v5111_v5 = vand.u32 127, %v479_v1  ;;  %s512_s13 = sadd.s32 2, %s401_s11  ;;  %4813 = vmatprep.mubr.msk.f32.mxu1 %vm5026_vm0, %v7830_v3 }
  0x18   : > { %s4691_s14 = sadd.s32 128, %s5105_s12  ;;  %v487_v6 = vstv %s5105_s12  ;;  %s5117_s15 = ssub.s32 8, %s512_s13 }
  0x19   : > { %s8650_s11 = smov (!%p406_p7, %s401_s11), 8  ;;  %v504_v7 = vstv %s4691_s14  ;;  %s933_s16 = sshrl.u32 %s4691_s14, 10  ;;  %vm482_vm1 = vcmp.lt.s32.totalorder %v5109_v4, 7  ;;  %v5124_v9 = vadd.s32 %v487_v6, %v5111_v5  ;;  %v5138_v10 = vadd.s32 24, %v5109_v4 }
  0x1a   : > { %v5120_v8 = vadd.s32 %v504_v7, %v5111_v5  ;;  %s936_s17 = sand.u32 1023, %s4691_s14   ;;  %s4525_s18 = sshll.u32 %s8650_s11, 3  ;;  %v520_v30 = vstv %s5117_s15  ;;  %vm1774_vm8 = vcmp.ge.s32.totalorder %v5109_v4, 2  ;;  %vm1902_vm9 = vcmp.ge.s32.totalorder %v5109_v4, 1 }
  0x1b   : > { %p4571_p8 = scmp.gt.s32.totalorder %s933_s16, 1  ;;  %s5129_s21 = scalar_lea.vmem %s7814_s0, %s4525_s18  ;;  %vm489_vm3 = vcmp.lt.s32.totalorder %v5124_v9, 1104  ;;  %vm1196_vm4 = vcmp.lt.s32.totalorder %v5138_v10, 25  ;;  %vm5237_vm5 = vcmp.lt.s32.totalorder %v520_v30, 0  ;;  %vm2160_vm10 = vcmp.lt.s32.totalorder %v5109_v4, 6  ;;  %vm5746_vm12 = vmand %vm1774_vm8, %vm482_vm1 }
  0x1c   : > { %s5134_s24 = scalar_lea.vmem %s7816_s2, %s4525_s18  ;;  %vm506_vm2 = vcmp.lt.s32.totalorder %v5120_v8, 1104  ;;  %v4528_v11 = vld [vmem:[%s5129_s21 + $0x8] sm:$0x7f]  ;;  %v4534_v12 = vld [vmem:[%s5129_s21 + $0x50] sm:$0x7f]  ;;  %s5149_s25 = sshrl.u32 %s936_s17, 7  ;;  %vm5763_vm13 = vmand %vm1902_vm9, %vm482_vm1 }
  0x1d   : > { %s8652_s16 = smov (%p4571_p8, %s933_s16), 1  ;;  %v4583_v13 = vld [vmem:[%s5134_s24 + $0x8] sm:$0xff]  ;;  %v499_v14 = vsel %vm482_vm1, %v4528_v11, %v8128_v0  ;;  %v562_v15 = vsel %vm482_vm1, %v4534_v12, %v8128_v0  ;;  %v4589_v17 = vld [vmem:[%s5134_s24 + $0x50] sm:$0xff]  ;;  %v4595_v18 = vld [vmem:[%s5134_s24 + $0x98] sm:$0xff]  ;;  %p514_p9 = scmp.lt.s32.totalorder %s5117_s15, 0  ;;  %vm2289_vm11 = vcmp.lt.s32.totalorder %v5109_v4, 5 }
  0x1e   : > { %v1036_v16 = vsel %vm506_vm2, %v4583_v13, %v8128_v0  ;;  %v478_v19 = vld [vmem:[%s5129_s21] sm:$0x7f]  ;;  %v5161_v20 = vsel %vm506_vm2, %v499_v14, %v8128_v0  ;;  %v5166_v21 = vsel %vm506_vm2, %v562_v15, %v8128_v0  ;;  %s5168_s28 = sshll.u32 %s8652_s16, 3  ;;  %v1098_v22 = vsel %vm506_vm2, %v4589_v17, %v8128_v0  ;;  %v4532_v24 = vld [vmem:[%s5129_s21 + $0x48] sm:$0x7f]  ;;  %v4593_v29 = vld [vmem:[%s5134_s24 + $0x90] sm:$0xff] }
  0x1f   : > { %1039 = vst [vmem:[#allocation17 + $0x8] sm:$0xff] %v1036_v16  ;;  %v1160_v23 = vsel %vm506_vm2, %v4595_v18, %v8128_v0  ;;  %v1007_v25 = vld [vmem:[%s5134_s24] sm:$0xff]  ;;  %v4587_v26 = vld [vmem:[%s5134_s24 + $0x48] sm:$0xff]  ;;  %s940_s11 = scalar_lea.vmem %s7820_s6, %s5168_s28  ;;  %s985_s16 = scalar_lea.vmem %s7819_s5, %s5168_s28  ;;  %1101 = vst [vmem:[#allocation17 + $0x20] sm:$0xff] %v1098_v22  ;;  %v4867_v27 = vpack.c.bf16 %v5166_v21, %v5161_v20  ;;  %v483_v28 = vsel %vm482_vm1, %v478_v19, %v8128_v0 }
  0x20   : > { %1163 = vst [vmem:[#allocation17 + $0x38] sm:$0xff] %v1160_v23  ;;  %v4599_v31 = vld [vmem:[%s5134_s24 + $0xd8] sm:$0xff]  ;;  %v4601_v32 = vld [vmem:[%s5134_s24 + $0xe0] sm:$0xff]  ;;  %s942_s17 = scalar_lea.vmem %s940_s11, %s5149_s25  ;;  %s987_s18 = scalar_lea.vmem %s985_s16, %s5149_s25  ;;  %v5202_v33 = vsel %vm489_vm3, %v483_v28, %v8128_v0  ;;  %v545_v34 = vsel %vm482_vm1, %v4532_v24, %v8128_v0  ;;  %v1019_v35 = vsel %vm489_vm3, %v1007_v25, %v8128_v0  ;;  %v1080_v36 = vsel %vm489_vm3, %v4587_v26, %v8128_v0  ;;  %v4538_v39 = vld [vmem:[%s5129_s21 + $0x90] sm:$0x7f] }
  0x21   : > { %v4540_v37 = vld [vmem:[%s5129_s21 + $0x98] sm:$0x7f]  ;;  %v4546_v38 = vld [vmem:[%s5129_s21 + $0xe0] sm:$0x7f]  ;;  %s1276_s22 = scalar_lea.vmem %s7818_s4, %s5168_s28  ;;  %s1321_s8 = scalar_lea.vmem %s7817_s3, %s5168_s28  ;;  %4868 = vmatprep.subr.bf16.mxu0 %v4867_v27  ;;  %v5227_v42 = vsel %vm489_vm3, %v545_v34, %v8128_v0  ;;  %1021 = vst [vmem:[#allocation17] sm:$0xff] %v1019_v35  ;;  %1083 = vst [vmem:[#allocation17 + $0x18] sm:$0xff] %v1080_v36  ;;  %v1142_v43 = vsel %vm489_vm3, %v4593_v29, %v8128_v0  ;;  %v1197_v46 = vsel %vm1196_vm4, %v4599_v31, %v8128_v0 }
  0x22   : > { %v943_v40 = vld [vmem:[%s942_s17] ss:$0 sm:$0xff]  ;;  %s1278_s11 = scalar_lea.vmem %s1276_s22, %s5149_s25  ;;  %s1323_s28 = scalar_lea.vmem %s1321_s8, %s5149_s25  ;;  %1145 = vst [vmem:[#allocation17 + $0x30] sm:$0xff] %v1142_v43  ;;  %v4869_v44 = vpack.c.bf16 %v5227_v42, %v5202_v33  ;;  %v1214_v47 = vsel %vm1196_vm4, %v4601_v32, %v8128_v0  ;;  %v4544_v48 = vld [vmem:[%s5129_s21 + $0xd8] sm:$0x7f]  ;;  %v1204_v51 = vsel %vm489_vm3, %v1197_v46, %v8128_v0  ;;  %v625_v53 = vsel %vm482_vm1, %v4540_v37, %v8128_v0 }
  0x23   : > { %v988_v41 = vld [vmem:[%s987_s18] ss:$0 sm:$0xff]  ;;  %946 = vst [vmem:[#allocation15 + $0x1] sm:$0x1] %v943_v40  ;;  %s5250_s25 = scalar_select %p514_p9, 0, 255  ;;  %v1222_v52 = vsel %vm506_vm2, %v1214_v47, %v8128_v0  ;;  %v688_v54 = vsel %vm482_vm1, %v4546_v38, %v8128_v0  ;;  %v5270_v55 = vsel %vm506_vm2, %v625_v53, %v8128_v0  ;;  %v608_v57 = vsel %vm482_vm1, %v4538_v39, %v8128_v0 }
  0x24   : > { %991 = vst [vmem:[#allocation16 + $0x1] sm:$0x1] %v988_v41  ;;  %v1279_v49 = vld [vmem:[%s1278_s11] ss:$0 sm:$0xff]  ;;  %4870 = vmatpush1.bf16.msra.mxu0 %v4869_v44  ;;  %s5265_s15 = sadd.s32 256, %s5105_s12  ;;  %1207 = vst [vmem:[#allocation17 + $0x48] sm:$0xff] %v1204_v51  ;;  %v5275_v56 = vsel %vm506_vm2, %v688_v54, %v8128_v0  ;;  %v671_v58 = vsel %vm482_vm1, %v4544_v48, %v8128_v0  ;;  %v5296_v63 = vsel %vm489_vm3, %v608_v57, %v8128_v0 }
  0x25   : > { %v1324_v50 = vld [vmem:[%s1323_s28] ss:$0 sm:$0xff]  ;;  %1282 = vst [vmem:[#allocation18 + $0x1] sm:$0x1] %v1279_v49  ;;  %1225 = vst [vmem:[#allocation17 + $0x50] sm:$0xff] %v1222_v52  ;;  %s5285_s13 = sand.u32 127, %s5250_s25  ;;  %v532_v60 = vstv %s5265_s15  ;;  %v4871_v62 = vpack.c.bf16 %v5275_v56, %v5270_v55  ;;  %v5301_v1 = vsel %vm489_vm3, %v671_v58, %v8128_v0  ;;  %v1516_v9 = vmul.f32 %v5270_v55, %v5270_v55 }
  0x26   : > { %1327 = vst [vmem:[#allocation19 + $0x1] sm:$0x1] %v1324_v50  ;;  %8132 = vst [vmem:[#allocation21_spill] sm:$0xff] %v5275_v56  ;;  %v4552_v59 = vld [vmem:[%s5129_s21 + $0x128] sm:$0x7f]  ;;  %s948_s14 = sshrl.u32 %s5265_s15, 10  ;;  %v5306_v7 = vadd.s32 %v532_v60, %v5111_v5  ;;  %v4873_v13 = vpack.c.bf16 %v5301_v1, %v5296_v63 }
  0x27   : > { %v4585_v61 = vld [vmem:[%s5134_s24 + $0x10] sm:%s5250_s25]  ;;  %v4536_v11 = vld [vmem:[%s5129_s21 + $0x58] sm:%s5285_s13]  ;;  %p4573_p10 = scmp.gt.s32.totalorder %s948_s14, 1  ;;  %s951_s16 = sand.u32 1023, %s5265_s15   ;;  %4872 = vmatprep.subr.bf16.mxu0 %v4871_v62  ;;  %v751_v17 = vsel %vm482_vm1, %v4552_v59, %v8128_v0 }
  0x28   : > { %v4530_v6 = vld [vmem:[%s5129_s21 + $0x10] sm:%s5285_s13]  ;;  %v1050_v12 = vsel %vm5237_vm5, %v8128_v0, %v4585_v61  ;;  %v585_v5 = vsel %vm5237_vm5, %v8128_v0, %v4536_v11  ;;  %v4591_v15 = vld [vmem:[%s5134_s24 + $0x58] sm:%s5250_s25]  ;;  %vm534_vm6 = vcmp.lt.s32.totalorder %v5306_v7, 1104  ;;  %4874 = vmatpush1.bf16.msra.mxu0 %v4873_v13  ;;  %s5353_s17 = sshrl.u32 %s951_s16, 7  ;;  %v5406_v41 = vsel %vm506_vm2, %v751_v17, %v8128_v0 }
  0x29   : > { %v522_v14 = vsel %vm5237_vm5, %v8128_v0, %v4530_v6  ;;  %v4597_v16 = vld [vmem:[%s5134_s24 + $0xa0] sm:%s5250_s25]  ;;  %v590_v19 = vsel %vm482_vm1, %v585_v5, %v8128_v0  ;;  %s8654_s14 = smov (%p4573_p10, %s948_s14), 1  ;;  %v1112_v22 = vsel %vm5237_vm5, %v8128_v0, %v4591_v15  ;;  %v4603_v23 = vld [vmem:[%s5134_s24 + $0xe8] sm:%s5250_s25]  ;;  %v1063_v27 = vsel %vm534_vm6, %v1050_v12, %v8128_v0  ;;  %8133 = vst [vmem:[#allocation22_spill] sm:$0xff] %v5406_v41 }
  0x2a   : > { %v527_v18 = vsel %vm482_vm1, %v522_v14, %v8128_v0  ;;  %v4542_v24 = vld [vmem:[%s5129_s21 + $0xa0] sm:%s5285_s13]  ;;  %v5351_v26 = vsel %vm534_vm6, %v590_v19, %v8128_v0  ;;  %v1125_v28 = vsel %vm534_vm6, %v1112_v22, %v8128_v0  ;;  %v4548_v29 = vld [vmem:[%s5129_s21 + $0xe8] sm:%s5285_s13]  ;;  %s5363_s24 = sshll.u32 %s8654_s14, 3  ;;  %1066 = vst [vmem:[#allocation17 + $0x10] sm:$0xff] %v1063_v27  ;;  %v1174_v30 = vsel %vm5237_vm5, %v8128_v0, %v4597_v16 }
  0x2b   : > { %v5346_v25 = vsel %vm534_vm6, %v527_v18, %v8128_v0  ;;  %1128 = vst [vmem:[#allocation17 + $0x28] sm:$0xff] %v1125_v28  ;;  %v1236_v31 = vsel %vm5237_vm5, %v8128_v0, %v4603_v23  ;;  %v4558_v34 = vld [vmem:[%s5129_s21 + $0x170] sm:$0x7f]  ;;  %v4550_v35 = vld [vmem:[%s5129_s21 + $0x120] sm:$0x7f]  ;;  %s955_s20 = scalar_lea.vmem %s7820_s6, %s5363_s24  ;;  %s1000_s30 = scalar_lea.vmem %s7819_s5, %s5363_s24  ;;  %v1187_v36 = vsel %vm534_vm6, %v1174_v30, %v8128_v0  ;;  %v648_v38 = vsel %vm5237_vm5, %v8128_v0, %v4542_v24  ;;  %v4560_v12 = vld [vmem:[%s5129_s21 + $0x178] sm:%s5285_s13] }
  0x2c   : > { %v4880_v32 = vpack.c.bf16 %v5351_v26, %v5346_v25  ;;  %v1241_v37 = vsel %vm1196_vm4, %v1236_v31, %v8128_v0  ;;  %s957_s8 = scalar_lea.vmem %s955_s20, %s5353_s17  ;;  %s1002_s11 = scalar_lea.vmem %s1000_s30, %s5353_s17  ;;  %1190 = vst [vmem:[#allocation17 + $0x40] sm:$0xff] %v1187_v36  ;;  %v653_v40 = vsel %vm482_vm1, %v648_v38, %v8128_v0  ;;  %v711_v10 = vsel %vm5237_vm5, %v8128_v0, %v4548_v29  ;;  %v4556_v43 = vld [vmem:[%s5129_s21 + $0x168] sm:$0x7f]  ;;  %v4554_v6 = vld [vmem:[%s5129_s21 + $0x130] sm:%s5285_s13]  ;;  %v4564_v5 = vld [vmem:[%s5129_s21 + $0x1b8] sm:$0x7f] }
  0x2d   : > { %v1249_v39 = vsel %vm534_vm6, %v1241_v37, %v8128_v0  ;;  %v958_v44 = vld [vmem:[%s957_s8] ss:$0 sm:$0xff]  ;;  %s1291_s15 = scalar_lea.vmem %s7818_s4, %s5363_s24  ;;  %s1336_s18 = scalar_lea.vmem %s7817_s3, %s5363_s24  ;;  %v5421_v47 = vsel %vm534_vm6, %v653_v40, %v8128_v0  ;;  %v716_v48 = vsel %vm482_vm1, %v711_v10, %v8128_v0  ;;  %v814_v49 = vsel %vm482_vm1, %v4558_v34, %v8128_v0  ;;  %v4562_v15 = vld [vmem:[%s5129_s21 + $0x1b0] sm:$0x7f] }
  0x2e   : > { %4881 = vmatpush3.bf16.msra.mxu1 %v4880_v32  ;;  %v1003_v46 = vld [vmem:[%s1002_s11] ss:$0 sm:$0xff]  ;;  %1252 = vst [vmem:[#allocation17 + $0x58] sm:$0xff] %v1249_v39  ;;  %v734_v50 = vsel %vm482_vm1, %v4550_v35, %v8128_v0  ;;  %961 = vst [vmem:[#allocation15 + $0x2] sm:$0x1] %v958_v44  ;;  %s1293_s24 = scalar_lea.vmem %s1291_s15, %s5353_s17  ;;  %s1338_s19 = scalar_lea.vmem %s1336_s18, %s5353_s17  ;;  %v5437_v51 = vsel %vm534_vm6, %v716_v48, %v8128_v0  ;;  %v5442_v52 = vsel %vm506_vm2, %v814_v49, %v8128_v0  ;;  %v7822_v10 = vmov 1.0  }
  0x2f   : > { %4882 = vmatprep.subr.bf16.mxu1 %v7824_v2  ;;  %1006 = vst [vmem:[#allocation16 + $0x2] sm:$0x1] %v1003_v46  ;;  %8134 = vst [vmem:[#allocation23_spill] sm:$0xff] %v5437_v51  ;;  %v5447_v53 = vsel %vm489_vm3, %v734_v50, %v8128_v0  ;;  %v1294_v54 = vld [vmem:[%s1293_s24] ss:$0 sm:$0xff]  ;;  %v4883_v58 = vpack.c.bf16 %v5437_v51, %v5421_v47  ;;  %v4875_v59 = vpack.c.bf16 %v5442_v52, %v5406_v41  ;;  %s398_s15 = sand.u32 1, %s5014_s26  }
  0x30   : > { %8135 = vst [vmem:[#allocation24_spill] sm:$0xff] %v5442_v52  ;;  %v1339_v57 = vld [vmem:[%s1338_s19] ss:$0 sm:$0xff]  ;;  %v797_v60 = vsel %vm482_vm1, %v4556_v43, %v8128_v0  ;;  %1297 = vst [vmem:[#allocation18 + $0x2] sm:$0x1] %v1294_v54  ;;  %v774_v11 = vsel %vm5237_vm5, %v8128_v0, %v4554_v6  ;;  %v837_v14 = vsel %vm5237_vm5, %v8128_v0, %v4560_v12  ;;  %s4951_s26 = smul.u32 168, %s398_s15 }
  0x31   : > { %1342 = vst [vmem:[#allocation19 + $0x2] sm:$0x1] %v1339_v57  ;;  %v5459_v61 = vsel %vm489_vm3, %v797_v60, %v8128_v0  ;;  %4876 = vmatprep.subr.bf16.mxu0 %v4875_v59  ;;  %v779_v13 = vsel %vm482_vm1, %v774_v11, %v8128_v0  ;;  %v1510_v16 = vmul.f32 %v5161_v20, %v5161_v20  ;;  %v4566_v22 = vld [vmem:[%s5129_s21 + $0x1c0] sm:%s5285_s13]  ;;  %s919_s21 = sshrl.u32 %s5105_s12, 10  ;;  %s922_s13 = sand.u32 1023, %s5105_s12  }
  0x32   : > { %8136 = vst [vmem:[#allocation25_spill] sm:$0xff] %v5459_v61  ;;  %4884 = vmatpush3.bf16.msra.mxu1 %v4883_v58  ;;  %v4877_v62 = vpack.c.bf16 %v5459_v61, %v5447_v53  ;;  %v1513_v17 = vmul.f32 %v5166_v21, %v5166_v21  ;;  %v1509_v18 = vmul.f32 %v5202_v33, %v5202_v33  ;;  %p4569_p11 = scmp.gt.s32.totalorder %s919_s21, 1  ;;  %s5590_s17 = sshrl.u32 %s922_s13, 7 }
  0x33   : > { %4885 = vmatprep.subr.bf16.mxu1 %v7824_v2  ;;  %v1512_v19 = vmul.f32 %v5227_v42, %v5227_v42  ;;  %v1515_v23 = vmul.f32 %v5296_v63, %v5296_v63  ;;  %v5494_v24 = vsel %vm534_vm6, %v779_v13, %v8128_v0  ;;  %v842_v27 = vsel %vm482_vm1, %v837_v14, %v8128_v0  ;;  %s6562_s14 = scalar_lea.vmem [#allocation13], %s4951_s26 }
  0x34   : > { %4878 = vmatpush1.bf16.msra.mxu0 %v4877_v62  ;;  %8137 = vst [vmem:[#allocation26_spill] sm:$0xff] %v5494_v24  ;;  %v877_v28 = vsel %vm482_vm1, %v4564_v5, %v8128_v0  ;;  %v1511_v29 = vmul.f32 %v5346_v25, %v5346_v25  ;;  %v5507_v30 = vsel %vm534_vm6, %v842_v27, %v8128_v0  ;;  %s8656_s21 = smov (%p4569_p11, %s919_s21), 1  ;;  %v5617_v27 = vsub.s32 2, %v5109_v4 }
  0x35   : > { %8138 = vst [vmem:[#allocation27_spill] sm:$0xff] %v5507_v30  ;;  %v5512_v31 = vsel %vm506_vm2, %v877_v28, %v8128_v0  ;;  %v860_v32 = vsel %vm482_vm1, %v4562_v15, %v8128_v0  ;;  %v1514_v34 = vmul.f32 %v5351_v26, %v5351_v26  ;;  %v4886_v35 = vpack.c.bf16 %v5507_v30, %v5494_v24  ;;  %s5592_s20 = sshll.u32 %s8656_s21, 3  ;;  %v5619_v28 = vld [vmem:[#allocation17 + $0x1a] ss:$8 sm:$0x7] }
  0x36   : > { %8139 = vst [vmem:[#allocation28_spill] sm:$0xff] %v5512_v31  ;;  %1380 = vmatprep.subr.mxu0 %v5512_v31  ;;  %v5525_v36 = vsel %vm489_vm3, %v860_v32, %v8128_v0  ;;  %v900_v8 = vsel %vm5237_vm5, %v8128_v0, %v4566_v22  ;;  %v1518_v37 = vmul.f32 %v5301_v1, %v5301_v1  ;;  %s926_s30 = scalar_lea.vmem %s7820_s6, %s5592_s20  ;;  %s971_s12 = scalar_lea.vmem %s7819_s5, %s5592_s20  ;;  %8144 = vst [vmem:[#allocation33_spill] sm:$0xff] %v5617_v27  ;;  %v5623_v32 = vld [vmem:[#allocation17 + $0x1f] ss:$8 sm:$0x7] }
  0x37   : > { %8140 = vst [vmem:[#allocation29_spill] sm:$0xff] %v5525_v36  ;;  %v905_v38 = vsel %vm482_vm1, %v900_v8, %v8128_v0  ;;  %v4888_v39 = vpack.c.bf16 %v1513_v17, %v1510_v16  ;;  %v4890_v40 = vpack.c.bf16 %v1512_v19, %v1509_v18  ;;  %4887 = vmatpush3.bf16.msra.mxu1 %v4886_v35  ;;  %s928_s8 = scalar_lea.vmem %s926_s30, %s5590_s17  ;;  %s973_s25 = scalar_lea.vmem %s971_s12, %s5590_s17  ;;  %v5604_v17 = vld [vmem:[#allocation17] ss:$8 sm:$0x7]  ;;  %v5607_v18 = vsub.s32 0, %v5109_v4 }
  0x38   : > { %1381 = vmatpush1.msra.mxu0 %v5525_v36  ;;  %v1517_v45 = vmul.f32 %v5421_v47, %v5421_v47  ;;  %4811 = vmatprep.subr.mxu1 %v7830_v3  ;;  %v5546_v43 = vsel %vm534_vm6, %v905_v38, %v8128_v0  ;;  %v1519_v44 = vmul.f32 %v5275_v56, %v5275_v56  ;;  %v929_v15 = vld [vmem:[%s928_s8] ss:$0 sm:$0xff]  ;;  %v5609_v19 = vld [vmem:[#allocation17 + $0x5] ss:$8 sm:$0x7]  ;;  %s1262_s24 = scalar_lea.vmem %s7818_s4, %s5592_s20  ;;  %s1307_s22 = scalar_lea.vmem %s7817_s3, %s5592_s20 }
  0x39   : > { %4619 = vmatmul.mubr.msk.f32.vlgmr.msra.gmra.mrb[0].mxu0 %vm1364_vm7, %v7822_v10  ;;  %8141 = vst [vmem:[#allocation30_spill] sm:$0xff] %v5546_v43  ;;  %4889 = vmatprep.subr.bf16.mxu0 %v4888_v39  ;;  %v1520_v46 = vmul.f32 %v5437_v51, %v5437_v51  ;;  %v4901_v48 = vpack.c.bf16 %v1514_v34, %v1511_v29  ;;  %931 = vst [vmem:[#allocation15] sm:$0x1] %v929_v15  ;;  %v974_v16 = vld [vmem:[%s973_s25] ss:$0 sm:$0xff]  ;;  %s1264_s19 = scalar_lea.vmem %s1262_s24, %s5590_s17  ;;  %s1309_s23 = scalar_lea.vmem %s1307_s22, %s5590_s17 }
  0x3a   : > { %4891 = vmatpush1.bf16.msra.mxu0 %v4890_v40  ;;  %v1522_v49 = vmul.f32 %v5406_v41, %v5406_v41  ;;  %v1525_v50 = vmul.f32 %v5442_v52, %v5442_v52  ;;  %v1521_v7 = vmul.f32 %v5447_v53, %v5447_v53  ;;  %v1524_v54 = vmul.f32 %v5459_v61, %v5459_v61  ;;  %v5625_v34 = vld [vmem:[#allocation17 + $0x1] ss:$8 sm:$0x7]  ;;  %v5636_v39 = vld [vmem:[#allocation17 + $0x6] ss:$8 sm:$0x7] }
  0x3b   : > { %v4892_v57 = vpack.c.bf16 %v1519_v44, %v1516_v9  ;;  %v4894_v58 = vpack.c.bf16 %v1518_v37, %v1515_v23  ;;  %1594 = vmatprep.mubr.f32.mxu0 %v7830_v3  ;;  %4812 = vmatpush3.msra.mxu1 %v5546_v43  ;;  %v1523_v60 = vmul.f32 %v5494_v24, %v5494_v24  ;;  %v5614_v23 = vsub.s32 1, %v5109_v4  ;;  %v5700_v38 = vld [vmem:[#allocation17 + $0x1d] ss:$8 sm:$0x7]  ;;  %s4744_s17 = smul.u32 (%p5099_p4), 24, %s5087_s1 }
  0x3c   : > { %v4896_v59 = vpack.c.bf16 %v1525_v50, %v1522_v49  ;;  %4900 = vmatprep.subr.bf16.mxu1 %v7824_v2  ;;  %4814 = vmatmul.mubr.msk.f32.vlgmr.msra.gmra.mrb[0].mxu1 %vm1364_vm7, %v7822_v10  ;;  %v1526_v62 = vmul.f32 %v5507_v30, %v5507_v30  ;;  %v4904_v6 = vpack.c.bf16 %v1520_v46, %v1517_v45  ;;  %v5647_v46 = vld [vmem:[#allocation17 + $0x1b] ss:$8 sm:$0x7]  ;;  %v5698_v45 = vld [vmem:[#allocation17 + $0x18] ss:$8 sm:$0x7] }
  0x3d   : > { %4902 = vmatpush3.bf16.msra.mxu1 %v4901_v48  ;;  %4893 = vmatprep.subr.bf16.mxu0 %v4892_v57  ;;  %v4898_v11 = vpack.c.bf16 %v1524_v54, %v1521_v7  ;;  %v1528_v12 = vmul.f32 %v5512_v31, %v5512_v31  ;;  %v1527_v14 = vmul.f32 %v5525_v36, %v5525_v36  ;;  %v5649_v48 = vld [vmem:[#allocation17 + $0x30] ss:$8 sm:$0x7]  ;;  %v5659_v57 = vld [vmem:[#allocation17 + $0x2] ss:$8 sm:$0x7]  ;;  %s7766_s30 = scalar_lea.vmem (%p5099_p4), %s7821_s7, %s4744_s17 }
  0x3e   : > { %4895 = vmatpush1.bf16.msra.mxu0 %v4894_v58  ;;  %4903 = vmatprep.subr.bf16.mxu1 %v7824_v2  ;;  %v4907_v13 = vpack.c.bf16 %v1526_v62, %v1523_v60  ;;  %v1529_v5 = vmul.f32 %v5546_v43, %v5546_v43  ;;  %976 = vst [vmem:[#allocation16] sm:$0x1] %v974_v16  ;;  %8142 = vst [vmem:[#allocation31_spill] sm:$0xff] %v5607_v18  ;;  %v5679_v16 = vld [vmem:[#allocation17 + $0x1c] ss:$8 sm:$0x7] }
  0x3f   : > { %4897 = vmatprep.subr.bf16.mxu0 %v4896_v59  ;;  %4830 = vmatprep.mubr.msk.f32.mxu1 %vm5026_vm0, %v7830_v3  ;;  %8143 = vst [vmem:[#allocation32_spill] sm:$0xff] %v5614_v23  ;;  %v5710_v49 = vld [vmem:[#allocation17 + $0x4] ss:$8 sm:$0x7]  ;;  %v5028_v59 = vmov 1966171168   ;;  %v8152_v30 = vrot.slane %v5609_v19, %v5617_v27  ;;  %v8225_v61 = vrot.slane %v5647_v46, %v5617_v27 }
  0x40   : > { %v1721_v15 = vunpack.c.l.s4 %v5028_v59  ;;  %v5740_v40 = vld [vmem:[#allocation15] sm:$0x7]  ;;  %v2307_v59 = vrot.slane %v5710_v49, %v5617_v27 }
  0x41   : > { %4905 = vmatpush3.bf16.msra.mxu1 %v4904_v6  ;;  %v5959_v52 = vld [vmem:[#allocation17 + $0x48] ss:$8 sm:$0x7] }
  0x42   : > { %4899 = vmatpush1.bf16.msra.mxu0 %v4898_v11  ;;  %4906 = vmatprep.subr.bf16.mxu1 %v7824_v2  ;;  %v5669_v11 = vld [vmem:[#allocation17 + $0x7] ss:$8 sm:$0x7]  ;;  %v1722_v50 = vunpack.c.0.s8 %v1721_v15 }
  0x43   : > { %1542 = vmatprep.subr.mxu0 %v1528_v12 }
  0x44   : > { %v5800_v15 = vsub.s32 %v1722_v50, %v5109_v4  ;;  %v8150_v50 = vrot.slane %v5604_v17, %v5617_v27 }
  0x45   : > { %4908 = vmatpush3.bf16.msra.mxu1 %v4907_v13 }
  0x46   : > { %1543 = vmatpush1.msra.mxu0 %v1527_v14  ;;  %4828 = vmatprep.subr.mxu1 %v7830_v3  ;;  %v5688_v14 = vld [vmem:[#allocation17 + $0x3] ss:$8 sm:$0x7]  ;;  %8149 = vst [vmem:[#allocation34_spill] sm:$0xff] %v5800_v15 }
  0x47   : > { %4621 = vmatmul.mubr.msk.f32.vlgmr.msra.gmra.mrb[2].mxu0 %vm1364_vm7, %v7822_v10 }
  0x48   : > { %3883 = vmatprep.mubr.f32.mxu0 %v7830_v3 }
  0x49   : > { %4829 = vmatpush3.msra.mxu1 %v1529_v5  ;;  %v5729_v5 = vld [vmem:[#allocation17 + $0x1e] ss:$8 sm:$0x7] }
  0x4a   : > { %4831 = vmatmul.mubr.msk.f32.vlgmr.msra.gmra.mrb[2].mxu1 %vm1364_vm7, %v7822_v10  ;;  %4921 = vmatprep.subr.bf16.mxu1 %v7824_v2  ;;  %v5805_v10 = vsel %vm482_vm1, 1.0, %v7830_v3 }
  0x4b   : > { %4847 = vmatprep.mubr.msk.f32.mxu1 %vm5026_vm0, %v7830_v3 }
 0x10c   : > { %v5611_v22 = vpop.f32.mrb[0].mxu0 }
 0x10d   : > { %v5621_v29 = vpop.f32.mrb[1].mxu0  ;;  %v5738_v7 = vmul.f32 0.020408163, %v5611_v22  ;;  %v5788_v22 = vsel %vm5746_vm12, 1.0, %v7830_v3 }
 0x10e   : > { %v5757_v44 = vmul.f32 0.020408163, %v5621_v29  ;;  %v5824_v24 = vmul.f32 %v5788_v22, %v8152_v30  ;;  %v8158_v30 = vrot.slane %v5659_v57, %v5607_v18 }
 0x10f   : > { %v1505_v58 = vpop.f32.mrb[0].mxu1  ;;  %v1677_v6 = vmul.f32 %v5738_v7, %v5738_v7 }
 0x110   : > { %v4815_v12 = vpop.f32.mrb[1].mxu1  ;;  %v5777_v62 = vmul.f32 0.020408163, %v1505_v58  ;;  %v1678_v58 = vmul.f32 %v5757_v44, %v5757_v44  ;;  %8153 = vst [vmem:[#allocation36_spill] sm:$0xff] %v5824_v24  ;;  %v5844_v24 = vmul.f32 %v5805_v10, %v8158_v30 }
 0x111   : > { %v5719_v12 = vld [vmem:[#allocation17 + $0x19] ss:$8 sm:$0x7]  ;;  %v5869_v30 = vld [vmem:[#allocation17 + $0x34] ss:$8 sm:$0x7] }
 0x112   : > { %v2332_v35 = vrot.slane %v5719_v12, %v5617_v27  ;;  %v1679_v8 = vmul.f32 %v5777_v62, %v5777_v62  ;;  %8159 = vst [vmem:[#allocation39_spill] sm:$0xff] %v5844_v24  ;;  %v5883_v24 = vld [vmem:[#allocation17 + $0x36] ss:$8 sm:$0x7] }
 0x11a   : > { %v1596_v2 = vpop.f32.mrb[2].mxu0 }
 0x11b   : > { %v1674_v60 = vmul.f32 0.020408163, %v1596_v2  ;;  %v1598_v9 = vpop.f32.mrb[3].mxu0  ;;  %v5797_v2 = vsel %vm5763_vm13, 1.0, %v7830_v3 }
 0x11c   : > { %v1675_v54 = vmul.f32 0.020408163, %v1598_v9  ;;  %v5810_v9 = vsel %vm2160_vm10, 1.0, %v7830_v3  ;;  %v8154_v3 = vrot.slane %v5625_v34, %v5617_v27 }
 0x11d   : > { %v1680_v29 = vsub.f32 %v1674_v60, %v1677_v6  ;;  %v1667_v37 = vpop.f32.mrb[2].mxu1  ;;  %v5818_v60 = vmul.f32 %v5788_v22, %v8150_v50  ;;  %v5838_v50 = vld [vmem:[#allocation17 + $0x31] ss:$8 sm:$0x7] }
 0x11e   : > { %v1681_v13 = vsub.f32 %v1675_v54, %v1678_v58  ;;  %v1676_v0 = vmul.f32 0.020408163, %v1667_v37  ;;  %v4832_v6 = vpop.f32.mrb[3].mxu1  ;;  %v5830_v54 = vmul.f32 %v5797_v2, %v8154_v3  ;;  %v8156_v37 = vrot.slane %v5636_v39, %v5617_v27 }
 0x11f   : > { %8151 = vst [vmem:[#allocation35_spill] sm:$0xff] %v5818_v60  ;;  %v1683_v43 = vmax.f32 %v1680_v29, 0.0  ;;  %v8160_v60 = vmov 0.0  }
 0x120   : > { %8155 = vst [vmem:[#allocation37_spill] sm:$0xff] %v5830_v54  ;;  %v5836_v58 = vmul.f32 %v5797_v2, %v8156_v37  ;;  %v1684_v29 = vmax.f32 %v1681_v13, 0.0  ;;  %v1682_v6 = vsub.f32 %v1676_v0, %v1679_v8  ;;  %v5849_v3 = vsel %vm2289_vm11, 1.0, %v8160_v60 }
 0x121   : > { %v1686_v54 = vadd.f32 0.001, %v1683_v43  ;;  %v8161_v37 = vrot.slane %v5659_v57, %v5614_v23  ;;  %v8163_v0 = vrot.slane %v5659_v57, %v5617_v27  ;;  %v8165_v8 = vrot.slane %v5669_v11, %v5607_v18 }
 0x122   : > { %8157 = vst [vmem:[#allocation38_spill] sm:$0xff] %v5836_v58  ;;  %v1687_v43 = vadd.f32 0.001, %v1684_v29  ;;  %v1685_v60 = vmax.f32 %v1682_v6, 0.0  ;;  %v8169_v57 = vrot.slane %v5679_v16, %v5617_v27  ;;  %v8173_v6 = vrot.slane %v5698_v45, %v5617_v27 }
 0x123   : > { %v5855_v58 = vmul.f32 %v5805_v10, %v8161_v37  ;;  %v5861_v13 = vmul.f32 %v5805_v10, %v8163_v0  ;;  %v5867_v4 = vmul.f32 %v5805_v10, %v8165_v8  ;;  %v8167_v37 = vrot.slane %v5669_v11, %v5617_v27 }
 0x124   : > { %v5881_v0 = vmul.f32 %v5805_v10, %v8169_v57  ;;  %4982 = vrsqrt.f32 %v1686_v54  ;;  %v8171_v8 = vrot.slane %v5688_v14, %v5617_v27  ;;  %v1688_v57 = vadd.f32 0.001, %v1685_v60 }
 0x125   : > { %8162 = vst [vmem:[#allocation40_spill] sm:$0xff] %v5855_v58  ;;  %8164 = vst [vmem:[#allocation41_spill] sm:$0xff] %v5861_v13  ;;  %v5875_v58 = vmul.f32 %v5805_v10, %v8167_v37  ;;  %v5895_v37 = vmul.f32 %v5810_v9, %v8173_v6  ;;  %4984 = vrsqrt.f32 %v1687_v43  ;;  %v1862_v54 = vrot.slane %v5623_v32, %v5614_v23  ;;  %v5919_v43 = vld [vmem:[#allocation17 + $0x32] ss:$8 sm:$0x7] }
 0x126   : > { %8166 = vst [vmem:[#allocation42_spill] sm:$0xff] %v5867_v4  ;;  %8170 = vst [vmem:[#allocation44_spill] sm:$0xff] %v5881_v0  ;;  %v5889_v29 = vmul.f32 %v5810_v9, %v8171_v8  ;;  %v5898_v4 = vmul.f32 %v5849_v3, %v2307_v59  ;;  %v1887_v0 = vrot.slane %v5869_v30, %v5614_v23  ;;  %4986 = vrsqrt.f32 %v1688_v57  ;;  %v5937_v13 = vld [vmem:[#allocation17 + $0x33] ss:$8 sm:$0x7] }
 0x127   : > { %8168 = vst [vmem:[#allocation43_spill] sm:$0xff] %v5875_v58  ;;  %8174 = vst [vmem:[#allocation46_spill] sm:$0xff] %v5895_v37  ;;  %v5904_v58 = vld [vmem:[#allocation17 + $0x35] ss:$8 sm:$0x7]  ;;  %v5907_v8 = vmul.f32 %v5849_v3, %v2332_v35  ;;  %v8177_v6 = vrot.slane %v5604_v17, %v5614_v23  ;;  %v2120_v59 = vrot.slane %v5838_v50, %v5614_v23 }
 0x128   : > { %8172 = vst [vmem:[#allocation45_spill] sm:$0xff] %v5889_v29  ;;  %8175 = vst [vmem:[#allocation47_spill] sm:$0xff] %v5898_v4  ;;  %v2145_v60 = vrot.slane %v5883_v24, %v5614_v23  ;;  %v8179_v4 = vrot.slane %v5609_v19, %v5614_v23  ;;  %v5935_v29 = vld [vmem:[#allocation17 + $0x37] ss:$8 sm:$0x7]  ;;  %v8183_v57 = vrot.slane %v5625_v34, %v5614_v23 }
 0x129   : > { %8176 = vst [vmem:[#allocation48_spill] sm:$0xff] %v5907_v8  ;;  %v5913_v37 = vmul.f32 %v5788_v22, %v8177_v6  ;;  %v8181_v8 = vrot.slane %v5619_v28, %v5614_v23  ;;  %v2016_v31 = vrot.slane %v5904_v58, %v5614_v23  ;;  %v5980_v41 = vmul.f32 %v5805_v10, %v2120_v59 }
 0x12a   : > { %v5925_v35 = vmul.f32 %v5788_v22, %v8179_v4  ;;  %v5943_v51 = vmul.f32 %v5797_v2, %v8183_v57  ;;  %v8185_v4 = vrot.slane %v5636_v39, %v5614_v23  ;;  %v5962_v57 = vmul.f32 %v5788_v22, %v1862_v54 }
 0x12b   : > { %8178 = vst [vmem:[#allocation49_spill] sm:$0xff] %v5913_v37  ;;  %v5931_v6 = vmul.f32 %v5788_v22, %v8181_v8  ;;  %v1991_v37 = vrot.slane %v5649_v48, %v5614_v23  ;;  %v8187_v8 = vrot.slane %v5647_v46, %v5614_v23  ;;  %8195 = vst [vmem:[#allocation59_spill] sm:$0xff] %v5980_v41 }
 0x12c   : > { %8180 = vst [vmem:[#allocation50_spill] sm:$0xff] %v5925_v35  ;;  %8184 = vst [vmem:[#allocation52_spill] sm:$0xff] %v5943_v51  ;;  %v5949_v35 = vmul.f32 %v5797_v2, %v8185_v4  ;;  %v5965_v51 = vmul.f32 %v5788_v22, %v1887_v0  ;;  %v8191_v4 = vrot.slane %v5669_v11, %v5614_v23 }
 0x12d   : > { %8182 = vst [vmem:[#allocation51_spill] sm:$0xff] %v5931_v6  ;;  %v5955_v6 = vmul.f32 %v5797_v2, %v8187_v8  ;;  %8189 = vst [vmem:[#allocation55_spill] sm:$0xff] %v5962_v57  ;;  %v8193_v8 = vrot.slane %v5679_v16, %v5614_v23  ;;  %v2249_v54 = vrot.slane %v5919_v43, %v5614_v23 }
 0x12e   : > { %8186 = vst [vmem:[#allocation53_spill] sm:$0xff] %v5949_v35  ;;  %8190 = vst [vmem:[#allocation56_spill] sm:$0xff] %v5965_v51  ;;  %v5971_v35 = vmul.f32 %v5805_v10, %v8191_v4  ;;  %v2274_v0 = vrot.slane %v5935_v29, %v5614_v23  ;;  %v2378_v11 = vrot.slane %v5937_v13, %v5614_v23 }
 0x12f   : > { %8188 = vst [vmem:[#allocation54_spill] sm:$0xff] %v5955_v6  ;;  %v5977_v6 = vmul.f32 %v5805_v10, %v8193_v8  ;;  %v5989_v4 = vmul.f32 %v5797_v2, %v1991_v37  ;;  %v5992_v51 = vmul.f32 %v5805_v10, %v2145_v60  ;;  %v2403_v8 = vrot.slane %v5959_v52, %v5614_v23 }
 0x130   : > { %8192 = vst [vmem:[#allocation57_spill] sm:$0xff] %v5971_v35  ;;  %v2124_v59 = vrot.slane %v5838_v50, %v5617_v27  ;;  %v5999_v41 = vmul.f32 %v5797_v2, %v2016_v31  ;;  %v8199_v57 = vrot.slane %v5688_v14, %v5614_v23  ;;  %v8201_v37 = vrot.slane %v5698_v45, %v5614_v23 }
 0x131   : > { %8194 = vst [vmem:[#allocation58_spill] sm:$0xff] %v5977_v6  ;;  %8196 = vst [vmem:[#allocation60_spill] sm:$0xff] %v5989_v4  ;;  %v8203_v4 = vrot.slane %v5700_v38, %v5614_v23  ;;  %v6043_v56 = vmul.f32 %v5810_v9, %v2274_v0 }
 0x132   : > { %8197 = vst [vmem:[#allocation61_spill] sm:$0xff] %v5992_v51  ;;  %8198 = vst [vmem:[#allocation62_spill] sm:$0xff] %v5999_v41  ;;  %v6005_v6 = vmul.f32 %v5810_v9, %v8199_v57  ;;  %v6011_v60 = vmul.f32 %v5810_v9, %v8201_v37  ;;  %v2149_v51 = vrot.slane %v5883_v24, %v5617_v27 }
 0x133   : > { %v6019_v31 = vmul.f32 %v5810_v9, %v8203_v4  ;;  %v8205_v41 = vrot.slane %v5710_v49, %v5614_v23  ;;  %v4983_v4 = vpop.eup %4982  ;;  %8212 = vst [vmem:[#allocation70_spill] sm:$0xff] %v6043_v56  ;;  %v6059_v0 = vmul.f32 %v5805_v10, %v2124_v59  ;;  %v8219_v59 = vrot.slane %v5619_v28, %v5617_v27 }
 0x134   : > { %8200 = vst [vmem:[#allocation63_spill] sm:$0xff] %v6005_v6  ;;  %8202 = vst [vmem:[#allocation64_spill] sm:$0xff] %v6011_v60  ;;  %v8207_v6 = vrot.slane %v5719_v12, %v5614_v23  ;;  %v8209_v60 = vrot.slane %v5729_v5, %v5614_v23 }
 0x135   : > { %8204 = vst [vmem:[#allocation65_spill] sm:$0xff] %v6019_v31  ;;  %v6025_v57 = vmul.f32 %v5849_v3, %v8205_v41  ;;  %v6040_v31 = vmul.f32 %v5810_v9, %v2249_v54  ;;  %v6046_v41 = vmul.f32 %v5849_v3, %v2378_v11  ;;  %v2020_v54 = vrot.slane %v5904_v58, %v5617_v27 }
 0x136   : > { %v6031_v37 = vmul.f32 %v5849_v3, %v8207_v6  ;;  %v6037_v35 = vmul.f32 %v5849_v3, %v8209_v60  ;;  %v1891_v6 = vrot.slane %v5869_v30, %v5617_v27  ;;  %v6054_v60 = vmul.f32 %v5849_v3, %v2403_v8  ;;  %8216 = vst [vmem:[#allocation73_spill] sm:$0xff] %v6059_v0 }
 0x137   : > { %8206 = vst [vmem:[#allocation66_spill] sm:$0xff] %v6025_v57  ;;  %8211 = vst [vmem:[#allocation69_spill] sm:$0xff] %v6040_v31  ;;  %v8214_v57 = vrot.slane %v5740_v40, %v5607_v18  ;;  %v8217_v11 = vrot.slane %v5740_v40, %v5614_v23  ;;  %v2253_v31 = vrot.slane %v5919_v43, %v5617_v27 }
 0x138   : > { %8208 = vst [vmem:[#allocation67_spill] sm:$0xff] %v6031_v37  ;;  %8210 = vst [vmem:[#allocation68_spill] sm:$0xff] %v6037_v35  ;;  %v4985_v37 = vpop.eup %4984  ;;  %v2278_v8 = vrot.slane %v5935_v29, %v5617_v27  ;;  %v6076_v0 = vmul.f32 %v5788_v22, %v8219_v59  ;;  %v2116_v59 = vrot.slane %v5838_v50, %v5607_v18 }
 0x139   : > { %8213 = vst [vmem:[#allocation71_spill] sm:$0xff] %v6046_v41  ;;  %v1709_v36 = vmul.f32 %v4983_v4, %v8214_v57  ;;  %8215 = vst [vmem:[#allocation72_spill] sm:$0xff] %v6054_v60  ;;  %v1710_v56 = vmul.f32 %v4985_v37, %v8217_v11  ;;  %v6065_v41 = vmul.f32 %v5805_v10, %v2149_v51  ;;  %v4987_v57 = vpop.eup %4986 }
 0x13a   : > { %8220 = vst [vmem:[#allocation75_spill] sm:$0xff] %v6076_v0  ;;  %v2382_v37 = vrot.slane %v5937_v13, %v5617_v27  ;;  %v2407_v51 = vrot.slane %v5959_v52, %v5617_v27  ;;  %v8224_v0 = vrot.slane %v5740_v40, %v5617_v27  ;;  %v8230_v40 = vrot.slane %v5700_v38, %v5617_v27 }
 0x13b   : > { %8218 = vst [vmem:[#allocation74_spill] sm:$0xff] %v6065_v41  ;;  %v1713_v4 = vmul.f32 %v1709_v36, %v5738_v7  ;;  %v1714_v11 = vmul.f32 %v1710_v56, %v5757_v44  ;;  %v8221_v41 = vrot.slane %v5623_v32, %v5617_v27  ;;  %v6090_v7 = vmul.f32 %v5788_v22, %v1891_v6 }
 0x13c   : > { %v1711_v35 = vmul.f32 %v4987_v57, %v8224_v0  ;;  %v6101_v44 = vmul.f32 %v5797_v2, %v8225_v61  ;;  %v2141_v6 = vrot.slane %v5883_v24, %v5607_v18  ;;  %v6118_v0 = vmul.f32 %v5810_v9, %v8230_v40 }
 0x13d   : > { %v6087_v60 = vmul.f32 %v5788_v22, %v8221_v41  ;;  %8223 = vst [vmem:[#allocation77_spill] sm:$0xff] %v6090_v7  ;;  %v8227_v41 = vrot.slane %v5649_v48, %v5617_v27  ;;  %v1719_v50 = vcombine.low %v1713_v4, %v1714_v11  ;;  %v6112_v7 = vmul.f32 %v5797_v2, %v2020_v54 }
 0x13e   : > { %8226 = vst [vmem:[#allocation78_spill] sm:$0xff] %v6101_v44  ;;  %8231 = vst [vmem:[#allocation81_spill] sm:$0xff] %v6118_v0  ;;  %v6121_v61 = vmul.f32 %v5810_v9, %v2253_v31  ;;  %v6124_v57 = vmul.f32 %v5810_v9, %v2278_v8  ;;  %v6133_v54 = vmul.f32 %v5849_v3, %v2382_v37 }
 0x13f   : > { %8222 = vst [vmem:[#allocation76_spill] sm:$0xff] %v6087_v60  ;;  %v6107_v60 = vmul.f32 %v5797_v2, %v8227_v41  ;;  %8229 = vst [vmem:[#allocation80_spill] sm:$0xff] %v6112_v7  ;;  %v8234_v41 = vrot.slane %v5729_v5, %v5617_v27  ;;  %v1883_v4 = vrot.slane %v5869_v30, %v5607_v18  ;;  %v8325_v7 = vld [vmem:[#allocation64_spill] sm:$0xff] }
 0x140   : > { %8232 = vst [vmem:[#allocation82_spill] sm:$0xff] %v6121_v61  ;;  %8233 = vst [vmem:[#allocation83_spill] sm:$0xff] %v6124_v57  ;;  %v6138_v11 = vmul.f32 %v5849_v3, %v2407_v51  ;;  %v2012_v31 = vrot.slane %v5904_v58, %v5607_v18  ;;  %v8238_v8 = vrot.slane %v5679_v16, %v5607_v18 }
 0x141   : > { %8228 = vst [vmem:[#allocation79_spill] sm:$0xff] %v6107_v60  ;;  %v6130_v24 = vmul.f32 %v5849_v3, %v8234_v41  ;;  %8236 = vst [vmem:[#allocation85_spill] sm:$0xff] %v6133_v54  ;;  %v6149_v41 = vmul.f32 %v5805_v10, %v2116_v59  ;;  %v1726_v37 = vrot.slane %v1719_v50, %v5800_v15 }
 0x142   : > { %8237 = vst [vmem:[#allocation86_spill] sm:$0xff] %v6138_v11  ;;  %v6146_v40 = vmul.f32 %v5805_v10, %v8238_v8  ;;  %v1715_v57 = vmul.f32 %v1711_v35, %v5777_v62  ;;  %v6154_v30 = vmul.f32 %v5805_v10, %v2141_v6  ;;  %v2245_v51 = vrot.slane %v5919_v43, %v5607_v18 }
 0x143   : > { %8235 = vst [vmem:[#allocation84_spill] sm:$0xff] %v6130_v24  ;;  %8240 = vst [vmem:[#allocation88_spill] sm:$0xff] %v6149_v41  ;;  %v8242_v58 = vrot.slane %v5604_v17, %v5607_v18  ;;  %v8244_v59 = vrot.slane %v5609_v19, %v5607_v18  ;;  %v8246_v62 = vrot.slane %v5619_v28, %v5607_v18 }
 0x144   : > { %8239 = vst [vmem:[#allocation87_spill] sm:$0xff] %v6146_v40  ;;  %8241 = vst [vmem:[#allocation89_spill] sm:$0xff] %v6154_v30  ;;  %v2270_v43 = vrot.slane %v5935_v29, %v5607_v18  ;;  %v1733_v17 = vrot.slane %v1715_v57, %v5800_v15  ;;  %v8248_v6 = vrot.slane %v5623_v32, %v5607_v18 }
 0x145   : > { %v6162_v16 = vmul.f32 %v5788_v22, %v8242_v58  ;;  %v6168_v8 = vmul.f32 %v5788_v22, %v8244_v59  ;;  %v6174_v10 = vmul.f32 %v5788_v22, %v8246_v62  ;;  %v6186_v19 = vmul.f32 %v5788_v22, %v1883_v4 }
 0x146   : > { %v6183_v50 = vmul.f32 %v5788_v22, %v8248_v6  ;;  %v8251_v28 = vrot.slane %v5625_v34, %v5607_v18  ;;  %v8253_v29 = vrot.slane %v5636_v39, %v5607_v18  ;;  %v8255_v32 = vrot.slane %v5647_v46, %v5607_v18 }
 0x147   : > { %8243 = vst [vmem:[#allocation90_spill] sm:$0xff] %v6162_v16  ;;  %8245 = vst [vmem:[#allocation91_spill] sm:$0xff] %v6168_v8  ;;  %v8257_v22 = vrot.slane %v5649_v48, %v5607_v18  ;;  %v2374_v4 = vrot.slane %v5937_v13, %v5607_v18  ;;  %v1747_v39 = vrot.slane %v1709_v36, %v5607_v18  ;;  %v8321_v16 = vld [vmem:[#allocation57_spill] sm:$0xff] }
 0x148   : > { %8247 = vst [vmem:[#allocation92_spill] sm:$0xff] %v6174_v10  ;;  %8249 = vst [vmem:[#allocation93_spill] sm:$0xff] %v6183_v50  ;;  %v6192_v58 = vmul.f32 %v5797_v2, %v8251_v28  ;;  %v6198_v57 = vmul.f32 %v5797_v2, %v8253_v29  ;;  %v6204_v59 = vmul.f32 %v5797_v2, %v8255_v32  ;;  %v1712_v29 = vld [vmem:[#allocation16] sm:$0x7] }
 0x149   : > { %8250 = vst [vmem:[#allocation94_spill] sm:$0xff] %v6186_v19  ;;  %v6210_v34 = vmul.f32 %v5797_v2, %v8257_v22  ;;  %v1734_v62 = vcombine.low %v1726_v37, %v1733_v17  ;;  %v6216_v6 = vmul.f32 %v5797_v2, %v2012_v31  ;;  %v2399_v46 = vrot.slane %v5959_v52, %v5607_v18  ;;  %v8289_v19 = vld [vmem:[#allocation37_spill] sm:$0xff] }
 0x14a   : > { %8252 = vst [vmem:[#allocation95_spill] sm:$0xff] %v6192_v58  ;;  %8254 = vst [vmem:[#allocation96_spill] sm:$0xff] %v6198_v57  ;;  %v1751_v28 = vrot.slane %v1710_v56, %v5607_v18  ;;  %v8260_v48 = vrot.slane %v5688_v14, %v5607_v18  ;;  %v8262_v13 = vrot.slane %v5698_v45, %v5607_v18  ;;  %v8304_v57 = vld [vmem:[#allocation46_spill] sm:$0xff] }
 0x14b   : > { %8256 = vst [vmem:[#allocation97_spill] sm:$0xff] %v6204_v59  ;;  %8258 = vst [vmem:[#allocation98_spill] sm:$0xff] %v6210_v34  ;;  %v8264_v2 = vrot.slane %v5700_v38, %v5607_v18  ;;  %v1741_v56 = vrot.slane %v1734_v62, %v5800_v15  ;;  %v1755_v31 = vrot.slane %v1711_v35, %v5607_v18  ;;  %v8278_v15 = vld [vmem:[#allocation21_spill] sm:$0xff]  ;;  %v8303_v59 = vld [vmem:[#allocation47_spill] sm:$0xff] }
 0x14c   : > { %8259 = vst [vmem:[#allocation99_spill] sm:$0xff] %v6216_v6  ;;  %v6225_v32 = vmul.f32 %v5810_v9, %v8260_v48  ;;  %v6231_v36 = vmul.f32 %v5810_v9, %v8262_v13  ;;  %v6242_v14 = vmul.f32 %v5810_v9, %v2245_v51  ;;  %v6245_v37 = vmul.f32 %v5810_v9, %v2270_v43  ;;  %v8287_v6 = vld [vmem:[#allocation35_spill] sm:$0xff] }
 0x14d   : > { %v6237_v52 = vmul.f32 %v5810_v9, %v8264_v2  ;;  %v8268_v45 = vrot.slane %v5710_v49, %v5607_v18  ;;  %v8270_v38 = vrot.slane %v5719_v12, %v5607_v18  ;;  %v8272_v35 = vrot.slane %v5729_v5, %v5607_v18 }
 0x14e   : > { %8261 = vst [vmem:[#allocation100_spill] sm:$0xff] %v6225_v32  ;;  %8263 = vst [vmem:[#allocation101_spill] sm:$0xff] %v6231_v36  ;;  %v6266_v9 = vmul.f32 %v5849_v3, %v2374_v4  ;;  %v2421_v49 = vmul.f32 %v1747_v39, %v5202_v33  ;;  %v2572_v43 = vmul.f32 %v1747_v39, %v5227_v42 }
 0x14f   : > { %8265 = vst [vmem:[#allocation102_spill] sm:$0xff] %v6237_v52  ;;  %8266 = vst [vmem:[#allocation103_spill] sm:$0xff] %v6242_v14  ;;  %v6251_v17 = vmul.f32 %v5849_v3, %v8268_v45  ;;  %v6257_v22 = vmul.f32 %v5849_v3, %v8270_v38  ;;  %v6263_v51 = vmul.f32 %v5849_v3, %v8272_v35  ;;  %v8276_v35 = vld [vmem:[#allocation25_spill] sm:$0xff]  ;;  %v8297_v52 = vld [vmem:[#allocation40_spill] sm:$0xff] }
 0x150   : > { %8267 = vst [vmem:[#allocation104_spill] sm:$0xff] %v6245_v37  ;;  %8274 = vst [vmem:[#allocation108_spill] sm:$0xff] %v6266_v9  ;;  %v1743_v62 = vsub.f32 %v1712_v29, %v1741_v56  ;;  %v6271_v48 = vmul.f32 %v5849_v3, %v2399_v46  ;;  %v2729_v12 = vmul.f32 %v1747_v39, %v5296_v63 }
 0x151   : > { %8269 = vst [vmem:[#allocation105_spill] sm:$0xff] %v6251_v17  ;;  %8271 = vst [vmem:[#allocation106_spill] sm:$0xff] %v6257_v22  ;;  %v2919_v13 = vmul.f32 %v1747_v39, %v5301_v1  ;;  %v3170_v5 = vmul.f32 %v1747_v39, %v5447_v53  ;;  %v2422_v2 = vmul.f32 %v1751_v28, %v5161_v20  ;;  %v8295_v22 = vld [vmem:[#allocation39_spill] sm:$0xff] }
 0x152   : > { %8273 = vst [vmem:[#allocation107_spill] sm:$0xff] %v6263_v51  ;;  %8275 = vst [vmem:[#allocation109_spill] sm:$0xff] %v6271_v48  ;;  %v6278_v45 = vrot.slane %v1743_v62, %v5607_v18  ;;  %v6281_v4 = vrot.slane %v1743_v62, %v5614_v23  ;;  %v6284_v33 = vrot.slane %v1743_v62, %v5617_v27  ;;  %v8277_v62 = vld [vmem:[#allocation29_spill] sm:$0xff] }
 0x153   : > { %v2423_v42 = vmul.f32 %v1755_v31, %v5346_v25  ;;  %v2573_v3 = vmul.f32 %v1751_v28, %v5166_v21  ;;  %v2730_v63 = vmul.f32 %v1751_v28, %v5270_v55  ;;  %v2574_v1 = vmul.f32 %v1755_v31, %v5351_v26 }
 0x154   : > { %v2731_v53 = vmul.f32 %v1755_v31, %v5421_v47  ;;  %v2424_v20 = vadd.f32 %v2421_v49, %v6278_v45  ;;  %v2425_v46 = vadd.f32 %v2422_v2, %v6281_v4  ;;  %v2575_v56 = vadd.f32 %v2572_v43, %v6278_v45  ;;  %v8279_v2 = vld [vmem:[#allocation22_spill] sm:$0xff]  ;;  %v8281_v43 = vld [vmem:[#allocation28_spill] sm:$0xff] }
 0x155   : > { %v2426_v29 = vadd.f32 %v2423_v42, %v6284_v33  ;;  %v2576_v38 = vadd.f32 %v2573_v3, %v6281_v4  ;;  %v2577_v25 = vadd.f32 %v2574_v1, %v6284_v33  ;;  %v2732_v21 = vadd.f32 %v2729_v12, %v6278_v45  ;;  %v8280_v42 = vld [vmem:[#allocation24_spill] sm:$0xff] }
 0x156   : > { %v2733_v55 = vadd.f32 %v2730_v63, %v6281_v4  ;;  %v3421_v26 = vmul.f32 %v1747_v39, %v8276_v35  ;;  %v3630_v47 = vmul.f32 %v1747_v39, %v8277_v62  ;;  %v2920_v49 = vmul.f32 %v1751_v28, %v8278_v15  ;;  %v8282_v63 = vld [vmem:[#allocation23_spill] sm:$0xff]  ;;  %v8283_v35 = vld [vmem:[#allocation26_spill] sm:$0xff] }
 0x157   : > { %v2429_v23 = vmax.f32 %v2426_v29, 0.0  ;;  %v3171_v18 = vmul.f32 %v1751_v28, %v8279_v2  ;;  %v3422_v27 = vmul.f32 %v1751_v28, %v8280_v42  ;;  %v3631_v48 = vmul.f32 %v1751_v28, %v8281_v43  ;;  %v8285_v29 = vld [vmem:[#allocation27_spill] sm:$0xff]  ;;  %v8286_v2 = vld [vmem:[#allocation30_spill] sm:$0xff] }
 0x158   : > { %v2734_v3 = vadd.f32 %v2731_v53, %v6284_v33  ;;  %v2921_v37 = vmul.f32 %v1755_v31, %v8282_v63  ;;  %v3172_v30 = vmul.f32 %v1755_v31, %v8283_v35  ;;  %v6312_v39 = vmax.f32 %v2424_v20, 0.0  ;;  %v8288_v53 = vld [vmem:[#allocation36_spill] sm:$0xff]  ;;  %v8290_v63 = vld [vmem:[#allocation38_spill] sm:$0xff] }
 0x159   : > { %v6306_v1 = vrot.slane %v2429_v23, 6  ;;  %v6308_v12 = vrot.slane %v2429_v23, 7  ;;  %v6314_v15 = vmax.f32 %v2425_v46, 0.0  ;;  %v3423_v62 = vmul.f32 %v1755_v31, %v8285_v29 }
 0x15a   : > { %8284 = vst [vmem:[#allocation25_spill] sm:$0xff] %v6312_v39  ;;  %v3632_v42 = vmul.f32 %v1755_v31, %v8286_v2  ;;  %v6326_v20 = vrot.slane %v2429_v23, 1  ;;  %v6328_v46 = vmax.f32 %v2575_v56, 0.0  ;;  %v6330_v14 = vmax.f32 %v2576_v38, 0.0  ;;  %v8293_v2 = vld [vmem:[#allocation41_spill] sm:$0xff] }
 0x15b   : > { %v2438_v28 = vmul.f32 %v6306_v1, %v8287_v6  ;;  %v2444_v43 = vmul.f32 %v6306_v1, %v8288_v53  ;;  %v2459_v9 = vmul.f32 %v6308_v12, %v8289_v19  ;;  %v2468_v35 = vmul.f32 %v6308_v12, %v8290_v63  ;;  %v8328_v63 = vld [vmem:[#allocation65_spill] sm:$0xff] }
 0x15c   : > { %8291 = vst [vmem:[#allocation29_spill] sm:$0xff] %v6328_v46  ;;  %8292 = vst [vmem:[#allocation21_spill] sm:$0xff] %v6330_v14  ;;  %v6332_v29 = vmax.f32 %v2577_v25, 0.0  ;;  %v2486_v41 = vmul.f32 %v2429_v23, %v8293_v2  ;;  %v6335_v34 = vrot.slane %v2429_v23, 2  ;;  %v6337_v50 = vmax.f32 %v2732_v21, 0.0  ;;  %v8298_v46 = vld [vmem:[#allocation43_spill] sm:$0xff] }
 0x15d   : > { %v2462_v31 = vadd.f32 %v2459_v9, %v2438_v28  ;;  %v2471_v51 = vadd.f32 %v2468_v35, %v2444_v43  ;;  %v6341_v17 = vmul.f32 %v6312_v39, %v8295_v22  ;;  %v2485_v56 = vmul.f32 %v6314_v15, %v8297_v52  ;;  %v8299_v25 = vld [vmem:[#allocation45_spill] sm:$0xff]  ;;  %v8300_v22 = vld [vmem:[#allocation42_spill] sm:$0xff] }
 0x15e   : > { %8294 = vst [vmem:[#allocation22_spill] sm:$0xff] %v6337_v50  ;;  %v2495_v38 = vmul.f32 %v2429_v23, %v8298_v46  ;;  %v2516_v9 = vmul.f32 %v6326_v20, %v8299_v25  ;;  %v2922_v28 = vadd.f32 %v2919_v13, %v6278_v45  ;;  %v2923_v32 = vadd.f32 %v2920_v49, %v6281_v4 }
 0x15f   : > { %8296 = vst [vmem:[#allocation24_spill] sm:$0xff] %v6341_v17  ;;  %v2489_v36 = vadd.f32 %v2486_v41, %v2462_v31  ;;  %v2924_v21 = vadd.f32 %v2921_v37, %v6284_v33  ;;  %v3173_v43 = vadd.f32 %v3170_v5, %v6278_v45  ;;  %v3174_v35 = vadd.f32 %v3171_v18, %v6281_v4  ;;  %v8302_v41 = vld [vmem:[#allocation44_spill] sm:$0xff] }
 0x160   : > { %v3175_v50 = vadd.f32 %v3172_v30, %v6284_v33  ;;  %v6356_v17 = vmul.f32 %v6312_v39, %v8300_v22  ;;  %v6359_v31 = vmul.f32 %v2429_v23, %v8302_v41  ;;  %v2546_v13 = vmul.f32 %v6335_v34, %v8303_v59 }
 0x161   : > { %v2519_v40 = vadd.f32 %v2516_v9, %v2489_v36  ;;  %v2498_v49 = vadd.f32 %v2495_v38, %v2471_v51  ;;  %v2525_v37 = vmul.f32 %v6326_v20, %v8304_v57  ;;  %v6367_v18 = vmul.f32 %v6332_v29, %v8293_v2  ;;  %v8323_v57 = vld [vmem:[#allocation58_spill] sm:$0xff] }
 0x162   : > { %8301 = vst [vmem:[#allocation28_spill] sm:$0xff] %v6356_v17  ;;  %v6371_v30 = vmul.f32 %v6332_v29, %v8298_v46  ;;  %v3424_v23 = vadd.f32 %v3421_v26, %v6278_v45  ;;  %v6377_v36 = vadd.f32 %v3422_v27, %v6281_v4  ;;  %v6380_v51 = vadd.f32 %v3423_v62, %v6284_v33  ;;  %v8316_v17 = vld [vmem:[#allocation52_spill] sm:$0xff] }
 0x163   : > { %v6373_v5 = vadd.f32 %v2546_v13, %v2519_v40  ;;  %v6383_v38 = vadd.f32 %v3630_v47, %v6278_v45  ;;  %v6386_v9 = vadd.f32 %v3631_v48, %v6281_v4  ;;  %v6389_v22 = vadd.f32 %v3632_v42, %v6284_v33  ;;  %v8309_v13 = vld [vmem:[#allocation48_spill] sm:$0xff]  ;;  %v8313_v4 = vld [vmem:[#allocation49_spill] sm:$0xff]  ;;  %v8314_v42 = vld [vmem:[#allocation50_spill] sm:$0xff] }
 0x164   : > { %8305 = vst [vmem:[#allocation23_spill] sm:$0xff] %v6371_v30  ;;  %v2431_v40 = vrot.slane %v6314_v15, 6  ;;  %v6394_v26 = vmul.f32 %v6335_v34, %v8309_v13  ;;  %v6396_v27 = vmax.f32 %v2733_v55, 0.0  ;;  %v6398_v30 = vmax.f32 %v2734_v3, 0.0  ;;  %v8317_v55 = vld [vmem:[#allocation53_spill] sm:$0xff] }
 0x165   : > { %8306 = vst [vmem:[#allocation26_spill] sm:$0xff] %v6373_v5  ;;  %8307 = vst [vmem:[#allocation27_spill] sm:$0xff] %v6383_v38  ;;  %v2452_v62 = vrot.slane %v6314_v15, 7  ;;  %v6401_v45 = vadd.f32 %v2525_v37, %v2498_v49  ;;  %v6403_v47 = vmax.f32 %v2922_v28, 0.0  ;;  %v6405_v48 = vmax.f32 %v2923_v32, 0.0  ;;  %v8320_v49 = vld [vmem:[#allocation54_spill] sm:$0xff] }
 0x166   : > { %8308 = vst [vmem:[#allocation30_spill] sm:$0xff] %v6389_v22  ;;  %8310 = vst [vmem:[#allocation110_spill] sm:$0xff] %v6398_v30  ;;  %v2437_v33 = vmul.f32 %v2431_v40, %v8313_v4  ;;  %v2443_v38 = vmul.f32 %v2431_v40, %v8314_v42  ;;  %v8315_v22 = vld [vmem:[#allocation51_spill] sm:$0xff]  ;;  %v6412_v3 = vmax.f32 %v2924_v21, 0.0  ;;  %v6414_v8 = vmax.f32 %v3173_v43, 0.0 }
 0x167   : > { %8311 = vst [vmem:[#allocation111_spill] sm:$0xff] %v6403_v47  ;;  %8312 = vst [vmem:[#allocation112_spill] sm:$0xff] %v6405_v48  ;;  %v2449_v5 = vmul.f32 %v2431_v40, %v8315_v22  ;;  %v2458_v58 = vmul.f32 %v2452_v62, %v8316_v17  ;;  %v2467_v10 = vmul.f32 %v2452_v62, %v8317_v55  ;;  %v2509_v28 = vrot.slane %v6314_v15, 1 }
 0x168   : > { %8318 = vst [vmem:[#allocation113_spill] sm:$0xff] %v6412_v3  ;;  %8319 = vst [vmem:[#allocation114_spill] sm:$0xff] %v6414_v8  ;;  %v2476_v37 = vmul.f32 %v2452_v62, %v8320_v49  ;;  %v2494_v39 = vmul.f32 %v6314_v15, %v8321_v16  ;;  %v2539_v11 = vrot.slane %v6314_v15, 2  ;;  %v6421_v40 = vmax.f32 %v3174_v35, 0.0  ;;  %v8324_v62 = vld [vmem:[#allocation63_spill] sm:$0xff] }
 0x169   : > { %v2461_v32 = vadd.f32 %v2458_v58, %v2437_v33  ;;  %v2470_v47 = vadd.f32 %v2467_v10, %v2443_v38  ;;  %v2503_v21 = vmul.f32 %v6314_v15, %v8323_v57  ;;  %v2582_v43 = vrot.slane %v6330_v14, 6  ;;  %v8330_v15 = vld [vmem:[#allocation67_spill] sm:$0xff] }
 0x16a   : > { %8322 = vst [vmem:[#allocation115_spill] sm:$0xff] %v6421_v40  ;;  %v2479_v13 = vadd.f32 %v2476_v37, %v2449_v5  ;;  %v2515_v46 = vmul.f32 %v2509_v28, %v8324_v62  ;;  %v2524_v58 = vmul.f32 %v2509_v28, %v8325_v7  ;;  %v6428_v10 = vmax.f32 %v3175_v50, 0.0  ;;  %v8329_v37 = vld [vmem:[#allocation66_spill] sm:$0xff] }
 0x16b   : > { %v2488_v8 = vadd.f32 %v2485_v56, %v2461_v32  ;;  %v2497_v3 = vadd.f32 %v2494_v39, %v2470_v47  ;;  %v6430_v38 = vmax.f32 %v3424_v23, 0.0  ;;  %v2533_v35 = vmul.f32 %v2509_v28, %v8328_v63  ;;  %v8331_v56 = vld [vmem:[#allocation68_spill] sm:$0xff] }
 0x16c   : > { %8326 = vst [vmem:[#allocation116_spill] sm:$0xff] %v6428_v10  ;;  %v2506_v33 = vadd.f32 %v2503_v21, %v2479_v13  ;;  %v2545_v53 = vmul.f32 %v2539_v11, %v8329_v37  ;;  %v2554_v54 = vmul.f32 %v2539_v11, %v8330_v15  ;;  %v2563_v39 = vmul.f32 %v2539_v11, %v8331_v56 }
 0x16d   : > { %8327 = vst [vmem:[#allocation117_spill] sm:$0xff] %v6430_v38  ;;  %v2518_v40 = vadd.f32 %v2515_v46, %v2488_v8  ;;  %v2527_v5 = vadd.f32 %v2524_v58, %v2497_v3  ;;  %v2585_v47 = vmul.f32 %v2582_v43, %v8313_v4  ;;  %v6438_v32 = vrot.slane %v6330_v14, 7  ;;  %v8332_v46 = vld [vmem:[#allocation55_spill] sm:$0xff] }
 0x16e   : > { %v2536_v59 = vadd.f32 %v2533_v35, %v2506_v33  ;;  %v2588_v13 = vmul.f32 %v2582_v43, %v8314_v42  ;;  %v2594_v28 = vmul.f32 %v2582_v43, %v8315_v22  ;;  %v2603_v3 = vmul.f32 %v2582_v43, %v8332_v46  ;;  %v8334_v38 = vld [vmem:[#allocation59_spill] sm:$0xff] }
 0x16f   : > { %v2548_v50 = vadd.f32 %v2545_v53, %v2518_v40  ;;  %v2557_v23 = vadd.f32 %v2554_v54, %v2527_v5  ;;  %v2612_v21 = vmul.f32 %v6438_v32, %v8316_v17  ;;  %v6446_v58 = vrot.slane %v6330_v14, 1 }
 0x170   : > { %v2566_v8 = vadd.f32 %v2563_v39, %v2536_v59  ;;  %v2624_v53 = vmul.f32 %v6438_v32, %v8320_v49  ;;  %v2639_v54 = vmul.f32 %v6330_v14, %v8297_v52  ;;  %v8333_v59 = vld [vmem:[#allocation60_spill] sm:$0xff]  ;;  %v2651_v5 = vmul.f32 %v6330_v14, %v8323_v57 }
 0x171   : > { %v6448_v11 = vadd.f32 %v2588_v13, %v2548_v50  ;;  %v2597_v33 = vadd.f32 %v2594_v28, %v2557_v23  ;;  %v2615_v35 = vadd.f32 %v2612_v21, %v2585_v47  ;;  %v2633_v43 = vmul.f32 %v6438_v32, %v8333_v59 }
 0x172   : > { %v2606_v40 = vadd.f32 %v2603_v3, %v2566_v8  ;;  %v2660_v50 = vmul.f32 %v6330_v14, %v8334_v38  ;;  %v6461_v23 = vrot.slane %v6330_v14, 2  ;;  %v6464_v13 = vrot.slane %v6396_v27, 6  ;;  %v8343_v14 = vld [vmem:[#allocation62_spill] sm:$0xff] }
 0x173   : > { %v2627_v39 = vadd.f32 %v2624_v53, %v2597_v33  ;;  %v2642_v10 = vadd.f32 %v2639_v54, %v2615_v35  ;;  %v2669_v47 = vmul.f32 %v6446_v58, %v8324_v62  ;;  %v6469_v8 = vrot.slane %v6396_v27, 7  ;;  %v8337_v53 = vld [vmem:[#allocation69_spill] sm:$0xff] }
 0x174   : > { %8335 = vst [vmem:[#allocation118_spill] sm:$0xff] %v6464_v13  ;;  %v2636_v28 = vadd.f32 %v2633_v43, %v2606_v40  ;;  %v6472_v3 = vmax.f32 %v6377_v36, 0.0  ;;  %v2681_v33 = vmul.f32 %v6446_v58, %v8328_v63  ;;  %v2690_v57 = vmul.f32 %v6446_v58, %v8337_v53 }
 0x175   : > { %v2654_v21 = vadd.f32 %v2651_v5, %v2627_v39  ;;  %v2672_v22 = vadd.f32 %v2669_v47, %v2642_v10  ;;  %v2699_v54 = vmul.f32 %v6461_v23, %v8329_v37  ;;  %v2742_v40 = vmul.f32 %v6464_v13, %v8313_v4  ;;  %v8339_v5 = vld [vmem:[#allocation71_spill] sm:$0xff] }
 0x176   : > { %8336 = vst [vmem:[#allocation119_spill] sm:$0xff] %v6472_v3  ;;  %v2663_v49 = vadd.f32 %v2660_v50, %v2636_v28  ;;  %v6483_v35 = vmax.f32 %v6380_v51, 0.0  ;;  %v2711_v43 = vmul.f32 %v6461_v23, %v8331_v56  ;;  %v2720_v39 = vmul.f32 %v6461_v23, %v8339_v5 }
 0x177   : > { %v2684_v36 = vadd.f32 %v2681_v33, %v2654_v21  ;;  %v2702_v50 = vadd.f32 %v2699_v54, %v2672_v22  ;;  %v2745_v10 = vmul.f32 %v6464_v13, %v8314_v42  ;;  %v2775_v28 = vmul.f32 %v6469_v8, %v8316_v17  ;;  %v8340_v21 = vld [vmem:[#allocation56_spill] sm:$0xff] }
 0x178   : > { %8338 = vst [vmem:[#allocation120_spill] sm:$0xff] %v6483_v35  ;;  %v2693_v3 = vadd.f32 %v2690_v57, %v2663_v49  ;;  %v2757_v51 = vmul.f32 %v6464_v13, %v8332_v46  ;;  %v2766_v33 = vmul.f32 %v6464_v13, %v8340_v21  ;;  %v2808_v35 = vmul.f32 %v6396_v27, %v8297_v52 }
 0x179   : > { %v2714_v47 = vadd.f32 %v2711_v43, %v2684_v36  ;;  %v2748_v57 = vadd.f32 %v2745_v10, %v2702_v50  ;;  %v2778_v49 = vadd.f32 %v2775_v28, %v2742_v40  ;;  %v2781_v22 = vmul.f32 %v6469_v8, %v8317_v55 }
 0x17a   : > { %v2723_v56 = vadd.f32 %v2720_v39, %v2693_v3  ;;  %v2793_v63 = vmul.f32 %v6469_v8, %v8333_v59  ;;  %v6504_v36 = vrot.slane %v6396_v27, 1  ;;  %v6507_v43 = vrot.slane %v6396_v27, 2 }
 0x17b   : > { %v2760_v54 = vadd.f32 %v2757_v51, %v2714_v47  ;;  %v2784_v13 = vadd.f32 %v2781_v22, %v2748_v57  ;;  %v2802_v3 = vmul.f32 %v6469_v8, %v8343_v14  ;;  %v2811_v40 = vadd.f32 %v2808_v35, %v2778_v49 }
 0x17c   : > { %8341 = vst [vmem:[#allocation121_spill] sm:$0xff] %v6504_v36  ;;  %8342 = vst [vmem:[#allocation122_spill] sm:$0xff] %v6507_v43  ;;  %v2769_v46 = vadd.f32 %v2766_v33, %v2723_v56  ;;  %v6513_v39 = vmax.f32 %v6386_v9, 0.0  ;;  %v2826_v10 = vmul.f32 %v6396_v27, %v8334_v38  ;;  %v2844_v28 = vmul.f32 %v6504_v36, %v8324_v62  ;;  %v8345_v56 = vld [vmem:[#allocation61_spill] sm:$0xff] }
 0x17d   : > { %v2796_v50 = vadd.f32 %v2793_v63, %v2760_v54  ;;  %v2814_v51 = vmul.f32 %v6396_v27, %v8321_v16  ;;  %v2835_v33 = vmul.f32 %v6396_v27, %v8345_v56  ;;  %v6524_v57 = vrot.slane %v6405_v48, 6 }
 0x17e   : > { %8344 = vst [vmem:[#allocation123_spill] sm:$0xff] %v6513_v39  ;;  %v2805_v47 = vadd.f32 %v2802_v3, %v2769_v46  ;;  %v2847_v35 = vadd.f32 %v2844_v28, %v2811_v40  ;;  %v2862_v63 = vmul.f32 %v6504_v36, %v8337_v53  ;;  %v2880_v49 = vmul.f32 %v6507_v43, %v8329_v37  ;;  %v8346_v3 = vld [vmem:[#allocation70_spill] sm:$0xff]  ;;  %v8347_v40 = vld [vmem:[#allocation72_spill] sm:$0xff] }
 0x17f   : > { %v2829_v9 = vadd.f32 %v2826_v10, %v2796_v50  ;;  %v2817_v22 = vadd.f32 %v2814_v51, %v2784_v13  ;;  %v2850_v54 = vmul.f32 %v6504_v36, %v8325_v7  ;;  %v2871_v39 = vmul.f32 %v6504_v36, %v8346_v3 }
 0x180   : > { %v2838_v46 = vadd.f32 %v2835_v33, %v2805_v47  ;;  %v2883_v59 = vadd.f32 %v2880_v49, %v2847_v35  ;;  %v2898_v50 = vmul.f32 %v6507_v43, %v8339_v5  ;;  %v2907_v10 = vmul.f32 %v6507_v43, %v8347_v40  ;;  %v8349_v5 = vld [vmem:[#allocation75_spill] sm:$0xff] }
 0x181   : > { %v2865_v38 = vadd.f32 %v2862_v63, %v2829_v9  ;;  %v2935_v53 = vmul.f32 %v6524_v57, %v8313_v4  ;;  %v2941_v13 = vmul.f32 %v6524_v57, %v8314_v42  ;;  %v6543_v47 = vrot.slane %v6405_v48, 7 }
 0x182   : > { %v2874_v28 = vadd.f32 %v2871_v39, %v2838_v46  ;;  %v6547_v51 = vmul.f32 %v6438_v32, %v8317_v55  ;;  %v2886_v33 = vmul.f32 %v6507_v43, %v8330_v15  ;;  %v2968_v39 = vmul.f32 %v6524_v57, %v8340_v21 }
 0x183   : > { %v2901_v9 = vadd.f32 %v2898_v50, %v2865_v38  ;;  %v2853_v35 = vadd.f32 %v2850_v54, %v2817_v22  ;;  %v2944_v49 = vadd.f32 %v2941_v13, %v2883_v59  ;;  %v2980_v46 = vmul.f32 %v6543_v47, %v8316_v17 }
 0x184   : > { %v2910_v63 = vadd.f32 %v2907_v10, %v2874_v28  ;;  %v3016_v42 = vmul.f32 %v6543_v47, %v8343_v14  ;;  %v6558_v32 = vrot.slane %v6405_v48, 1  ;;  %v2450_v43 = vmul.f32 %v6306_v1, %v8349_v5 }
 0x185   : > { %v2971_v4 = vadd.f32 %v2968_v39, %v2901_v9  ;;  %v2983_v38 = vadd.f32 %v2980_v46, %v2935_v53  ;;  %v2989_v59 = vmul.f32 %v6543_v47, %v8317_v55  ;;  %v6568_v22 = vrot.slane %v6405_v48, 2 }
 0x186   : > { %8348 = vst [vmem:[#allocation124_spill] sm:$0xff] %v6558_v32  ;;  %2913 = vst [vmem:[%s6562_s14 + $0x8] sm:$0xff] %v2910_v63  ;;  %v2477_v54 = vmul.f32 %v6308_v12, %v6101_v44  ;;  %v6574_v50 = vmul.f32 %v6446_v58, %v8325_v7  ;;  %v6578_v1 = vmul.f32 %v6461_v23, %v8330_v15 }
 0x187   : > { %8350 = vst [vmem:[#allocation125_spill] sm:$0xff] %v6568_v22  ;;  %v3019_v10 = vadd.f32 %v3016_v42, %v2971_v4  ;;  %v3061_v53 = vmul.f32 %v6405_v48, %v8345_v56  ;;  %v6582_v28 = vadd.f32 %v2886_v33, %v2853_v35  ;;  %v2992_v13 = vadd.f32 %v2989_v59, %v2944_v49 }
 0x188   : > { %v3025_v9 = vmul.f32 %v6405_v48, %v8297_v52  ;;  %v3034_v12 = vmul.f32 %v6405_v48, %v8321_v16  ;;  %v3109_v58 = vmul.f32 %v6558_v32, %v8346_v3  ;;  %v2480_v46 = vadd.f32 %v2477_v54, %v2450_v43  ;;  %v8361_v3 = vld [vmem:[#allocation43_spill] sm:$0xff] }
 0x189   : > { %v3064_v39 = vadd.f32 %v3061_v53, %v3019_v10  ;;  %v2534_v4 = vmul.f32 %v6326_v20, %v6118_v0  ;;  %v3073_v23 = vmul.f32 %v6558_v32, %v8324_v62  ;;  %v3157_v33 = vmul.f32 %v6568_v22, %v8347_v40 }
 0x18a   : > { %v3028_v42 = vadd.f32 %v3025_v9, %v2983_v38  ;;  %v6597_v35 = vrot.slane %v6332_v29, 6  ;;  %v2507_v59 = vadd.f32 %v6359_v31, %v2480_v46  ;;  %v2558_v43 = vadd.f32 %v6394_v26, %v6401_v45 }
 0x18b   : > { %v3112_v49 = vadd.f32 %v3109_v58, %v3064_v39  ;;  %v6603_v54 = vrot.slane %v6332_v29, 7  ;;  %v6605_v20 = vadd.f32 %v3034_v12, %v2992_v13  ;;  %v6609_v38 = vmul.f32 %v6558_v32, %v8325_v7  ;;  %v8351_v39 = vld [vmem:[#allocation76_spill] sm:$0xff] }
 0x18c   : > { %v6613_v10 = vmul.f32 %v6568_v22, %v8329_v37  ;;  %v2586_v53 = vmul.f32 %v6597_v35, %v8287_v6  ;;  %v2537_v9 = vadd.f32 %v2534_v4, %v2507_v59  ;;  %v2564_v26 = vmul.f32 %v6335_v34, %v6130_v24  ;;  %v8357_v7 = vld [vmem:[#allocation36_spill] sm:$0xff] }
 0x18d   : > { %v3160_v31 = vadd.f32 %v3157_v33, %v3112_v49  ;;  %v2595_v45 = vmul.f32 %v6597_v35, %v8349_v5  ;;  %v6621_v13 = vadd.f32 %v3073_v23, %v3028_v42  ;;  %v6625_v12 = vmul.f32 %v6568_v22, %v8330_v15 }
 0x18e   : > { %v2604_v58 = vmul.f32 %v6597_v35, %v8351_v39  ;;  %v2613_v46 = vmul.f32 %v6603_v54, %v8289_v19  ;;  %v2567_v33 = vadd.f32 %v2564_v26, %v2537_v9  ;;  %v2625_v34 = vmul.f32 %v6603_v54, %v6101_v44 }
 0x18f   : > { %4629 = vst [vmem:[%s6562_s14 + $0x20] sm:$0xff] %v3160_v31  ;;  %v4909_v4 = vpack.c.bf16 %v3160_v31, %v2910_v63  ;;  %v2598_v49 = vadd.f32 %v2595_v45, %v2558_v43  ;;  %v2652_v42 = vmul.f32 %v6332_v29, %v8302_v41  ;;  %v6637_v23 = vrot.slane %v6332_v29, 1  ;;  %v8353_v31 = vld [vmem:[#allocation73_spill] sm:$0xff] }
 0x190   : > { %v2616_v59 = vadd.f32 %v2613_v46, %v2586_v53  ;;  %v6640_v37 = vrot.slane %v6332_v29, 2  ;;  %v2607_v62 = vadd.f32 %v2604_v58, %v2567_v33  ;;  %v2634_v63 = vmul.f32 %v6603_v54, %v6107_v60 }
 0x191   : > { %4910 = vmatprep.subr.bf16.mxu0 %v4909_v4  ;;  %v2628_v52 = vadd.f32 %v2625_v34, %v2598_v49  ;;  %v6645_v43 = vrot.slane %v6398_v30, 6  ;;  %v2661_v9 = vmul.f32 %v6332_v29, %v8353_v31  ;;  %v2670_v26 = vmul.f32 %v6637_v23, %v8299_v25  ;;  %v8355_v34 = vld [vmem:[#allocation47_spill] sm:$0xff] }
 0x192   : > { %v2643_v53 = vadd.f32 %v6367_v18, %v2616_v59  ;;  %v6653_v45 = vrot.slane %v6398_v30, 7  ;;  %v2637_v46 = vadd.f32 %v2634_v63, %v2607_v62  ;;  %v2682_v4 = vmul.f32 %v6637_v23, %v6118_v0  ;;  %v8356_v62 = vld [vmem:[#allocation85_spill] sm:$0xff] }
 0x193   : > { %8352 = vst [vmem:[#allocation126_spill] sm:$0xff] %v6645_v43  ;;  %v2655_v58 = vadd.f32 %v2652_v42, %v2628_v52  ;;  %v2809_v33 = vmul.f32 %v6398_v30, %v8293_v2  ;;  %v2691_v18 = vmul.f32 %v6637_v23, %v6121_v61  ;;  %v2700_v29 = vmul.f32 %v6640_v37, %v8355_v34 }
 0x194   : > { %8354 = vst [vmem:[#allocation127_spill] sm:$0xff] %v6653_v45  ;;  %v2673_v49 = vadd.f32 %v2670_v26, %v2643_v53  ;;  %v2712_v59 = vmul.f32 %v6640_v37, %v6130_v24  ;;  %v2664_v17 = vadd.f32 %v2661_v9, %v2637_v46  ;;  %v2721_v52 = vmul.f32 %v6640_v37, %v8356_v62  ;;  %v8358_v9 = vld [vmem:[#allocation77_spill] sm:$0xff] }
 0x195   : > { %v2685_v15 = vadd.f32 %v2682_v4, %v2655_v58  ;;  %v2743_v42 = vmul.f32 %v6645_v43, %v8287_v6  ;;  %v2746_v53 = vmul.f32 %v6645_v43, %v8357_v7  ;;  %v2758_v26 = vmul.f32 %v6645_v43, %v8351_v39  ;;  %v8359_v58 = vld [vmem:[#allocation38_spill] sm:$0xff] }
 0x196   : > { %v2703_v63 = vadd.f32 %v2700_v29, %v2673_v49  ;;  %v2776_v55 = vmul.f32 %v6653_v45, %v8289_v19  ;;  %v2694_v0 = vadd.f32 %v2691_v18, %v2664_v17  ;;  %v2767_v46 = vmul.f32 %v6645_v43, %v8358_v9  ;;  %v8360_v29 = vld [vmem:[#allocation80_spill] sm:$0xff] }
 0x197   : > { %v2715_v24 = vadd.f32 %v2712_v59, %v2685_v15  ;;  %v2782_v4 = vmul.f32 %v6653_v45, %v8359_v58  ;;  %v2794_v49 = vmul.f32 %v6653_v45, %v6107_v60  ;;  %v2803_v5 = vmul.f32 %v6653_v45, %v8360_v29 }
 0x198   : > { %v2749_v41 = vadd.f32 %v2746_v53, %v2703_v63  ;;  %v2779_v44 = vadd.f32 %v2776_v55, %v2743_v42  ;;  %v2724_v39 = vadd.f32 %v2721_v52, %v2694_v0  ;;  %v2815_v17 = vmul.f32 %v6398_v30, %v8361_v3  ;;  %v8364_v53 = vld [vmem:[#allocation74_spill] sm:$0xff] }
 0x199   : > { %v2761_v40 = vadd.f32 %v2758_v26, %v2715_v24  ;;  %v2827_v15 = vmul.f32 %v6398_v30, %v8353_v31  ;;  %v6688_v43 = vrot.slane %v6398_v30, 1  ;;  %v6691_v55 = vrot.slane %v6398_v30, 2  ;;  %v8365_v24 = vld [vmem:[#allocation113_spill] sm:$0xff] }
 0x19a   : > { %v2785_v18 = vadd.f32 %v2782_v4, %v2749_v41  ;;  %v2812_v59 = vadd.f32 %v2809_v33, %v2779_v44  ;;  %v2770_v42 = vadd.f32 %v2767_v46, %v2724_v39  ;;  %v2836_v0 = vmul.f32 %v6398_v30, %v8364_v53  ;;  %v8367_v41 = vld [vmem:[#allocation46_spill] sm:$0xff]  ;;  %v8369_v39 = vld [vmem:[#allocation83_spill] sm:$0xff] }
 0x19b   : > { %8362 = vst [vmem:[#allocation128_spill] sm:$0xff] %v6688_v43  ;;  %8363 = vst [vmem:[#allocation129_spill] sm:$0xff] %v6691_v55  ;;  %v2797_v63 = vadd.f32 %v2794_v49, %v2761_v40  ;;  %v6696_v52 = vrot.slane %v8365_v24, 6  ;;  %v2845_v31 = vmul.f32 %v6688_v43, %v8299_v25  ;;  %v2851_v44 = vmul.f32 %v6688_v43, %v8367_v41 }
 0x19c   : > { %v2818_v26 = vadd.f32 %v2815_v17, %v2785_v18  ;;  %v6703_v33 = vrot.slane %v8365_v24, 7  ;;  %v2806_v4 = vadd.f32 %v2803_v5, %v2770_v42  ;;  %v2863_v40 = vmul.f32 %v6688_v43, %v6121_v61  ;;  %v8370_v18 = vld [vmem:[#allocation48_spill] sm:$0xff]  ;;  %v8372_v61 = vld [vmem:[#allocation86_spill] sm:$0xff] }
 0x19d   : > { %8366 = vst [vmem:[#allocation130_spill] sm:$0xff] %v6696_v52  ;;  %v2830_v60 = vadd.f32 %v2827_v15, %v2797_v63  ;;  %v2872_v46 = vmul.f32 %v6688_v43, %v8369_v39  ;;  %v2848_v49 = vadd.f32 %v2845_v31, %v2812_v59  ;;  %v2881_v17 = vmul.f32 %v6691_v55, %v8355_v34  ;;  %v8390_v43 = vld [vmem:[#allocation105_spill] sm:$0xff] }
 0x19e   : > { %8368 = vst [vmem:[#allocation131_spill] sm:$0xff] %v6703_v33  ;;  %v2854_v30 = vadd.f32 %v2851_v44, %v2818_v26  ;;  %v2887_v45 = vmul.f32 %v6691_v55, %v8370_v18  ;;  %v2839_v14 = vadd.f32 %v2836_v0, %v2806_v4  ;;  %v2899_v5 = vmul.f32 %v6691_v55, %v8356_v62 }
 0x19f   : > { %v2866_v21 = vadd.f32 %v2863_v40, %v2830_v60  ;;  %v2936_v15 = vmul.f32 %v6696_v52, %v8287_v6  ;;  %v2884_v42 = vadd.f32 %v2881_v17, %v2848_v49  ;;  %v2908_v31 = vmul.f32 %v6691_v55, %v8372_v61  ;;  %v8383_v55 = vld [vmem:[#allocation97_spill] sm:$0xff] }
 0x1a0   : > { %v6717_v63 = vadd.f32 %v2887_v45, %v2854_v30  ;;  %v2942_v59 = vmul.f32 %v6696_v52, %v8357_v7  ;;  %v2875_v26 = vadd.f32 %v2872_v46, %v2839_v14  ;;  %v2969_v60 = vmul.f32 %v6696_v52, %v8358_v9  ;;  %v8380_v9 = vld [vmem:[#allocation96_spill] sm:$0xff] }
 0x1a1   : > { %v2902_v44 = vadd.f32 %v2899_v5, %v2866_v21  ;;  %v2981_v0 = vmul.f32 %v6703_v33, %v8289_v19  ;;  %v2990_v30 = vmul.f32 %v6703_v33, %v8359_v58  ;;  %v3017_v45 = vmul.f32 %v6703_v33, %v8360_v29 }
 0x1a2   : > { %8371 = vst [vmem:[#allocation132_spill] sm:$0xff] %v6717_v63  ;;  %v2945_v4 = vadd.f32 %v2942_v59, %v2884_v42  ;;  %v3026_v40 = vmul.f32 %v8365_v24, %v8293_v2  ;;  %v2911_v49 = vadd.f32 %v2908_v31, %v2875_v26  ;;  %v3035_v21 = vmul.f32 %v8365_v24, %v8361_v3  ;;  %v8375_v59 = vld [vmem:[#allocation25_spill] sm:$0xff] }
 0x1a3   : > { %v2972_v14 = vadd.f32 %v2969_v60, %v2902_v44  ;;  %v2984_v46 = vadd.f32 %v2981_v0, %v2936_v15  ;;  %v6736_v5 = vrot.slane %v8365_v24, 1  ;;  %v6739_v42 = vrot.slane %v8365_v24, 2 }
 0x1a4   : > { %v2993_v17 = vadd.f32 %v2990_v30, %v2945_v4  ;;  %v2430_v19 = vrot.slane %v8375_v59, 6  ;;  %2914 = vst [vmem:[%s6562_s14 + $0x10] sm:$0xff] %v2911_v49  ;;  %v3062_v31 = vmul.f32 %v8365_v24, %v8364_v53  ;;  %v2451_v15 = vrot.slane %v8375_v59, 7  ;;  %v8378_v53 = vld [vmem:[#allocation92_spill] sm:$0xff]  ;;  %v8392_v24 = vld [vmem:[#allocation106_spill] sm:$0xff] }
 0x1a5   : > { %8373 = vst [vmem:[#allocation133_spill] sm:$0xff] %v6736_v5  ;;  %8374 = vst [vmem:[#allocation134_spill] sm:$0xff] %v6739_v42  ;;  %v3020_v6 = vadd.f32 %v3017_v45, %v2972_v14  ;;  %v3029_v29 = vadd.f32 %v3026_v40, %v2984_v46  ;;  %v3074_v44 = vmul.f32 %v6736_v5, %v8299_v25  ;;  %v8377_v25 = vld [vmem:[#allocation91_spill] sm:$0xff] }
 0x1a6   : > { %v3038_v26 = vadd.f32 %v3035_v21, %v2993_v17  ;;  %v3083_v60 = vmul.f32 %v6736_v5, %v8367_v41  ;;  %v3110_v0 = vmul.f32 %v6736_v5, %v8369_v39  ;;  %v3122_v30 = vmul.f32 %v6739_v42, %v8355_v34  ;;  %v8376_v21 = vld [vmem:[#allocation90_spill] sm:$0xff] }
 0x1a7   : > { %v3065_v4 = vadd.f32 %v3062_v31, %v3020_v6  ;;  %v3131_v45 = vmul.f32 %v6739_v42, %v8370_v18  ;;  %v3158_v40 = vmul.f32 %v6739_v42, %v8372_v61  ;;  %v3077_v14 = vadd.f32 %v3074_v44, %v3029_v29  ;;  %v8379_v6 = vld [vmem:[#allocation95_spill] sm:$0xff] }
 0x1a8   : > { %v3086_v46 = vadd.f32 %v3083_v60, %v3038_v26  ;;  %v2436_v17 = vmul.f32 %v2430_v19, %v8376_v21  ;;  %v2442_v2 = vmul.f32 %v2430_v19, %v8377_v25  ;;  %v2448_v39 = vmul.f32 %v2430_v19, %v8378_v53  ;;  %v8384_v42 = vld [vmem:[#allocation87_spill] sm:$0xff] }
 0x1a9   : > { %v3113_v3 = vadd.f32 %v3110_v0, %v3065_v4  ;;  %v2457_v31 = vmul.f32 %v2451_v15, %v8379_v6  ;;  %v2466_v34 = vmul.f32 %v2451_v15, %v8380_v9  ;;  %v6763_v62 = vadd.f32 %v3122_v30, %v3077_v14  ;;  %v8385_v14 = vld [vmem:[#allocation100_spill] sm:$0xff] }
 0x1aa   : > { %v6765_v5 = vadd.f32 %v3131_v45, %v3086_v46  ;;  %v2475_v61 = vmul.f32 %v2451_v15, %v8383_v55  ;;  %v2508_v29 = vrot.slane %v8375_v59, 1  ;;  %v2538_v0 = vrot.slane %v8375_v59, 2  ;;  %v8386_v15 = vld [vmem:[#allocation24_spill] sm:$0xff] }
 0x1ab   : > { %8381 = vst [vmem:[#allocation25_spill] sm:$0xff] %v6763_v62  ;;  %v3161_v26 = vadd.f32 %v3158_v40, %v3113_v3  ;;  %v2460_v44 = vadd.f32 %v2457_v31, %v2436_v17  ;;  %v2469_v60 = vadd.f32 %v2466_v34, %v2442_v2  ;;  %v6772_v19 = vadd.f32 %v6609_v38, %v6605_v20  ;;  %v8387_v62 = vld [vmem:[#allocation28_spill] sm:$0xff]  ;;  %v8388_v40 = vld [vmem:[#allocation101_spill] sm:$0xff]  ;;  %v8389_v17 = vld [vmem:[#allocation102_spill] sm:$0xff] }
 0x1ac   : > { %8382 = vst [vmem:[#allocation135_spill] sm:$0xff] %v6765_v5  ;;  %v2478_v4 = vadd.f32 %v2475_v61, %v2448_v39  ;;  %v2502_v30 = vmul.f32 %v8375_v59, %v8384_v42  ;;  %v2514_v45 = vmul.f32 %v2508_v29, %v8385_v14  ;;  %v2523_v2 = vmul.f32 %v2508_v29, %v8388_v40  ;;  %v8391_v38 = vld [vmem:[#allocation29_spill] sm:$0xff] }
 0x1ad   : > { %4630 = vst [vmem:[%s6562_s14 + $0x28] sm:$0xff] %v3161_v26  ;;  %v4922_v46 = vpack.c.bf16 %v3161_v26, %v2911_v49  ;;  %v2487_v5 = vadd.f32 %v8386_v15, %v2460_v44  ;;  %v2496_v3 = vadd.f32 %v8387_v62, %v2469_v60  ;;  %v2532_v31 = vmul.f32 %v2508_v29, %v8389_v17  ;;  %v8393_v44 = vld [vmem:[#allocation107_spill] sm:$0xff] }
 0x1ae   : > { %v2505_v34 = vadd.f32 %v2502_v30, %v2478_v4  ;;  %v2544_v20 = vmul.f32 %v2538_v0, %v8390_v43  ;;  %v2581_v61 = vrot.slane %v8391_v38, 6  ;;  %v2553_v63 = vmul.f32 %v2538_v0, %v8392_v24 }
 0x1af   : > { %4923 = vmatpush3.bf16.msra.mxu1 %v4922_v46  ;;  %v2517_v39 = vadd.f32 %v2514_v45, %v2487_v5  ;;  %v2526_v59 = vadd.f32 %v2523_v2, %v2496_v3  ;;  %v6786_v49 = vrot.slane %v8391_v38, 7  ;;  %v2562_v62 = vmul.f32 %v2538_v0, %v8393_v44  ;;  %v8396_v2 = vld [vmem:[#allocation93_spill] sm:$0xff] }
 0x1b0   : > { %v2535_v26 = vadd.f32 %v2532_v31, %v2505_v34  ;;  %v2584_v60 = vmul.f32 %v2581_v61, %v8376_v21  ;;  %v2587_v4 = vmul.f32 %v2581_v61, %v8377_v25  ;;  %v8394_v29 = vmov 0.0|0.0   ;;  %v8397_v34 = vld [vmem:[#allocation39_spill] sm:$0xff] }
 0x1b1   : > { %4924 = vmatprep.subr.bf16.mxu1 %v8394_v29  ;;  %v2547_v30 = vadd.f32 %v2544_v20, %v2517_v39  ;;  %v2556_v15 = vadd.f32 %v2553_v63, %v2526_v59  ;;  %v2593_v46 = vmul.f32 %v2581_v61, %v8378_v53  ;;  %v2611_v5 = vmul.f32 %v6786_v49, %v8379_v6  ;;  %v8399_v59 = vld [vmem:[#allocation98_spill] sm:$0xff] }
 0x1b2   : > { %v6797_v45 = vadd.f32 %v6613_v10, %v6621_v13  ;;  %v2565_v3 = vadd.f32 %v2562_v62, %v2535_v26  ;;  %v2602_v0 = vmul.f32 %v2581_v61, %v8396_v2  ;;  %v2638_v31 = vmul.f32 %v8391_v38, %v8397_v34 }
 0x1b3   : > { %v6802_v33 = vadd.f32 %v2587_v4, %v2547_v30  ;;  %v2596_v29 = vadd.f32 %v2593_v46, %v2556_v15  ;;  %v2614_v20 = vadd.f32 %v2611_v5, %v2584_v60  ;;  %v2623_v63 = vmul.f32 %v6786_v49, %v8383_v55  ;;  %v8400_v4 = vld [vmem:[#allocation22_spill] sm:$0xff]  ;;  %v8402_v15 = vld [vmem:[#allocation88_spill] sm:$0xff] }
 0x1b4   : > { %8395 = vst [vmem:[#allocation24_spill] sm:$0xff] %v6797_v45  ;;  %v2605_v39 = vadd.f32 %v2602_v0, %v2565_v3  ;;  %v2632_v53 = vmul.f32 %v6786_v49, %v8399_v59  ;;  %v6809_v10 = vrot.slane %v8391_v38, 1  ;;  %v6812_v13 = vrot.slane %v8391_v38, 2 }
 0x1b5   : > { %8398 = vst [vmem:[#allocation28_spill] sm:$0xff] %v6802_v33  ;;  %v2626_v61 = vadd.f32 %v2623_v63, %v2596_v29  ;;  %v2641_v26 = vadd.f32 %v2638_v31, %v2614_v20  ;;  %v2650_v62 = vmul.f32 %v8391_v38, %v8384_v42  ;;  %v6817_v60 = vrot.slane %v8400_v4, 6  ;;  %v8404_v31 = vld [vmem:[#allocation103_spill] sm:$0xff]  ;;  %v8405_v42 = vld [vmem:[#allocation108_spill] sm:$0xff] }
 0x1b6   : > { %v2635_v30 = vadd.f32 %v2632_v53, %v2605_v39  ;;  %v2659_v46 = vmul.f32 %v8391_v38, %v8402_v15  ;;  %v2668_v5 = vmul.f32 %v6809_v10, %v8385_v14  ;;  %v6824_v3 = vrot.slane %v8400_v4, 7 }
 0x1b7   : > { %8401 = vst [vmem:[#allocation136_spill] sm:$0xff] %v6817_v60  ;;  %v2653_v0 = vadd.f32 %v2650_v62, %v2626_v61  ;;  %v2680_v29 = vmul.f32 %v6809_v10, %v8389_v17  ;;  %v2689_v20 = vmul.f32 %v6809_v10, %v8404_v31  ;;  %v2698_v63 = vmul.f32 %v6812_v13, %v8390_v43 }
 0x1b8   : > { %8403 = vst [vmem:[#allocation137_spill] sm:$0xff] %v6824_v3  ;;  %v2662_v53 = vadd.f32 %v2659_v46, %v2635_v30  ;;  %v2671_v39 = vadd.f32 %v2668_v5, %v2641_v26  ;;  %v2710_v45 = vmul.f32 %v6812_v13, %v8393_v44  ;;  %v2719_v55 = vmul.f32 %v6812_v13, %v8405_v42  ;;  %v8406_v30 = vld [vmem:[#allocation94_spill] sm:$0xff]  ;;  %v8407_v44 = vld [vmem:[#allocation99_spill] sm:$0xff] }
 0x1b9   : > { %v2683_v38 = vadd.f32 %v2680_v29, %v2653_v0  ;;  %v2741_v61 = vmul.f32 %v6817_v60, %v8376_v21  ;;  %v2744_v62 = vmul.f32 %v6817_v60, %v8377_v25  ;;  %v2756_v17 = vmul.f32 %v6817_v60, %v8396_v2 }
 0x1ba   : > { %v2692_v33 = vadd.f32 %v2689_v20, %v2662_v53  ;;  %v2701_v52 = vadd.f32 %v2698_v63, %v2671_v39  ;;  %v2765_v26 = vmul.f32 %v6817_v60, %v8406_v30  ;;  %v2774_v46 = vmul.f32 %v6824_v3, %v8379_v6  ;;  %v8408_v39 = vld [vmem:[#allocation42_spill] sm:$0xff] }
 0x1bb   : > { %v2713_v5 = vadd.f32 %v2710_v45, %v2683_v38  ;;  %v2780_v0 = vmul.f32 %v6824_v3, %v8380_v9  ;;  %v2792_v29 = vmul.f32 %v6824_v3, %v8399_v59  ;;  %v2801_v56 = vmul.f32 %v6824_v3, %v8407_v44  ;;  %v8409_v45 = vld [vmem:[#allocation89_spill] sm:$0xff] }
 0x1bc   : > { %v2722_v22 = vadd.f32 %v2719_v55, %v2692_v33  ;;  %v2747_v2 = vadd.f32 %v2744_v62, %v2701_v52  ;;  %v2777_v20 = vadd.f32 %v2774_v46, %v2741_v61  ;;  %v2807_v63 = vmul.f32 %v8400_v4, %v8397_v34 }
 0x1bd   : > { %v2759_v53 = vadd.f32 %v2756_v17, %v2713_v5  ;;  %v2813_v60 = vmul.f32 %v8400_v4, %v8408_v39  ;;  %v2825_v38 = vmul.f32 %v8400_v4, %v8402_v15  ;;  %v2834_v32 = vmul.f32 %v8400_v4, %v8409_v45  ;;  %v8411_v17 = vld [vmem:[#allocation111_spill] sm:$0xff] }
 0x1be   : > { %v2768_v59 = vadd.f32 %v2765_v26, %v2722_v22  ;;  %v2783_v48 = vadd.f32 %v2780_v0, %v2747_v2  ;;  %v2810_v36 = vadd.f32 %v2807_v63, %v2777_v20  ;;  %v6861_v55 = vrot.slane %v8400_v4, 1 }
 0x1bf   : > { %v2795_v52 = vadd.f32 %v2792_v29, %v2759_v53  ;;  %v6864_v33 = vrot.slane %v8400_v4, 2  ;;  %v6867_v61 = vrot.slane %v8411_v17, 6  ;;  %v6870_v62 = vrot.slane %v8411_v17, 7  ;;  %v8412_v29 = vld [vmem:[#allocation104_spill] sm:$0xff] }
 0x1c0   : > { %8410 = vst [vmem:[#allocation138_spill] sm:$0xff] %v6861_v55  ;;  %v2804_v46 = vadd.f32 %v2801_v56, %v2768_v59  ;;  %v2816_v5 = vadd.f32 %v2813_v60, %v2783_v48  ;;  %v2843_v22 = vmul.f32 %v6861_v55, %v8385_v14  ;;  %v2849_v2 = vmul.f32 %v6861_v55, %v8388_v40 }
 0x1c1   : > { %v2828_v26 = vadd.f32 %v2825_v38, %v2795_v52  ;;  %v2861_v0 = vmul.f32 %v6861_v55, %v8404_v31  ;;  %v2870_v20 = vmul.f32 %v6861_v55, %v8412_v29  ;;  %v2879_v63 = vmul.f32 %v6864_v33, %v8390_v43  ;;  %v8413_v38 = vld [vmem:[#allocation109_spill] sm:$0xff] }
 0x1c2   : > { %v2837_v53 = vadd.f32 %v2834_v32, %v2804_v46  ;;  %v2846_v15 = vadd.f32 %v2843_v22, %v2810_v36  ;;  %v2852_v56 = vadd.f32 %v2849_v2, %v2816_v5  ;;  %v2885_v48 = vmul.f32 %v6864_v33, %v8392_v24 }
 0x1c3   : > { %v2864_v59 = vadd.f32 %v2861_v0, %v2828_v26  ;;  %v2897_v60 = vmul.f32 %v6864_v33, %v8405_v42  ;;  %v2906_v52 = vmul.f32 %v6864_v33, %v8413_v38  ;;  %v2934_v31 = vmul.f32 %v6867_v61, %v8376_v21  ;;  %v8436_v21 = vld [vmem:[#allocation71_spill] sm:$0xff] }
 0x1c4   : > { %v2873_v55 = vadd.f32 %v2870_v20, %v2837_v53  ;;  %v2882_v4 = vadd.f32 %v2879_v63, %v2846_v15  ;;  %v6890_v3 = vadd.f32 %v2885_v48, %v2852_v56  ;;  %v2940_v36 = vmul.f32 %v6867_v61, %v8377_v25 }
 0x1c5   : > { %v6896_v32 = vadd.f32 %v6625_v12, %v6772_v19  ;;  %v2900_v46 = vadd.f32 %v2897_v60, %v2864_v59  ;;  %v2967_v5 = vmul.f32 %v6867_v61, %v8406_v30  ;;  %v2979_v22 = vmul.f32 %v6870_v62, %v8379_v6  ;;  %v8435_v6 = vld [vmem:[#allocation125_spill] sm:$0xff] }
 0x1c6   : > { %v2909_v2 = vadd.f32 %v2906_v52, %v2873_v55  ;;  %v2943_v26 = vadd.f32 %v2940_v36, %v2882_v4  ;;  %v2988_v15 = vmul.f32 %v6870_v62, %v8380_v9  ;;  %v3015_v0 = vmul.f32 %v6870_v62, %v8407_v44 }
 0x1c7   : > { %8414 = vst [vmem:[#allocation111_spill] sm:$0xff] %v6896_v32  ;;  %v2970_v20 = vadd.f32 %v2967_v5, %v2900_v46  ;;  %v2982_v63 = vadd.f32 %v2979_v22, %v2934_v31  ;;  %v3024_v12 = vmul.f32 %v8411_v17, %v8397_v34  ;;  %v3033_v19 = vmul.f32 %v8411_v17, %v8408_v39  ;;  %v8415_v5 = vld [vmem:[#allocation21_spill] sm:$0xff]  ;;  %v8430_v34 = vld [vmem:[#allocation115_spill] sm:$0xff] }
 0x1c8   : > { %2912 = vst [vmem:[%s6562_s14] sm:$0xff] %v2909_v2  ;;  %v2991_v53 = vadd.f32 %v2988_v15, %v2943_v26  ;;  %v6912_v56 = vrot.slane %v8411_v17, 1  ;;  %v6915_v4 = vrot.slane %v8411_v17, 2  ;;  %v2621_v55 = vadd.f32 %v6547_v51, %v6448_v11 }
 0x1c9   : > { %v6921_v31 = vmul.f32 %v6597_v35, %v8357_v7  ;;  %v3018_v48 = vadd.f32 %v3015_v0, %v2970_v20  ;;  %v3027_v59 = vadd.f32 %v3024_v12, %v2982_v63  ;;  %v3060_v60 = vmul.f32 %v8411_v17, %v8409_v45 }
 0x1ca   : > { %v3036_v52 = vadd.f32 %v3033_v19, %v2991_v53  ;;  %v3072_v36 = vmul.f32 %v6912_v56, %v8385_v14  ;;  %v3081_v46 = vmul.f32 %v6912_v56, %v8388_v40  ;;  %v2645_v22 = vmul.f32 %v8415_v5, %v8321_v16  ;;  %v8429_v14 = vld [vmem:[#allocation59_spill] sm:$0xff]  ;;  %v8458_v16 = vld [vmem:[#allocation44_spill] sm:$0xff] }
 0x1cb   : > { %v6933_v11 = vmul.f32 %v6603_v54, %v8359_v58  ;;  %v3063_v51 = vadd.f32 %v3060_v60, %v3018_v48  ;;  %v3108_v35 = vmul.f32 %v6912_v56, %v8412_v29  ;;  %v3120_v26 = vmul.f32 %v6915_v4, %v8390_v43  ;;  %v8427_v43 = vld [vmem:[#allocation55_spill] sm:$0xff] }
 0x1cc   : > { %v3075_v15 = vadd.f32 %v3072_v36, %v3027_v59  ;;  %v3084_v0 = vadd.f32 %v3081_v46, %v3036_v52  ;;  %v3129_v20 = vmul.f32 %v6915_v4, %v8392_v24  ;;  %v2648_v63 = vadd.f32 %v2645_v22, %v2621_v55  ;;  %v8418_v55 = vld [vmem:[#allocation51_spill] sm:$0xff] }
 0x1cd   : > { %v6943_v12 = vmul.f32 %v6637_v23, %v8367_v41  ;;  %v6947_v54 = vmul.f32 %v6640_v37, %v8370_v18  ;;  %v3111_v19 = vadd.f32 %v3108_v35, %v3063_v51  ;;  %v3156_v53 = vmul.f32 %v6915_v4, %v8413_v38  ;;  %v8420_v35 = vld [vmem:[#allocation54_spill] sm:$0xff]  ;;  %v8449_v38 = vld [vmem:[#allocation72_spill] sm:$0xff] }
 0x1ce   : > { %v6951_v48 = vadd.f32 %v3120_v26, %v3075_v15  ;;  %v6953_v59 = vadd.f32 %v3129_v20, %v3084_v0  ;;  %v2678_v60 = vadd.f32 %v6574_v50, %v2648_v63  ;;  %v2950_v52 = vmul.f32 %v6524_v57, %v8418_v55  ;;  %v8419_v50 = vld [vmem:[#allocation118_spill] sm:$0xff]  ;;  %v8422_v0 = vld [vmem:[#allocation65_spill] sm:$0xff] }
 0x1cf   : > { %v6960_v23 = vmul.f32 %v6786_v49, %v8380_v9  ;;  %v6964_v37 = vmul.f32 %v6809_v10, %v8388_v40  ;;  %v6968_v36 = vmul.f32 %v6812_v13, %v8392_v24  ;;  %v3159_v46 = vadd.f32 %v3156_v53, %v3111_v19  ;;  %v8421_v15 = vld [vmem:[#allocation58_spill] sm:$0xff]  ;;  %v8423_v20 = vld [vmem:[#allocation121_spill] sm:$0xff]  ;;  %v8424_v19 = vld [vmem:[#allocation68_spill] sm:$0xff] }
 0x1d0   : > { %8416 = vst [vmem:[#allocation21_spill] sm:$0xff] %v6951_v48  ;;  %8417 = vst [vmem:[#allocation139_spill] sm:$0xff] %v6953_v59  ;;  %v2708_v5 = vadd.f32 %v6578_v1, %v2678_v60  ;;  %v2751_v22 = vmul.f32 %v8419_v50, %v8418_v55  ;;  %v2953_v51 = vadd.f32 %v2950_v52, %v6582_v28  ;;  %v8425_v53 = vld [vmem:[#allocation122_spill] sm:$0xff]  ;;  %v8426_v28 = vld [vmem:[#allocation112_spill] sm:$0xff]  ;;  %v7008_v24 = vrot.slane %v8430_v34, 1 }
 0x1d1   : > { %v2998_v49 = vmul.f32 %v6543_v47, %v8420_v35  ;;  %4628 = vst [vmem:[%s6562_s14 + $0x18] sm:$0xff] %v3159_v46  ;;  %v4911_v26 = vpack.c.bf16 %v3159_v46, %v2909_v2  ;;  %v2787_v10 = vmul.f32 %v6469_v8, %v8420_v35  ;;  %v2820_v13 = vmul.f32 %v6396_v27, %v8421_v15  ;;  %v8428_v46 = vld [vmem:[#allocation60_spill] sm:$0xff]  ;;  %v8441_v9 = vld [vmem:[#allocation119_spill] sm:$0xff] }
 0x1d2   : > { %v2856_v63 = vmul.f32 %v8423_v20, %v8422_v0  ;;  %v2754_v1 = vadd.f32 %v2751_v22, %v2708_v5  ;;  %v2892_v60 = vmul.f32 %v8425_v53, %v8424_v19  ;;  %v3043_v52 = vmul.f32 %v8426_v28, %v8421_v15  ;;  %8437 = vst [vmem:[#allocation122_spill] sm:$0xff] %v7008_v24  ;;  %v8439_v59 = vld [vmem:[#allocation56_spill] sm:$0xff]  ;;  %v8451_v15 = vld [vmem:[#allocation130_spill] sm:$0xff] }
 0x1d3   : > { %v3001_v50 = vadd.f32 %v2998_v49, %v2953_v51  ;;  %4912 = vmatpush1.bf16.msra.mxu0 %v4911_v26  ;;  %v2959_v2 = vmul.f32 %v6524_v57, %v8427_v43  ;;  %v3007_v8 = vmul.f32 %v6543_v47, %v8428_v46  ;;  %v3052_v27 = vmul.f32 %v8426_v28, %v8429_v14  ;;  %v8432_v51 = vld [vmem:[#allocation124_spill] sm:$0xff]  ;;  %v8434_v26 = vld [vmem:[#allocation69_spill] sm:$0xff] }
 0x1d4   : > { %v6994_v20 = vrot.slane %v8430_v34, 6  ;;  %v2790_v5 = vadd.f32 %v2787_v10, %v2754_v1  ;;  %v3091_v49 = vmul.f32 %v8432_v51, %v8422_v0  ;;  %v6999_v53 = vrot.slane %v8430_v34, 7 }
 0x1d5   : > { %v3046_v22 = vadd.f32 %v3043_v52, %v3001_v50  ;;  %v3100_v57 = vmul.f32 %v8432_v51, %v8434_v26  ;;  %v3139_v47 = vmul.f32 %v8435_v6, %v8424_v19  ;;  %v3148_v28 = vmul.f32 %v8435_v6, %v8436_v21  ;;  %v8438_v52 = vld [vmem:[#allocation61_spill] sm:$0xff] }
 0x1d6   : > { %8431 = vst [vmem:[#allocation118_spill] sm:$0xff] %v6994_v20  ;;  %8433 = vst [vmem:[#allocation121_spill] sm:$0xff] %v6999_v53  ;;  %v2823_v10 = vadd.f32 %v2820_v13, %v2790_v5  ;;  %v3303_v50 = vmul.f32 %v8430_v34, %v8429_v14  ;;  %v7014_v40 = vmul.f32 %v8430_v34, %v8438_v52  ;;  %v7021_v6 = vrot.slane %v8430_v34, 2 }
 0x1d7   : > { %v3094_v1 = vadd.f32 %v3091_v49, %v3046_v22  ;;  %v3210_v51 = vmul.f32 %v6994_v20, %v8427_v43  ;;  %v3219_v48 = vmul.f32 %v6994_v20, %v8439_v59  ;;  %v7024_v25 = vrot.slane %v8441_v9, 6  ;;  %v8443_v49 = vld [vmem:[#allocation62_spill] sm:$0xff] }
 0x1d8   : > { %8440 = vst [vmem:[#allocation112_spill] sm:$0xff] %v7021_v6  ;;  %v2859_v13 = vadd.f32 %v2856_v63, %v2823_v10  ;;  %v3258_v22 = vmul.f32 %v6999_v53, %v8428_v46  ;;  %v3267_v18 = vmul.f32 %v6999_v53, %v8443_v49  ;;  %v3351_v41 = vmul.f32 %v7008_v24, %v8434_v26  ;;  %v8447_v10 = vld [vmem:[#allocation70_spill] sm:$0xff] }
 0x1d9   : > { %8442 = vst [vmem:[#allocation124_spill] sm:$0xff] %v7024_v25  ;;  %v3142_v5 = vadd.f32 %v3139_v47, %v3094_v1  ;;  %v7033_v58 = vrot.slane %v8441_v9, 7  ;;  %v7036_v7 = vrot.slane %v8441_v9, 1  ;;  %v7039_v14 = vrot.slane %v8441_v9, 2  ;;  %v8448_v46 = vld [vmem:[#allocation26_spill] sm:$0xff] }
 0x1da   : > { %v2895_v63 = vadd.f32 %v2892_v60, %v2859_v13  ;;  %v7043_v1 = vmul.f32 %v7008_v24, %v8447_v10  ;;  %v2592_v43 = vadd.f32 %v6921_v31, %v8448_v46  ;;  %v3399_v26 = vmul.f32 %v7021_v6, %v8436_v21  ;;  %v8450_v24 = vld [vmem:[#allocation75_spill] sm:$0xff] }
 0x1db   : > { %8444 = vst [vmem:[#allocation125_spill] sm:$0xff] %v7033_v58  ;;  %8445 = vst [vmem:[#allocation140_spill] sm:$0xff] %v7036_v7  ;;  %v3213_v47 = vadd.f32 %v3210_v51, %v3142_v5  ;;  %v7051_v19 = vmul.f32 %v7021_v6, %v8449_v38  ;;  %v3464_v0 = vmul.f32 %v7024_v25, %v8439_v59  ;;  %v8452_v59 = vld [vmem:[#allocation78_spill] sm:$0xff]  ;;  %v8453_v25 = vld [vmem:[#allocation131_spill] sm:$0xff] }
 0x1dc   : > { %8446 = vst [vmem:[#allocation141_spill] sm:$0xff] %v7039_v14  ;;  %v3539_v60 = vmul.f32 %v8441_v9, %v8438_v52  ;;  %v2962_v51 = vadd.f32 %v2959_v2, %v2895_v63  ;;  %v2622_v5 = vadd.f32 %v6933_v11, %v2592_v43  ;;  %v2951_v31 = vmul.f32 %v8451_v15, %v8450_v24  ;;  %v8455_v43 = vld [vmem:[#allocation132_spill] sm:$0xff] }
 0x1dd   : > { %v3261_v13 = vadd.f32 %v3258_v22, %v3213_v47  ;;  %v3503_v46 = vmul.f32 %v7033_v58, %v8443_v49  ;;  %v3578_v21 = vmul.f32 %v7036_v7, %v8447_v10  ;;  %v3617_v6 = vmul.f32 %v7039_v14, %v8449_v38  ;;  %v8454_v22 = vld [vmem:[#allocation23_spill] sm:$0xff]  ;;  %v8456_v47 = vld [vmem:[#allocation126_spill] sm:$0xff]  ;;  %v8460_v38 = vld [vmem:[#allocation113_spill] sm:$0xff] }
 0x1de   : > { %v2999_v34 = vmul.f32 %v8453_v25, %v8452_v59  ;;  %v3010_v52 = vadd.f32 %v3007_v8, %v2962_v51  ;;  %v2649_v63 = vadd.f32 %v8454_v22, %v2622_v5  ;;  %v2954_v11 = vadd.f32 %v2951_v31, %v8455_v43  ;;  %v8457_v49 = vld [vmem:[#allocation127_spill] sm:$0xff]  ;;  %v8459_v10 = vld [vmem:[#allocation110_spill] sm:$0xff]  ;;  %v8461_v51 = vld [vmem:[#allocation81_spill] sm:$0xff] }
 0x1df   : > { %v3306_v2 = vadd.f32 %v3303_v50, %v3261_v13  ;;  %v2752_v9 = vmul.f32 %v8456_v47, %v8450_v24  ;;  %v2788_v58 = vmul.f32 %v8457_v49, %v8452_v59  ;;  %v2821_v7 = vmul.f32 %v8459_v10, %v8458_v16  ;;  %v8462_v13 = vld [vmem:[#allocation128_spill] sm:$0xff]  ;;  %v8464_v22 = vld [vmem:[#allocation129_spill] sm:$0xff] }
 0x1e0   : > { %v3044_v14 = vmul.f32 %v8460_v38, %v8458_v16  ;;  %v3055_v35 = vadd.f32 %v3052_v27, %v3010_v52  ;;  %v2679_v8 = vadd.f32 %v6943_v12, %v2649_v63  ;;  %v3002_v50 = vadd.f32 %v2999_v34, %v2954_v11  ;;  %v8463_v31 = vld [vmem:[#allocation84_spill] sm:$0xff]  ;;  %v8465_v47 = vld [vmem:[#allocation133_spill] sm:$0xff]  ;;  %v8468_v12 = vld [vmem:[#allocation79_spill] sm:$0xff] }
 0x1e1   : > { %v3354_v32 = vadd.f32 %v3351_v41, %v3306_v2  ;;  %v2857_v5 = vmul.f32 %v8462_v13, %v8461_v51  ;;  %v2893_v43 = vmul.f32 %v8464_v22, %v8463_v31  ;;  %v3092_v49 = vmul.f32 %v8465_v47, %v8461_v51  ;;  %v8466_v59 = vld [vmem:[#allocation116_spill] sm:$0xff]  ;;  %v8469_v63 = vld [vmem:[#allocation134_spill] sm:$0xff] }
 0x1e2   : > { %v7086_v24 = vrot.slane %v8466_v59, 6  ;;  %v3103_v10 = vadd.f32 %v3100_v57, %v3055_v35  ;;  %v2709_v27 = vadd.f32 %v6947_v54, %v2679_v8  ;;  %v3047_v41 = vadd.f32 %v3044_v14, %v3002_v50  ;;  %v8467_v52 = vld [vmem:[#allocation76_spill] sm:$0xff]  ;;  %v8471_v14 = vld [vmem:[#allocation82_spill] sm:$0xff] }
 0x1e3   : > { %v3402_v53 = vadd.f32 %v3399_v26, %v3354_v32  ;;  %v2960_v34 = vmul.f32 %v8451_v15, %v8467_v52  ;;  %v3008_v2 = vmul.f32 %v8453_v25, %v8468_v12  ;;  %v3140_v11 = vmul.f32 %v8469_v63, %v8463_v31  ;;  %v8470_v32 = vld [vmem:[#allocation73_spill] sm:$0xff] }
 0x1e4   : > { %v7096_v13 = vrot.slane %v8466_v59, 7  ;;  %v3151_v22 = vadd.f32 %v3148_v28, %v3103_v10  ;;  %v2755_v16 = vadd.f32 %v2752_v9, %v2709_v27  ;;  %v3095_v35 = vadd.f32 %v3092_v49, %v3047_v41  ;;  %v8472_v15 = vld [vmem:[#allocation85_spill] sm:$0xff] }
 0x1e5   : > { %v3467_v51 = vadd.f32 %v3464_v0, %v3402_v53  ;;  %v3053_v54 = vmul.f32 %v8460_v38, %v8470_v32  ;;  %v3101_v26 = vmul.f32 %v8465_v47, %v8471_v14  ;;  %v7104_v57 = vmul.f32 %v8469_v63, %v8472_v15  ;;  %v8473_v0 = vld [vmem:[#allocation77_spill] sm:$0xff]  ;;  %v8476_v63 = vld [vmem:[#allocation120_spill] sm:$0xff] }
 0x1e6   : > { %v3211_v25 = vmul.f32 %v7086_v24, %v8467_v52  ;;  %v3222_v8 = vadd.f32 %v3219_v48, %v3151_v22  ;;  %v2791_v31 = vadd.f32 %v2788_v58, %v2755_v16  ;;  %v3143_v28 = vadd.f32 %v3140_v11, %v3095_v35  ;;  %v8475_v58 = vld [vmem:[#allocation74_spill] sm:$0xff]  ;;  %v8477_v35 = vld [vmem:[#allocation83_spill] sm:$0xff] }
 0x1e7   : > { %v3506_v50 = vadd.f32 %v3503_v46, %v3467_v51  ;;  %v7110_v9 = vmul.f32 %v7086_v24, %v8473_v0  ;;  %v3259_v38 = vmul.f32 %v7096_v13, %v8468_v12  ;;  %v3304_v53 = vmul.f32 %v8466_v59, %v8470_v32  ;;  %v8474_v46 = vld [vmem:[#allocation80_spill] sm:$0xff] }
 0x1e8   : > { %v7117_v47 = vrot.slane %v8466_v59, 1  ;;  %v3270_v49 = vadd.f32 %v3267_v18, %v3222_v8  ;;  %v2824_v27 = vadd.f32 %v2821_v7, %v2791_v31  ;;  %v3214_v48 = vadd.f32 %v3211_v25, %v3143_v28 }
 0x1e9   : > { %v3542_v10 = vadd.f32 %v3539_v60, %v3506_v50  ;;  %v7121_v16 = vmul.f32 %v7096_v13, %v8474_v46  ;;  %v7125_v51 = vmul.f32 %v8466_v59, %v8475_v58  ;;  %v7128_v41 = vrot.slane %v8466_v59, 2  ;;  %v8478_v50 = vld [vmem:[#allocation28_spill] sm:$0xff] }
 0x1ea   : > { %v7131_v11 = vrot.slane %v8476_v63, 6  ;;  %v3315_v22 = vadd.f32 %v7014_v40, %v3270_v49  ;;  %v2860_v7 = vadd.f32 %v2857_v5, %v2824_v27  ;;  %v3262_v60 = vadd.f32 %v3259_v38, %v3214_v48  ;;  %v8480_v49 = vld [vmem:[#allocation86_spill] sm:$0xff]  ;;  %v8481_v48 = vld [vmem:[#allocation29_spill] sm:$0xff] }
 0x1eb   : > { %v3581_v18 = vadd.f32 %v3578_v21, %v3542_v10  ;;  %v3352_v31 = vmul.f32 %v7117_v47, %v8471_v14  ;;  %v7138_v25 = vmul.f32 %v7117_v47, %v8477_v35  ;;  %v7141_v8 = vrot.slane %v8476_v63, 7 }
 0x1ec   : > { %v2620_v28 = vadd.f32 %v6960_v23, %v8478_v50  ;;  %v3363_v32 = vadd.f32 %v7043_v1, %v3315_v22  ;;  %v2896_v21 = vadd.f32 %v2893_v43, %v2860_v7  ;;  %v3307_v5 = vadd.f32 %v3304_v53, %v3262_v60  ;;  %v8483_v60 = vld [vmem:[#allocation92_spill] sm:$0xff] }
 0x1ed   : > { %v7146_v40 = vadd.f32 %v3617_v6, %v3581_v18  ;;  %v3400_v38 = vmul.f32 %v7128_v41, %v8472_v15  ;;  %v7152_v10 = vmul.f32 %v7128_v41, %v8480_v49  ;;  %v7155_v27 = vrot.slane %v8476_v63, 1 }
 0x1ee   : > { %v2644_v23 = vmul.f32 %v8481_v48, %v8408_v39  ;;  %v7160_v1 = vadd.f32 %v7051_v19, %v3363_v32  ;;  %v2963_v6 = vadd.f32 %v2960_v34, %v2896_v21  ;;  %v3355_v43 = vadd.f32 %v3352_v31, %v3307_v5  ;;  %v8484_v48 = vld [vmem:[#allocation97_spill] sm:$0xff] }
 0x1ef   : > { %8479 = vst [vmem:[#allocation26_spill] sm:$0xff] %v7146_v40  ;;  %4635 = vst [vmem:[%s6562_s14 + $0x50] sm:$0xff] %v7146_v40  ;;  %v7165_v53 = vrot.slane %v8476_v63, 2  ;;  %v3465_v22 = vmul.f32 %v7131_v11, %v8473_v0  ;;  %v3540_v18 = vmul.f32 %v8476_v63, %v8475_v58  ;;  %v2949_v50 = vmul.f32 %v6867_v61, %v8483_v60 }
 0x1f0   : > { %8482 = vst [vmem:[#allocation130_spill] sm:$0xff] %v7160_v1  ;;  %v2647_v7 = vadd.f32 %v2644_v23, %v2620_v28  ;;  %4632 = vst [vmem:[%s6562_s14 + $0x38] sm:$0xff] %v7160_v1  ;;  %v4913_v19 = vpack.c.bf16 %v7146_v40, %v7160_v1  ;;  %v3011_v34 = vadd.f32 %v3008_v2, %v2963_v6  ;;  %v8486_v40 = vld [vmem:[#allocation137_spill] sm:$0xff] }
 0x1f1   : > { %v3403_v32 = vadd.f32 %v3400_v38, %v3355_v43  ;;  %v3504_v31 = vmul.f32 %v7141_v8, %v8474_v46  ;;  %v3579_v21 = vmul.f32 %v7155_v27, %v8477_v35  ;;  %v2952_v28 = vadd.f32 %v2949_v50, %v6890_v3  ;;  %v8485_v38 = vld [vmem:[#allocation136_spill] sm:$0xff] }
 0x1f2   : > { %v2677_v5 = vadd.f32 %v6964_v37, %v2647_v7  ;;  %v2997_v23 = vmul.f32 %v6870_v62, %v8484_v48  ;;  %4914 = vmatprep.subr.bf16.mxu0 %v4913_v19  ;;  %v3056_v58 = vadd.f32 %v3053_v54, %v3011_v34  ;;  %v3618_v2 = vmul.f32 %v7165_v53, %v8480_v49  ;;  %v8487_v7 = vld [vmem:[#allocation87_spill] sm:$0xff]  ;;  %v8488_v54 = vld [vmem:[#allocation22_spill] sm:$0xff] }
 0x1f3   : > { %v3468_v39 = vadd.f32 %v3465_v22, %v3403_v32  ;;  %v2750_v6 = vmul.f32 %v8485_v38, %v8483_v60  ;;  %v2786_v1 = vmul.f32 %v8486_v40, %v8484_v48  ;;  %v3042_v3 = vmul.f32 %v8411_v17, %v8487_v7  ;;  %v8489_v19 = vld [vmem:[#allocation102_spill] sm:$0xff] }
 0x1f4   : > { %v2707_v43 = vadd.f32 %v6968_v36, %v2677_v5  ;;  %v3000_v37 = vadd.f32 %v2997_v23, %v2952_v28  ;;  %v3104_v50 = vadd.f32 %v3101_v26, %v3056_v58  ;;  %v2819_v22 = vmul.f32 %v8488_v54, %v8487_v7  ;;  %v8490_v34 = vld [vmem:[#allocation138_spill] sm:$0xff]  ;;  %v8492_v23 = vld [vmem:[#allocation107_spill] sm:$0xff]  ;;  %v8493_v26 = vld [vmem:[#allocation93_spill] sm:$0xff] }
 0x1f5   : > { %v3507_v35 = vadd.f32 %v3504_v31, %v3468_v39  ;;  %v2855_v32 = vmul.f32 %v8490_v34, %v8489_v19  ;;  %v3090_v36 = vmul.f32 %v6912_v56, %v8489_v19  ;;  %v8491_v5 = vld [vmem:[#allocation114_spill] sm:$0xff]  ;;  %v2891_v39 = vmul.f32 %v6864_v33, %v8492_v23  ;;  %v8496_v33 = vld [vmem:[#allocation103_spill] sm:$0xff] }
 0x1f6   : > { %v2753_v49 = vadd.f32 %v2750_v6, %v2707_v43  ;;  %v3045_v46 = vadd.f32 %v3042_v3, %v3000_v37  ;;  %v7201_v38 = vrot.slane %v8491_v5, 6  ;;  %v3152_v40 = vadd.f32 %v7104_v57, %v3104_v50  ;;  %v8494_v3 = vld [vmem:[#allocation98_spill] sm:$0xff] }
 0x1f7   : > { %v3543_v28 = vadd.f32 %v3540_v18, %v3507_v35  ;;  %v2958_v58 = vmul.f32 %v6867_v61, %v8493_v26  ;;  %v3138_v6 = vmul.f32 %v6915_v4, %v8492_v23  ;;  %v7211_v43 = vrot.slane %v8491_v5, 7  ;;  %v8495_v35 = vld [vmem:[#allocation88_spill] sm:$0xff]  ;;  %v8507_v23 = vld [vmem:[#allocation115_spill] sm:$0xff] }
 0x1f8   : > { %v2789_v31 = vadd.f32 %v2786_v1, %v2753_v49  ;;  %v3093_v54 = vadd.f32 %v3090_v36, %v3045_v46  ;;  %v3223_v37 = vadd.f32 %v7110_v9, %v3152_v40  ;;  %v3006_v57 = vmul.f32 %v6870_v62, %v8494_v3 }
 0x1f9   : > { %v3051_v18 = vmul.f32 %v8411_v17, %v8495_v35  ;;  %v3099_v50 = vmul.f32 %v6912_v56, %v8496_v33  ;;  %v3582_v61 = vadd.f32 %v3579_v21, %v3543_v28  ;;  %v3209_v1 = vmul.f32 %v7201_v38, %v8493_v26 }
 0x1fa   : > { %v2822_v49 = vadd.f32 %v2819_v22, %v2789_v31  ;;  %v3141_v46 = vadd.f32 %v3138_v6, %v3093_v54  ;;  %v3271_v34 = vadd.f32 %v7121_v16, %v3223_v37  ;;  %v3147_v9 = vmul.f32 %v6915_v4, %v8405_v42  ;;  %v8498_v6 = vld [vmem:[#allocation117_spill] sm:$0xff] }
 0x1fb   : > { %v3302_v62 = vmul.f32 %v8491_v5, %v8495_v35  ;;  %v7228_v36 = vrot.slane %v8491_v5, 1  ;;  %v3257_v56 = vmul.f32 %v7211_v43, %v8494_v3  ;;  %v7234_v21 = vmul.f32 %v8491_v5, %v8409_v45 }
 0x1fc   : > { %v2858_v17 = vadd.f32 %v2855_v32, %v2822_v49  ;;  %v3212_v40 = vadd.f32 %v3209_v1, %v3141_v46  ;;  %v3316_v16 = vadd.f32 %v7125_v51, %v3271_v34  ;;  %v3218_v4 = vmul.f32 %v7201_v38, %v8406_v30  ;;  %v8499_v1 = vld [vmem:[#allocation50_spill] sm:$0xff] }
 0x1fd   : > { %v3266_v22 = vmul.f32 %v7211_v43, %v8407_v44  ;;  %v7242_v28 = vrot.slane %v8491_v5, 2  ;;  %v7244_v32 = vadd.f32 %v3618_v2, %v3582_v61  ;;  %v7247_v37 = vrot.slane %v8498_v6, 6 }
 0x1fe   : > { %v2894_v31 = vadd.f32 %v2891_v39, %v2858_v17  ;;  %v3260_v54 = vadd.f32 %v3257_v56, %v3212_v40  ;;  %v3364_v49 = vadd.f32 %v7138_v25, %v3316_v16  ;;  %v3350_v51 = vmul.f32 %v7228_v36, %v8496_v33  ;;  %v8501_v17 = vld [vmem:[#allocation24_spill] sm:$0xff]  ;;  %v8502_v56 = vld [vmem:[#allocation53_spill] sm:$0xff]  ;;  %v8505_v33 = vld [vmem:[#allocation54_spill] sm:$0xff] }
 0x1ff   : > { %8497 = vst [vmem:[#allocation131_spill] sm:$0xff] %v7244_v32  ;;  %v7253_v46 = vrot.slane %v8498_v6, 7  ;;  %v3192_v34 = vmul.f32 %v6994_v20, %v8499_v1  ;;  %v7259_v2 = vmul.f32 %v7228_v36, %v8412_v29  ;;  %v3201_v39 = vmul.f32 %v6994_v20, %v8418_v55  ;;  %v8503_v16 = vld [vmem:[#allocation121_spill] sm:$0xff] }
 0x200   : > { %v2961_v35 = vadd.f32 %v2958_v58, %v2894_v31  ;;  %v3305_v3 = vadd.f32 %v3302_v62, %v3260_v54  ;;  %v7264_v25 = vadd.f32 %v7152_v10, %v3364_v49  ;;  %v3398_v61 = vmul.f32 %v7242_v28, %v8405_v42  ;;  %v8504_v31 = vld [vmem:[#allocation111_spill] sm:$0xff]  ;;  %v8506_v42 = vld [vmem:[#allocation57_spill] sm:$0xff] }
 0x201   : > { %v3195_v40 = vadd.f32 %v3192_v34, %v8501_v17  ;;  %v3240_v1 = vmul.f32 %v8503_v16, %v8502_v56  ;;  %v3204_v54 = vadd.f32 %v3201_v39, %v8504_v31  ;;  %v3249_v26 = vmul.f32 %v8503_v16, %v8505_v33  ;;  %v8509_v31 = vld [vmem:[#allocation64_spill] sm:$0xff] }
 0x202   : > { %8500 = vst [vmem:[#allocation23_spill] sm:$0xff] %v7264_v25  ;;  %v3009_v58 = vadd.f32 %v3006_v57, %v2961_v35  ;;  %v3353_v62 = vadd.f32 %v3350_v51, %v3305_v3  ;;  %v4925_v20 = vpack.c.bf16 %v7244_v32, %v7264_v25  ;;  %v3463_v10 = vmul.f32 %v7247_v37, %v8406_v30  ;;  %v8508_v57 = vld [vmem:[#allocation58_spill] sm:$0xff] }
 0x203   : > { %v3243_v49 = vadd.f32 %v3240_v1, %v3195_v40  ;;  %v3285_v34 = vmul.f32 %v8507_v23, %v8506_v42  ;;  %v3252_v56 = vadd.f32 %v3249_v26, %v3204_v54  ;;  %v3294_v3 = vmul.f32 %v8507_v23, %v8508_v57  ;;  %v8510_v32 = vld [vmem:[#allocation122_spill] sm:$0xff]  ;;  %v8513_v54 = vld [vmem:[#allocation67_spill] sm:$0xff] }
 0x204   : > { %v3054_v17 = vadd.f32 %v3051_v18, %v3009_v58  ;;  %v3401_v19 = vadd.f32 %v3398_v61, %v3353_v62  ;;  %4926 = vmatpush3.bf16.msra.mxu1 %v4925_v20  ;;  %v3502_v35 = vmul.f32 %v7253_v46, %v8407_v44  ;;  %v7285_v51 = vrot.slane %v8498_v6, 1  ;;  %v8511_v18 = vld [vmem:[#allocation65_spill] sm:$0xff] }
 0x205   : > { %v3288_v39 = vadd.f32 %v3285_v34, %v3243_v49  ;;  %v3333_v1 = vmul.f32 %v8510_v32, %v8509_v31  ;;  %v3297_v42 = vadd.f32 %v3294_v3, %v3252_v56  ;;  %v3342_v26 = vmul.f32 %v8510_v32, %v8511_v18  ;;  %v8514_v49 = vld [vmem:[#allocation112_spill] sm:$0xff] }
 0x206   : > { %v3102_v40 = vadd.f32 %v3099_v50, %v3054_v17  ;;  %v3466_v25 = vadd.f32 %v3463_v10, %v3401_v19  ;;  %v8512_v61 = vmov 0.0|0.0   ;;  %v3538_v20 = vmul.f32 %v8498_v6, %v8409_v45  ;;  %v8515_v19 = vld [vmem:[#allocation68_spill] sm:$0xff]  ;;  %v8516_v10 = vld [vmem:[#allocation109_spill] sm:$0xff] }
 0x207   : > { %4927 = vmatprep.subr.bf16.mxu1 %v8512_v61  ;;  %v7295_v58 = vrot.slane %v8498_v6, 2  ;;  %v3336_v62 = vadd.f32 %v3333_v1, %v3288_v39  ;;  %v3381_v34 = vmul.f32 %v8514_v49, %v8513_v54  ;;  %v3345_v50 = vadd.f32 %v3342_v26, %v3297_v42  ;;  %v8517_v45 = vld [vmem:[#allocation124_spill] sm:$0xff]  ;;  %v8518_v54 = vld [vmem:[#allocation55_spill] sm:$0xff] }
 0x208   : > { %v3150_v44 = vadd.f32 %v3147_v9, %v3102_v40  ;;  %v3505_v31 = vadd.f32 %v3502_v35, %v3466_v25  ;;  %v3390_v56 = vmul.f32 %v8514_v49, %v8515_v19  ;;  %v3407_v17 = vmul.f32 %v7242_v28, %v8516_v10  ;;  %v8519_v35 = vld [vmem:[#allocation125_spill] sm:$0xff]  ;;  %v8520_v26 = vld [vmem:[#allocation60_spill] sm:$0xff] }
 0x209   : > { %v3577_v3 = vmul.f32 %v7285_v51, %v8412_v29  ;;  %v3384_v61 = vadd.f32 %v3381_v34, %v3336_v62  ;;  %v3446_v30 = vmul.f32 %v8517_v45, %v8418_v55  ;;  %v3455_v9 = vmul.f32 %v8517_v45, %v8518_v54 }
 0x20a   : > { %v3221_v39 = vadd.f32 %v3218_v4, %v3150_v44  ;;  %v3541_v1 = vadd.f32 %v3538_v20, %v3505_v31  ;;  %v3393_v32 = vadd.f32 %v3390_v56, %v3345_v50  ;;  %v3616_v42 = vmul.f32 %v7295_v58, %v8516_v10  ;;  %v8521_v44 = vld [vmem:[#allocation119_spill] sm:$0xff]  ;;  %v8523_v56 = vld [vmem:[#allocation140_spill] sm:$0xff] }
 0x20b   : > { %v3449_v25 = vadd.f32 %v3446_v30, %v3384_v61  ;;  %v3485_v40 = vmul.f32 %v8519_v35, %v8505_v33  ;;  %v3494_v29 = vmul.f32 %v8519_v35, %v8520_v26  ;;  %v3521_v4 = vmul.f32 %v8521_v44, %v8508_v57  ;;  %v8522_v20 = vld [vmem:[#allocation59_spill] sm:$0xff]  ;;  %v8526_v35 = vld [vmem:[#allocation69_spill] sm:$0xff] }
 0x20c   : > { %v3269_v62 = vadd.f32 %v3266_v22, %v3221_v39  ;;  %v3580_v34 = vadd.f32 %v3577_v3, %v3541_v1  ;;  %v3458_v49 = vadd.f32 %v3455_v9, %v3393_v32  ;;  %v3530_v50 = vmul.f32 %v8521_v44, %v8522_v20  ;;  %v8524_v30 = vld [vmem:[#allocation123_spill] sm:$0xff]  ;;  %v8527_v39 = vld [vmem:[#allocation141_spill] sm:$0xff] }
 0x20d   : > { %v3488_v31 = vadd.f32 %v3485_v40, %v3449_v25  ;;  %v3560_v55 = vmul.f32 %v8523_v56, %v8511_v18  ;;  %v7322_v61 = vrot.slane %v8524_v30, 6  ;;  %v3569_v22 = vmul.f32 %v8523_v56, %v8526_v35  ;;  %v8528_v9 = vld [vmem:[#allocation71_spill] sm:$0xff] }
 0x20e   : > { %v3314_v33 = vadd.f32 %v7234_v21, %v3269_v62  ;;  %v3497_v10 = vadd.f32 %v3494_v29, %v3458_v49  ;;  %v7328_v32 = vrot.slane %v8524_v30, 7  ;;  %v3599_v1 = vmul.f32 %v8527_v39, %v8515_v19  ;;  %v8530_v49 = vld [vmem:[#allocation36_spill] sm:$0xff]  ;;  %v8532_v56 = vld [vmem:[#allocation75_spill] sm:$0xff] }
 0x20f   : > { %8525 = vst [vmem:[#allocation132_spill] sm:$0xff] %v7322_v61  ;;  %v3524_v3 = vadd.f32 %v3521_v4, %v3488_v31  ;;  %v3608_v25 = vmul.f32 %v8527_v39, %v8528_v9  ;;  %v3712_v40 = vmul.f32 %v8524_v30, %v8522_v20  ;;  %v7337_v21 = vadd.f32 %v3616_v42, %v3580_v34  ;;  %v8531_v31 = vld [vmem:[#allocation56_spill] sm:$0xff]  ;;  %v8535_v34 = vld [vmem:[#allocation135_spill] sm:$0xff] }
 0x210   : > { %v3362_v18 = vadd.f32 %v7259_v2, %v3314_v33  ;;  %v3533_v29 = vadd.f32 %v3530_v50, %v3497_v10  ;;  %v3193_v62 = vmul.f32 %v7086_v24, %v8530_v49  ;;  %v3655_v4 = vmul.f32 %v7322_v61, %v8518_v54  ;;  %v8534_v2 = vld [vmem:[#allocation25_spill] sm:$0xff]  ;;  %v8536_v50 = vld [vmem:[#allocation38_spill] sm:$0xff] }
 0x211   : > { %8529 = vst [vmem:[#allocation126_spill] sm:$0xff] %v7337_v21  ;;  %v3563_v57 = vadd.f32 %v3560_v55, %v3524_v3  ;;  %v3664_v19 = vmul.f32 %v7322_v61, %v8531_v31  ;;  %v3202_v39 = vmul.f32 %v7086_v24, %v8532_v56  ;;  %v3685_v33 = vmul.f32 %v7328_v32, %v8520_v26  ;;  %v8537_v3 = vld [vmem:[#allocation78_spill] sm:$0xff]  ;;  %v8541_v49 = vld [vmem:[#allocation61_spill] sm:$0xff] }
 0x212   : > { %v7347_v44 = vadd.f32 %v3407_v17, %v3362_v18  ;;  %v3572_v20 = vadd.f32 %v3569_v22, %v3533_v29  ;;  %v3196_v10 = vadd.f32 %v3193_v62, %v8534_v2  ;;  %v3241_v54 = vmul.f32 %v7096_v13, %v8536_v50  ;;  %v8538_v22 = vld [vmem:[#allocation43_spill] sm:$0xff] }
 0x213   : > { %v3602_v42 = vadd.f32 %v3599_v1, %v3563_v57  ;;  %v3205_v55 = vadd.f32 %v3202_v39, %v8535_v34  ;;  %v3250_v31 = vmul.f32 %v7096_v13, %v8537_v3  ;;  %v7360_v17 = vrot.slane %v8524_v30, 1  ;;  %v8539_v39 = vld [vmem:[#allocation44_spill] sm:$0xff]  ;;  %v8540_v34 = vld [vmem:[#allocation62_spill] sm:$0xff] }
 0x214   : > { %8533 = vst [vmem:[#allocation127_spill] sm:$0xff] %v7347_v44  ;;  %v4915_v61 = vpack.c.bf16 %v7337_v21, %v7347_v44  ;;  %v3611_v18 = vadd.f32 %v3608_v25, %v3572_v20  ;;  %v3286_v26 = vmul.f32 %v8466_v59, %v8538_v22  ;;  %v3244_v57 = vadd.f32 %v3241_v54, %v3196_v10  ;;  %v8542_v20 = vld [vmem:[#allocation46_spill] sm:$0xff] }
 0x215   : > { %v3658_v29 = vadd.f32 %v3655_v4, %v3602_v42  ;;  %v3253_v1 = vadd.f32 %v3250_v31, %v3205_v55  ;;  %v3295_v62 = vmul.f32 %v8466_v59, %v8539_v39  ;;  %v3694_v50 = vmul.f32 %v7328_v32, %v8540_v34  ;;  %v8543_v4 = vld [vmem:[#allocation81_spill] sm:$0xff]  ;;  %v8545_v55 = vld [vmem:[#allocation48_spill] sm:$0xff] }
 0x216   : > { %4916 = vmatpush1.bf16.msra.mxu0 %v4915_v61  ;;  %v3667_v2 = vadd.f32 %v3664_v19, %v3611_v18  ;;  %v3721_v25 = vmul.f32 %v8524_v30, %v8541_v49  ;;  %v3334_v21 = vmul.f32 %v7117_v47, %v8542_v20  ;;  %v3289_v45 = vadd.f32 %v3286_v26, %v3244_v57  ;;  %v8546_v34 = vld [vmem:[#allocation84_spill] sm:$0xff] }
 0x217   : > { %v3688_v44 = vadd.f32 %v3685_v33, %v3658_v29  ;;  %v3298_v22 = vadd.f32 %v3295_v62, %v3253_v1  ;;  %v3343_v10 = vmul.f32 %v7117_v47, %v8543_v4  ;;  %v3742_v61 = vmul.f32 %v7360_v17, %v8526_v35  ;;  %v8547_v29 = vld [vmem:[#allocation70_spill] sm:$0xff] }
 0x218   : > { %v3697_v42 = vadd.f32 %v3694_v50, %v3667_v2  ;;  %v7377_v19 = vrot.slane %v8524_v30, 2  ;;  %v3382_v54 = vmul.f32 %v7128_v41, %v8545_v55  ;;  %v3337_v31 = vadd.f32 %v3334_v21, %v3289_v45  ;;  %v8548_v55 = vld [vmem:[#allocation30_spill] sm:$0xff]  ;;  %v8549_v21 = vld [vmem:[#allocation72_spill] sm:$0xff] }
 0x219   : > { %v3715_v49 = vadd.f32 %v3712_v40, %v3688_v44  ;;  %v3346_v18 = vadd.f32 %v3343_v10, %v3298_v22  ;;  %v3391_v33 = vmul.f32 %v7128_v41, %v8546_v34  ;;  %v3751_v57 = vmul.f32 %v7360_v17, %v8547_v29 }
 0x21a   : > { %8544 = vst [vmem:[#allocation110_spill] sm:$0xff] %v7377_v19  ;;  %v3724_v26 = vadd.f32 %v3721_v25, %v3697_v42  ;;  %v3447_v50 = vmul.f32 %v7131_v11, %v8532_v56  ;;  %v3385_v1 = vadd.f32 %v3382_v54, %v3337_v31  ;;  %v3456_v2 = vmul.f32 %v7131_v11, %v8467_v52  ;;  %v8550_v54 = vld [vmem:[#allocation27_spill] sm:$0xff] }
 0x21b   : > { %v3745_v35 = vadd.f32 %v3742_v61, %v3715_v49  ;;  %v3394_v62 = vadd.f32 %v3391_v33, %v3346_v18  ;;  %v7390_v44 = vmax.f32 %v8548_v55, 0.0  ;;  %v3772_v40 = vmul.f32 %v7377_v19, %v8528_v9 }
 0x21c   : > { %v3754_v45 = vadd.f32 %v3751_v57, %v3724_v26  ;;  %v3781_v22 = vmul.f32 %v7377_v19, %v8549_v21  ;;  %v3450_v25 = vadd.f32 %v3447_v50, %v3385_v1  ;;  %v3486_v42 = vmul.f32 %v7141_v8, %v8537_v3  ;;  %v8553_v26 = vld [vmem:[#allocation73_spill] sm:$0xff] }
 0x21d   : > { %v3459_v10 = vadd.f32 %v3456_v2, %v3394_v62  ;;  %v3495_v61 = vmul.f32 %v7141_v8, %v8468_v12  ;;  %v7401_v49 = vmax.f32 %v8550_v54, 0.0  ;;  %v7403_v55 = vadd.f32 %v3772_v40, %v3745_v35  ;;  %v8555_v40 = vld [vmem:[#allocation91_spill] sm:$0xff]  ;;  %v8561_v19 = vld [vmem:[#allocation101_spill] sm:$0xff] }
 0x21e   : > { %v7405_v31 = vadd.f32 %v3781_v22, %v3754_v45  ;;  %v3522_v9 = vmul.f32 %v8476_v63, %v8539_v39  ;;  %v3489_v18 = vadd.f32 %v3486_v42, %v3450_v25  ;;  %v3531_v29 = vmul.f32 %v8476_v63, %v8553_v26 }
 0x21f   : > { %8551 = vst [vmem:[#allocation113_spill] sm:$0xff] %v7403_v55  ;;  %v3498_v33 = vadd.f32 %v3495_v61, %v3459_v10  ;;  %v3561_v57 = vmul.f32 %v7155_v27, %v8543_v4  ;;  %v3570_v35 = vmul.f32 %v7155_v27, %v8471_v14  ;;  %v7418_v1 = vrot.slane %v7390_v44, 6  ;;  %v8556_v61 = vld [vmem:[#allocation96_spill] sm:$0xff] }
 0x220   : > { %8552 = vst [vmem:[#allocation128_spill] sm:$0xff] %v7405_v31  ;;  %v4917_v50 = vpack.c.bf16 %v7403_v55, %v7405_v31  ;;  %v7421_v62 = vrot.slane %v7390_v44, 7  ;;  %v3525_v2 = vadd.f32 %v3522_v9, %v3489_v18  ;;  %v3191_v21 = vmul.f32 %v7201_v38, %v8555_v40  ;;  %v8558_v55 = vld [vmem:[#allocation139_spill] sm:$0xff] }
 0x221   : > { %v3534_v45 = vadd.f32 %v3531_v29, %v3498_v33  ;;  %v3200_v22 = vmul.f32 %v7201_v38, %v8483_v60  ;;  %v3600_v25 = vmul.f32 %v7165_v53, %v8546_v34  ;;  %v3609_v10 = vmul.f32 %v7165_v53, %v8472_v15  ;;  %v8557_v33 = vld [vmem:[#allocation21_spill] sm:$0xff] }
 0x222   : > { %8554 = vst [vmem:[#allocation129_spill] sm:$0xff] %v7421_v62  ;;  %4918 = vmatprep.subr.bf16.mxu0 %v4917_v50  ;;  %v3713_v42 = vmul.f32 %v7390_v44, %v8553_v26  ;;  %v3239_v54 = vmul.f32 %v7211_v43, %v8556_v61  ;;  %v3564_v9 = vadd.f32 %v3561_v57, %v3525_v2 }
 0x223   : > { %v3573_v18 = vadd.f32 %v3570_v35, %v3534_v45  ;;  %v3194_v29 = vadd.f32 %v3191_v21, %v8557_v33  ;;  %v3203_v31 = vadd.f32 %v3200_v22, %v8558_v55  ;;  %v3656_v50 = vmul.f32 %v7418_v1, %v8467_v52  ;;  %v8559_v35 = vld [vmem:[#allocation42_spill] sm:$0xff]  ;;  %v8560_v45 = vld [vmem:[#allocation80_spill] sm:$0xff] }
 0x224   : > { %v3665_v34 = vmul.f32 %v7418_v1, %v8473_v0  ;;  %v3686_v4 = vmul.f32 %v7421_v62, %v8468_v12  ;;  %v3248_v26 = vmul.f32 %v7211_v43, %v8484_v48  ;;  %v3603_v39 = vadd.f32 %v3600_v25, %v3564_v9 }
 0x225   : > { %v3612_v3 = vadd.f32 %v3609_v10, %v3573_v18  ;;  %v3242_v57 = vadd.f32 %v3239_v54, %v3194_v29  ;;  %v3284_v2 = vmul.f32 %v8491_v5, %v8559_v35  ;;  %v3695_v55 = vmul.f32 %v7421_v62, %v8560_v45  ;;  %v8562_v10 = vld [vmem:[#allocation74_spill] sm:$0xff] }
 0x226   : > { %v7450_v52 = vrot.slane %v7390_v44, 1  ;;  %v3251_v21 = vadd.f32 %v3248_v26, %v3203_v31  ;;  %v3293_v0 = vmul.f32 %v8491_v5, %v8487_v7  ;;  %v3659_v12 = vadd.f32 %v3656_v50, %v3603_v39  ;;  %v8563_v29 = vld [vmem:[#allocation102_spill] sm:$0xff] }
 0x227   : > { %v3668_v22 = vadd.f32 %v3665_v34, %v3612_v3  ;;  %v3287_v33 = vadd.f32 %v3284_v2, %v3242_v57  ;;  %v3332_v25 = vmul.f32 %v7228_v36, %v8561_v19  ;;  %v3722_v54 = vmul.f32 %v7390_v44, %v8562_v10  ;;  %v8564_v62 = vld [vmem:[#allocation106_spill] sm:$0xff]  ;;  %v8565_v34 = vld [vmem:[#allocation83_spill] sm:$0xff] }
 0x228   : > { %v7459_v9 = vrot.slane %v7390_v44, 2  ;;  %v3296_v18 = vadd.f32 %v3293_v0, %v3251_v21  ;;  %v3341_v45 = vmul.f32 %v7228_v36, %v8563_v29  ;;  %v3689_v31 = vadd.f32 %v3686_v4, %v3659_v12  ;;  %v8566_v2 = vld [vmem:[#allocation107_spill] sm:$0xff]  ;;  %v8567_v12 = vld [vmem:[#allocation86_spill] sm:$0xff] }
 0x229   : > { %v3698_v26 = vadd.f32 %v3695_v55, %v3668_v22  ;;  %v3335_v35 = vadd.f32 %v3332_v25, %v3287_v33  ;;  %v3380_v3 = vmul.f32 %v7242_v28, %v8564_v62  ;;  %v3743_v39 = vmul.f32 %v7450_v52, %v8471_v14  ;;  %v8568_v33 = vld [vmem:[#allocation93_spill] sm:$0xff] }
 0x22a   : > { %v3752_v50 = vmul.f32 %v7450_v52, %v8565_v34  ;;  %v3344_v57 = vadd.f32 %v3341_v45, %v3296_v18  ;;  %v3389_v10 = vmul.f32 %v7242_v28, %v8566_v2  ;;  %v3716_v21 = vadd.f32 %v3713_v42, %v3689_v31 }
 0x22b   : > { %v3725_v0 = vadd.f32 %v3722_v54, %v3698_v26  ;;  %v3383_v19 = vadd.f32 %v3380_v3, %v3335_v35  ;;  %v3445_v4 = vmul.f32 %v7247_v37, %v8483_v60  ;;  %v3773_v55 = vmul.f32 %v7459_v9, %v8472_v15  ;;  %v8569_v54 = vld [vmem:[#allocation98_spill] sm:$0xff] }
 0x22c   : > { %v3782_v22 = vmul.f32 %v7459_v9, %v8567_v12  ;;  %v3392_v14 = vadd.f32 %v3389_v10, %v3344_v57  ;;  %v3454_v25 = vmul.f32 %v7247_v37, %v8568_v33  ;;  %v3746_v18 = vadd.f32 %v3743_v39, %v3716_v21  ;;  %v8572_v12 = vld [vmem:[#allocation88_spill] sm:$0xff]  ;;  %v8574_v21 = vld [vmem:[#allocation118_spill] sm:$0xff] }
 0x22d   : > { %v3755_v45 = vadd.f32 %v3752_v50, %v3725_v0  ;;  %v3448_v34 = vadd.f32 %v3445_v4, %v3383_v19  ;;  %v3484_v42 = vmul.f32 %v7253_v46, %v8484_v48  ;;  %v3493_v31 = vmul.f32 %v7253_v46, %v8569_v54  ;;  %v8573_v50 = vld [vmem:[#allocation49_spill] sm:$0xff] }
 0x22e   : > { %v3457_v35 = vadd.f32 %v3454_v25, %v3392_v14  ;;  %v7483_v26 = vadd.f32 %v3773_v55, %v3746_v18  ;;  %v3520_v57 = vmul.f32 %v8498_v6, %v8487_v7  ;;  %v3529_v39 = vmul.f32 %v8498_v6, %v8572_v12  ;;  %v8575_v14 = vld [vmem:[#allocation52_spill] sm:$0xff] }
 0x22f   : > { %v7485_v15 = vadd.f32 %v3782_v22, %v3755_v45  ;;  %v3487_v3 = vadd.f32 %v3484_v42, %v3448_v34  ;;  %v3559_v19 = vmul.f32 %v7285_v51, %v8563_v29  ;;  %v3186_v0 = vmul.f32 %v8574_v21, %v8573_v50  ;;  %v8576_v45 = vld [vmem:[#allocation103_spill] sm:$0xff] }
 0x230   : > { %8570 = vst [vmem:[#allocation133_spill] sm:$0xff] %v7483_v26  ;;  %v3496_v10 = vadd.f32 %v3493_v31, %v3457_v35  ;;  %v7498_v22 = vrot.slane %v7401_v49, 6  ;;  %v3231_v25 = vmul.f32 %v8503_v16, %v8575_v14  ;;  %v3568_v34 = vmul.f32 %v7285_v51, %v8576_v45 }
 0x231   : > { %8571 = vst [vmem:[#allocation116_spill] sm:$0xff] %v7485_v15  ;;  %v4928_v4 = vpack.c.bf16 %v7483_v26, %v7485_v15  ;;  %v3523_v55 = vadd.f32 %v3520_v57, %v3487_v3  ;;  %v7505_v42 = vrot.slane %v7401_v49, 7  ;;  %v3598_v31 = vmul.f32 %v7295_v58, %v8566_v2  ;;  %v8577_v3 = vld [vmem:[#allocation40_spill] sm:$0xff]  ;;  %v8582_v2 = vld [vmem:[#allocation94_spill] sm:$0xff] }
 0x232   : > { %v3532_v18 = vadd.f32 %v3529_v39, %v3496_v10  ;;  %v3234_v50 = vadd.f32 %v3231_v25, %v3186_v0  ;;  %v3276_v57 = vmul.f32 %v8507_v23, %v8577_v3  ;;  %v8578_v26 = vld [vmem:[#allocation108_spill] sm:$0xff]  ;;  %v8579_v10 = vmov 0.0  }
 0x233   : > { %4929 = vmatpush3.bf16.msra.mxu1 %v4928_v4  ;;  %v3562_v35 = vadd.f32 %v3559_v19, %v3523_v55  ;;  %v3607_v16 = vmul.f32 %v7295_v58, %v8578_v26  ;;  %v3654_v14 = vmul.f32 %v7498_v22, %v8568_v33  ;;  %v8580_v4 = vld [vmem:[#allocation63_spill] sm:$0xff]  ;;  %v8581_v19 = vld [vmem:[#allocation122_spill] sm:$0xff]  ;;  %v3663_v0 = vmul.f32 %v7498_v22, %v8582_v2 }
 0x234   : > { %v3571_v21 = vadd.f32 %v3568_v34, %v3532_v18  ;;  %4845 = vmatprep.subr.mxu1 %v8579_v10  ;;  %v3279_v15 = vadd.f32 %v3276_v57, %v3234_v50  ;;  %v3324_v55 = vmul.f32 %v8581_v19, %v8580_v4  ;;  %v3684_v23 = vmul.f32 %v7505_v42, %v8569_v54  ;;  %v8583_v33 = vld [vmem:[#allocation66_spill] sm:$0xff]  ;;  %v8585_v57 = vld [vmem:[#allocation99_spill] sm:$0xff]  ;;  %v8587_v4 = vld [vmem:[#allocation37_spill] sm:$0xff] }
 0x235   : > { %v3601_v39 = vadd.f32 %v3598_v31, %v3562_v35  ;;  %v3711_v25 = vmul.f32 %v7401_v49, %v8572_v12  ;;  %v7525_v34 = vrot.slane %v7401_v49, 1  ;;  %v8584_v31 = vld [vmem:[#allocation112_spill] sm:$0xff]  ;;  %v3232_v54 = vmul.f32 %v7096_v13, %v8587_v4 }
 0x236   : > { %v3610_v29 = vadd.f32 %v3607_v16, %v3571_v21  ;;  %v3327_v35 = vadd.f32 %v3324_v55, %v3279_v15  ;;  %v3372_v50 = vmul.f32 %v8584_v31, %v8583_v33  ;;  %v3693_v21 = vmul.f32 %v7505_v42, %v8585_v57  ;;  %v8586_v16 = vld [vmem:[#allocation35_spill] sm:$0xff]  ;;  %v8589_v15 = vld [vmem:[#allocation124_spill] sm:$0xff]  ;;  %v8590_v33 = vld [vmem:[#allocation89_spill] sm:$0xff] }
 0x237   : > { %v3657_v18 = vadd.f32 %v3654_v14, %v3601_v39  ;;  %v3187_v2 = vmul.f32 %v7086_v24, %v8586_v16  ;;  %v7536_v12 = vrot.slane %v7401_v49, 2  ;;  %v8588_v14 = vld [vmem:[#allocation50_spill] sm:$0xff]  ;;  %v8591_v31 = vld [vmem:[#allocation41_spill] sm:$0xff]  ;;  %v3741_v13 = vmul.f32 %v7525_v34, %v8576_v45 }
 0x238   : > { %v3666_v3 = vadd.f32 %v3663_v0, %v3610_v29  ;;  %v3375_v39 = vadd.f32 %v3372_v50, %v3327_v35  ;;  %v3437_v55 = vmul.f32 %v8589_v15, %v8588_v14  ;;  %v3720_v29 = vmul.f32 %v7401_v49, %v8590_v33  ;;  %v8593_v16 = vld [vmem:[#allocation125_spill] sm:$0xff]  ;;  %v8594_v50 = vld [vmem:[#allocation104_spill] sm:$0xff] }
 0x239   : > { %v3687_v19 = vadd.f32 %v3684_v23, %v3657_v18  ;;  %v3235_v0 = vadd.f32 %v3232_v54, %v3187_v2  ;;  %v3277_v57 = vmul.f32 %v8466_v59, %v8591_v31  ;;  %v8592_v18 = vld [vmem:[#allocation53_spill] sm:$0xff]  ;;  %v3750_v14 = vmul.f32 %v7525_v34, %v8594_v50  ;;  %v8604_v50 = vld [vmem:[#allocation95_spill] sm:$0xff] }
 0x23a   : > { %v3696_v10 = vadd.f32 %v3693_v21, %v3666_v3  ;;  %v3440_v23 = vadd.f32 %v3437_v55, %v3375_v39  ;;  %v3476_v4 = vmul.f32 %v8593_v16, %v8592_v18  ;;  %v8595_v21 = vld [vmem:[#allocation45_spill] sm:$0xff]  ;;  %v3771_v59 = vmul.f32 %v7536_v12, %v8578_v26  ;;  %v8602_v18 = vld [vmem:[#allocation90_spill] sm:$0xff] }
 0x23b   : > { %v3714_v24 = vadd.f32 %v3711_v25, %v3687_v19  ;;  %v3280_v3 = vadd.f32 %v3277_v57, %v3235_v0  ;;  %v3325_v15 = vmul.f32 %v7117_v47, %v8595_v21  ;;  %v8596_v54 = vld [vmem:[#allocation57_spill] sm:$0xff]  ;;  %v8597_v19 = vld [vmem:[#allocation119_spill] sm:$0xff]  ;;  %v8600_v47 = vld [vmem:[#allocation64_spill] sm:$0xff]  ;;  %v3185_v26 = vmul.f32 %v7201_v38, %v8602_v18 }
 0x23c   : > { %v3723_v35 = vadd.f32 %v3720_v29, %v3696_v10  ;;  %v3479_v25 = vadd.f32 %v3476_v4, %v3440_v23  ;;  %v3512_v45 = vmul.f32 %v8597_v19, %v8596_v54  ;;  %v8598_v55 = vld [vmem:[#allocation109_spill] sm:$0xff]  ;;  %v8599_v29 = vld [vmem:[#allocation47_spill] sm:$0xff]  ;;  %v8603_v4 = vld [vmem:[#allocation36_spill] sm:$0xff] }
 0x23d   : > { %v3744_v2 = vadd.f32 %v3741_v13, %v3714_v24  ;;  %v3780_v33 = vmul.f32 %v7536_v12, %v8598_v55  ;;  %v3328_v10 = vadd.f32 %v3325_v15, %v3280_v3  ;;  %v3373_v31 = vmul.f32 %v7128_v41, %v8599_v29  ;;  %v8601_v24 = vld [vmem:[#allocation140_spill] sm:$0xff]  ;;  %v8605_v41 = vld [vmem:[#allocation67_spill] sm:$0xff]  ;;  %v8606_v21 = vld [vmem:[#allocation141_spill] sm:$0xff] }
 0x23e   : > { %v3753_v39 = vadd.f32 %v3750_v14, %v3723_v35  ;;  %v3515_v57 = vadd.f32 %v3512_v45, %v3479_v25  ;;  %v3551_v13 = vmul.f32 %v8601_v24, %v8600_v47  ;;  %v3438_v35 = vmul.f32 %v7131_v11, %v8603_v4  ;;  %v8608_v19 = vld [vmem:[#allocation39_spill] sm:$0xff]  ;;  %v8610_v55 = vld [vmem:[#allocation132_spill] sm:$0xff]  ;;  %v8613_v24 = vld [vmem:[#allocation54_spill] sm:$0xff] }
 0x23f   : > { %v7560_v0 = vadd.f32 %v3771_v59, %v3744_v2  ;;  %v3376_v16 = vadd.f32 %v3373_v31, %v3328_v10  ;;  %v3230_v14 = vmul.f32 %v7211_v43, %v8604_v50  ;;  %v3590_v15 = vmul.f32 %v8606_v21, %v8605_v41  ;;  %v8607_v2 = vld [vmem:[#allocation38_spill] sm:$0xff]  ;;  %v8609_v11 = vld [vmem:[#allocation51_spill] sm:$0xff] }
 0x240   : > { %v7566_v23 = vadd.f32 %v3780_v33, %v3753_v39  ;;  %v3554_v3 = vadd.f32 %v3551_v13, %v3515_v57  ;;  %v3477_v59 = vmul.f32 %v7141_v8, %v8607_v2  ;;  %v3275_v45 = vmul.f32 %v8491_v5, %v8608_v19  ;;  %v8611_v10 = vld [vmem:[#allocation43_spill] sm:$0xff]  ;;  %v8612_v57 = vld [vmem:[#allocation100_spill] sm:$0xff]  ;;  %v8615_v50 = vld [vmem:[#allocation58_spill] sm:$0xff] }
 0x241   : > { %v3441_v38 = vadd.f32 %v3438_v35, %v3376_v16  ;;  %v3233_v54 = vadd.f32 %v3230_v14, %v3185_v26  ;;  %v3646_v33 = vmul.f32 %v8610_v55, %v8609_v11  ;;  %v3513_v29 = vmul.f32 %v8476_v63, %v8611_v10  ;;  %v8614_v16 = vld [vmem:[#allocation105_spill] sm:$0xff]  ;;  %v8620_v19 = vld [vmem:[#allocation78_spill] sm:$0xff] }
 0x242   : > { %v4919_v25 = vpack.c.bf16 %v7560_v0, %v7566_v23  ;;  %v3593_v39 = vadd.f32 %v3590_v15, %v3554_v3  ;;  %v3323_v8 = vmul.f32 %v7228_v36, %v8612_v57  ;;  %v3676_v13 = vmul.f32 %v7328_v32, %v8613_v24  ;;  %v8616_v3 = vld [vmem:[#allocation48_spill] sm:$0xff]  ;;  %v8617_v15 = vld [vmem:[#allocation65_spill] sm:$0xff] }
 0x243   : > { %v3480_v43 = vadd.f32 %v3477_v59, %v3441_v38  ;;  %v3278_v31 = vadd.f32 %v3275_v45, %v3233_v54  ;;  %v3552_v5 = vmul.f32 %v7155_v27, %v8542_v20  ;;  %v3371_v4 = vmul.f32 %v7242_v28, %v8614_v16  ;;  %v8619_v38 = vld [vmem:[#allocation110_spill] sm:$0xff]  ;;  %v8621_v45 = vld [vmem:[#allocation129_spill] sm:$0xff]  ;;  %v8626_v57 = vld [vmem:[#allocation84_spill] sm:$0xff] }
 0x244   : > { %4920 = vmatpush1.bf16.msra.mxu0 %v4919_v25  ;;  %v3649_v47 = vadd.f32 %v3646_v33, %v3593_v39  ;;  %v3703_v63 = vmul.f32 %v8524_v30, %v8615_v50  ;;  %v3591_v36 = vmul.f32 %v7165_v53, %v8616_v3  ;;  %v3436_v32 = vmul.f32 %v7247_v37, %v8555_v40  ;;  %v8618_v25 = vld [vmem:[#allocation68_spill] sm:$0xff]  ;;  %v8622_v39 = vld [vmem:[#allocation42_spill] sm:$0xff]  ;;  %v8625_v10 = vld [vmem:[#allocation81_spill] sm:$0xff] }
 0x245   : > { %v3516_v18 = vadd.f32 %v3513_v29, %v3480_v43  ;;  %v3326_v26 = vadd.f32 %v3323_v8, %v3278_v31  ;;  %v3733_v27 = vmul.f32 %v7360_v17, %v8617_v15  ;;  %v3647_v28 = vmul.f32 %v7418_v1, %v8532_v56  ;;  %v8623_v1 = vld [vmem:[#allocation44_spill] sm:$0xff] }
 0x246   : > { %v3679_v35 = vadd.f32 %v3676_v13, %v3649_v47  ;;  %v3475_v30 = vmul.f32 %v7253_v46, %v8556_v61  ;;  %v3763_v53 = vmul.f32 %v8619_v38, %v8618_v25  ;;  %v3677_v37 = vmul.f32 %v8621_v45, %v8620_v19  ;;  %v8624_v61 = vld [vmem:[#allocation101_spill] sm:$0xff]  ;;  %v4994_v13 = vld [vmem:[%s6562_s14 + $0x28] sm:$0xff] }
 0x247   : > { %v3555_v14 = vadd.f32 %v3552_v5, %v3516_v18  ;;  %v3374_v41 = vadd.f32 %v3371_v4, %v3326_v26  ;;  %v3511_v17 = vmul.f32 %v8498_v6, %v8622_v39  ;;  %v3704_v55 = vmul.f32 %v7390_v44, %v8623_v1  ;;  %v4995_v26 = vld [vmem:[%s6562_s14 + $0x10] sm:$0xff]  ;;  %v8636_v25 = vld [vmem:[#allocation26_spill] sm:$0xff]  ;;  %v8637_v19 = vld [vmem:[#allocation133_spill] sm:$0xff] }
 0x248   : > { %v3706_v21 = vadd.f32 %v3703_v63, %v3679_v35  ;;  %v3550_v33 = vmul.f32 %v7285_v51, %v8624_v61  ;;  %v3734_v29 = vmul.f32 %v7450_v52, %v8625_v10  ;;  %v3589_v6 = vmul.f32 %v7295_v58, %v8564_v62  ;;  %v8628_v4 = vld [vmem:[#allocation131_spill] sm:$0xff]  ;;  %v8631_v63 = vld [vmem:[#allocation102_spill] sm:$0xff]  ;;  %v8640_v61 = vld [vmem:[#allocation128_spill] sm:$0xff] }
 0x249   : > { %v3594_v20 = vadd.f32 %v3591_v36, %v3555_v14  ;;  %v3439_v2 = vadd.f32 %v3436_v32, %v3374_v41  ;;  %v3764_v8 = vmul.f32 %v7459_v9, %v8626_v57  ;;  %v3645_v24 = vmul.f32 %v7498_v22, %v8483_v60  ;;  %v8627_v60 = vld [vmem:[#allocation23_spill] sm:$0xff]  ;;  %v4996_v36 = vld [vmem:[%s6562_s14 + $0x20] sm:$0xff] }
 0x24a   : > { %v3736_v59 = vadd.f32 %v3733_v27, %v3706_v21  ;;  %v3965_v51 = vmul.f32 %v4994_v13, %v4994_v13  ;;  %v3675_v52 = vmul.f32 %v7505_v42, %v8484_v48  ;;  %v3962_v16 = vmul.f32 %v4995_v26, %v4995_v26  ;;  %v8633_v14 = vld [vmem:[#allocation107_spill] sm:$0xff]  ;;  %v4997_v21 = vld [vmem:[%s6562_s14 + $0x18] sm:$0xff] }
 0x24b   : > { %v3650_v54 = vadd.f32 %v3647_v28, %v3594_v20  ;;  %v3478_v40 = vadd.f32 %v3475_v30, %v3439_v2  ;;  %v3702_v58 = vmul.f32 %v7401_v49, %v8487_v7  ;;  %v3968_v22 = vmul.f32 %v8627_v60, %v8627_v60  ;;  %v8634_v20 = vld [vmem:[#allocation116_spill] sm:$0xff]  ;;  %v8635_v30 = vld [vmem:[#allocation130_spill] sm:$0xff]  ;;  %v8638_v39 = vld [vmem:[#allocation127_spill] sm:$0xff] }
 0x24c   : > { %v7610_v11 = vadd.f32 %v3763_v53, %v3736_v59  ;;  %v4943_v9 = vpack.c.bf16 %v3965_v51, %v3962_v16  ;;  %v3971_v35 = vmul.f32 %v8628_v4, %v8628_v4  ;;  %v8629_v50 = vmov 0.0|0.0   ;;  %v4999_v53 = vld [vmem:[%s6562_s14] sm:$0xff]  ;;  %v1265_v13 = vld [vmem:[%s1264_s19] ss:$0 sm:$0xff] }
 0x24d   : > { %v3680_v56 = vadd.f32 %v3677_v37, %v3650_v54  ;;  %v3514_v46 = vadd.f32 %v3511_v17, %v3478_v40  ;;  %v8630_v48 = vmov 1.0   ;;  %v3732_v7 = vmul.f32 %v7525_v34, %v8631_v63  ;;  %v4998_v34 = vld [vmem:[%s6562_s14 + $0x8] sm:$0xff]  ;;  %1267 = vst [vmem:[#allocation18] sm:$0x1] %v1265_v13  ;;  %v1310_v51 = vld [vmem:[%s1309_s23] ss:$0 sm:$0xff] }
 0x24e   : > { %3831 = vmatprep.subr.mxu0 %v7610_v11  ;;  %v8632_v49 = vmov 0.0   ;;  %v3762_v3 = vmul.f32 %v7536_v12, %v8633_v14  ;;  %v3964_v41 = vmul.f32 %v4996_v36, %v4996_v36  ;;  %v3963_v15 = vmul.f32 %v4997_v21, %v4997_v21  ;;  %1312 = vst [vmem:[#allocation19] sm:$0x1] %v1310_v51  ;;  %v4652_v13 = vld [vmem:[%s6562_s14 + $0x28] sm:$0xff] }
 0x24f   : > { %v3707_v43 = vadd.f32 %v3704_v55, %v3680_v56  ;;  %v3553_v31 = vadd.f32 %v3550_v33, %v3514_v46  ;;  %v4946_v27 = vpack.c.bf16 %v3971_v35, %v3968_v22  ;;  %v3974_v28 = vmul.f32 %v8634_v20, %v8634_v20  ;;  %v8639_v56 = vld [vmem:[#allocation126_spill] sm:$0xff] }
 0x250   : > { %v3961_v2 = vmul.f32 %v4998_v34, %v4998_v34  ;;  %v3967_v59 = vmul.f32 %v8635_v30, %v8635_v30  ;;  %v3970_v38 = vmul.f32 %v8636_v25, %v8636_v25  ;;  %v3960_v54 = vmul.f32 %v4999_v53, %v4999_v53  ;;  %v8642_v30 = vld [vmem:[#allocation33_spill] sm:$0xff] }
 0x251   : > { %v3737_v47 = vadd.f32 %v3734_v29, %v3707_v43  ;;  %v3592_v44 = vadd.f32 %v3589_v6, %v3553_v31  ;;  %v3977_v45 = vmul.f32 %v8637_v19, %v8637_v19  ;;  %v3966_v17 = vmul.f32 %v8638_v39, %v8638_v39  ;;  %v8641_v43 = vld [vmem:[#allocation113_spill] sm:$0xff] }
 0x252   : > { %v4930_v37 = vpack.c.bf16 %v3964_v41, %v3961_v2  ;;  %v4932_v40 = vpack.c.bf16 %v3963_v15, %v3960_v54  ;;  %v3969_v1 = vmul.f32 %v8639_v56, %v8639_v56  ;;  %v4934_v46 = vpack.c.bf16 %v3970_v38, %v3967_v59 }
 0x253   : > { %v7626_v18 = vadd.f32 %v3764_v8, %v3737_v47  ;;  %v3648_v5 = vadd.f32 %v3645_v24, %v3592_v44  ;;  %v4949_v55 = vpack.c.bf16 %v3977_v45, %v3974_v28  ;;  %v3973_v33 = vmul.f32 %v8640_v61, %v8640_v61  ;;  %v8643_v45 = vld [vmem:[#allocation31_spill] sm:$0xff] }
 0x254   : > { %v3976_v10 = vmul.f32 %v8641_v43, %v8641_v43  ;;  %v4936_v31 = vpack.c.bf16 %v3969_v1, %v3966_v17  ;;  %v3972_v6 = vmul.f32 %v7566_v23, %v7566_v23  ;;  %v3975_v8 = vmul.f32 %v7560_v0, %v7560_v0 }
 0x255   : > { %4846 = vmatpush3.msra.mxu1 %v7626_v18  ;;  %v3678_v62 = vadd.f32 %v3675_v52, %v3648_v5  ;;  %v3980_v29 = vmul.f32 %v7626_v18, %v7626_v18  ;;  %v3979_v44 = vmul.f32 %v7610_v11, %v7610_v11 }
 0x256   : > { %4942 = vmatprep.subr.bf16.mxu1 %v8629_v50  ;;  %4848 = vmatmul.mubr.msk.f32.vlgmr.msra.gmra.mrb[4].mxu1 %vm1364_vm7, %v8630_v48  ;;  %v4938_v57 = vpack.c.bf16 %v3976_v10, %v3973_v33  ;;  %v4940_v47 = vpack.c.bf16 %v3975_v8, %v3972_v6 }
 0x257   : > { %v3705_v42 = vadd.f32 %v3702_v58, %v3678_v62  ;;  %4944 = vmatpush3.bf16.msra.mxu1 %v4943_v9  ;;  %4864 = vmatprep.mubr.msk.f32.mxu1 %vm5026_vm0, %v8632_v49 }
 0x258   : > { %4945 = vmatprep.subr.bf16.mxu1 %v8629_v50 }
 0x259   : > { %v3735_v32 = vadd.f32 %v3732_v7, %v3705_v42 }
 0x25b   : > { %v7657_v12 = vadd.f32 %v3762_v3, %v3735_v32  ;;  %4947 = vmatpush3.bf16.msra.mxu1 %v4946_v27  ;;  %v4143_v27 = vld [vmem:[#allocation18] sm:$0x7] }
 0x25c   : > { %4948 = vmatprep.subr.bf16.mxu1 %v8629_v50  ;;  %v4156_v59 = vrot.slane %v4143_v27, %v8642_v30 }
 0x25d   : > { %3832 = vmatpush1.msra.mxu0 %v7657_v12  ;;  %v3978_v24 = vmul.f32 %v7657_v12, %v7657_v12 }
 0x25e   : > { %4646 = vmatmul.mubr.msk.f32.vlgmr.msra.gmra.mrb[4].mxu0 %vm1364_vm7, %v8630_v48  ;;  %4931 = vmatprep.subr.bf16.mxu0 %v4930_v37  ;;  %v4148_v37 = vrot.slane %v4143_v27, %v8643_v45 }
 0x25f   : > { %4933 = vmatpush1.bf16.msra.mxu0 %v4932_v40  ;;  %4950 = vmatpush3.bf16.msra.mxu1 %v4949_v55  ;;  %v8644_v40 = vld [vmem:[#allocation32_spill] sm:$0xff] }
 0x260   : > { %4935 = vmatprep.subr.bf16.mxu0 %v4934_v46  ;;  %4862 = vmatprep.subr.mxu1 %v8632_v49  ;;  %v4152_v17 = vrot.slane %v4143_v27, %v8644_v40 }
 0x261   : > { %4045 = vmatprep.mubr.f32.mxu0 %v8632_v49 }
 0x263   : > { %4937 = vmatpush1.bf16.msra.mxu0 %v4936_v31  ;;  %4863 = vmatpush3.msra.mxu1 %v3980_v29 }
 0x264   : > { %4939 = vmatprep.subr.bf16.mxu0 %v4938_v57  ;;  %4865 = vmatmul.mubr.msk.f32.vlgmr.msra.gmra.mrb[6].mxu1 %vm1364_vm7, %v8630_v48  ;;  %v8645_v57 = vld [vmem:[#allocation34_spill] sm:$0xff] }
 0x267   : > { %4941 = vmatpush1.bf16.msra.mxu0 %v4940_v47 }
 0x268   : > { %3993 = vmatprep.subr.mxu0 %v3979_v44 }
 0x26b   : > { %3994 = vmatpush1.msra.mxu0 %v3978_v24  ;;  %v4225_v24 = vld [vmem:[%s6562_s14 + $0x10] sm:$0xff] }
 0x26c   : > { %4648 = vmatmul.mubr.msk.f32.vlgmr.msra.gmra.mrb[6].mxu0 %vm1364_vm7, %v8630_v48 }
 0x329   : > { %v3956_v5 = vpop.f32.mrb[4].mxu1 }
 0x32a   : > { %v4849_v52 = vpop.f32.mrb[5].mxu1  ;;  %v4124_v58 = vmul.f32 0.020408163, %v3956_v5 }
 0x32c   : > { %v4130_v9 = vmul.f32 %v4124_v58, %v4124_v58 }
 0x331   : > { %v3885_v26 = vpop.f32.mrb[4].mxu0 }
 0x332   : > { %v3887_v16 = vpop.f32.mrb[5].mxu0  ;;  %v4122_v48 = vmul.f32 0.020408163, %v3885_v26  ;;  %v4163_v26 = vld [vmem:[#allocation19] sm:$0x7] }
 0x333   : > { %v4123_v63 = vmul.f32 0.020408163, %v3887_v16 }
 0x334   : > { %v4128_v14 = vmul.f32 %v4122_v48, %v4122_v48 }
 0x335   : > { %v4129_v41 = vmul.f32 %v4123_v63, %v4123_v63 }
 0x337   : > { %v4118_v62 = vpop.f32.mrb[6].mxu1 }
 0x338   : > { %v4127_v22 = vmul.f32 0.020408163, %v4118_v62  ;;  %v4866_v35 = vpop.f32.mrb[7].mxu1 }
 0x339   : > { %v4650_v35 = vld [vmem:[%s6562_s14 + $0x18] sm:$0xff] }
 0x33a   : > { %v4133_v50 = vsub.f32 %v4127_v22, %v4130_v9  ;;  %v4223_v22 = vld [vmem:[%s6562_s14] sm:$0xff] }
 0x33c   : > { %v4136_v42 = vmax.f32 %v4133_v50, 0.0 }
 0x33e   : > { %v4139_v7 = vadd.f32 0.001, %v4136_v42 }
 0x33f   : > { %v4047_v49 = vpop.f32.mrb[6].mxu0 }
 0x340   : > { %4988 = vrsqrt.f32 %v4139_v7  ;;  %v4125_v3 = vmul.f32 0.020408163, %v4047_v49  ;;  %v4049_v36 = vpop.f32.mrb[7].mxu0 }
 0x341   : > { %v4126_v32 = vmul.f32 0.020408163, %v4049_v36 }
 0x342   : > { %v4131_v21 = vsub.f32 %v4125_v3, %v4128_v14  ;;  %v4651_v3 = vld [vmem:[%s6562_s14 + $0x20] sm:$0xff] }
 0x343   : > { %v4132_v15 = vsub.f32 %v4126_v32, %v4129_v41 }
 0x344   : > { %v4134_v28 = vmax.f32 %v4131_v21, 0.0  ;;  %v4657_v21 = vld [vmem:[%s6562_s14 + $0x38] sm:$0xff] }
 0x345   : > { %v4135_v34 = vmax.f32 %v4132_v15, 0.0 }
 0x346   : > { %v4137_v2 = vadd.f32 0.001, %v4134_v28 }
 0x347   : > { %v4138_v25 = vadd.f32 0.001, %v4135_v34 }
 0x348   : > { %4990 = vrsqrt.f32 %v4137_v2 }
 0x349   : > { %4992 = vrsqrt.f32 %v4138_v25 }
 0x34a   : > { %v4989_v38 = vpop.eup %4988 }
 0x34b   : > { %v4162_v53 = vmul.f32 %v4989_v38, %v4156_v59 }
 0x34d   : > { %v4166_v54 = vmul.f32 %v4162_v53, %v4124_v58  ;;  %v4206_v6 = vrot.slane %v4162_v53, %v8643_v45 }
 0x34f   : > { %v4184_v8 = vrot.slane %v4166_v54, %v8645_v57  ;;  %v4228_v5 = vmul.f32 %v4225_v24, %v4206_v6  ;;  %v4240_v52 = vmul.f32 %v4652_v13, %v4206_v6  ;;  %v4252_v58 = vmul.f32 %v4206_v6, %v8627_v60 }
 0x350   : > { %v4264_v62 = vmul.f32 %v4206_v6, %v8628_v4  ;;  %v4276_v9 = vmul.f32 %v4206_v6, %v8634_v20  ;;  %v4300_v42 = vmul.f32 %v4206_v6, %v7626_v18  ;;  %v4224_v20 = vld [vmem:[%s6562_s14 + $0x8] sm:$0xff] }
 0x352   : > { %v4991_v1 = vpop.eup %4990 }
 0x353   : > { %v4993_v55 = vpop.eup %4992  ;;  %v4160_v46 = vmul.f32 %v4991_v1, %v4148_v37 }
 0x354   : > { %v4161_v33 = vmul.f32 %v4993_v55, %v4152_v17 }
 0x355   : > { %v4164_v10 = vmul.f32 %v4160_v46, %v4122_v48  ;;  %v4198_v44 = vrot.slane %v4160_v46, %v8643_v45  ;;  %v4288_v48 = vmul.f32 %v4206_v6, %v8637_v19 }
 0x356   : > { %v4165_v29 = vmul.f32 %v4161_v33, %v4123_v63  ;;  %v4202_v16 = vrot.slane %v4161_v33, %v8643_v45 }
 0x357   : > { %v4226_v63 = vmul.f32 %v4223_v22, %v4198_v44  ;;  %v4238_v7 = vmul.f32 %v4650_v35, %v4198_v44  ;;  %v4250_v49 = vmul.f32 %v4198_v44, %v8638_v39  ;;  %v4262_v60 = vmul.f32 %v4198_v44, %v8639_v56 }
 0x358   : > { %v4170_v31 = vcombine.low %v4164_v10, %v4165_v29  ;;  %v4274_v4 = vmul.f32 %v4198_v44, %v7566_v23  ;;  %v4286_v36 = vmul.f32 %v4198_v44, %v7560_v0  ;;  %v4298_v41 = vmul.f32 %v4198_v44, %v7657_v12  ;;  %v4663_v23 = vld [vmem:[%s6562_s14 + $0x50] sm:$0xff] }
 0x359   : > { %v4227_v32 = vmul.f32 %v4224_v20, %v4202_v16  ;;  %v4239_v19 = vmul.f32 %v4651_v3, %v4202_v16  ;;  %v4251_v56 = vmul.f32 %v4657_v21, %v4202_v16  ;;  %v4263_v27 = vmul.f32 %v4663_v23, %v4202_v16 }
 0x35a   : > { %v4177_v47 = vrot.slane %v4170_v31, %v8645_v57  ;;  %v4275_v0 = vmul.f32 %v4202_v16, %v8640_v61  ;;  %v4287_v12 = vmul.f32 %v4202_v16, %v8641_v43  ;;  %v4299_v28 = vmul.f32 %v4202_v16, %v7610_v11 }
 0x35c   : > { %v4185_v51 = vcombine.low %v4177_v47, %v4184_v8 }
 0x35e   : > { %v4192_v50 = vrot.slane %v4185_v51, %v8645_v57 }
 0x360   : > { %v4194_v14 = vsub.f32 %v4163_v26, %v4192_v50 }
 0x362   : > { %v4211_v18 = vrot.slane %v4194_v14, %v8643_v45  ;;  %v4215_v15 = vrot.slane %v4194_v14, %v8644_v40  ;;  %v4219_v39 = vrot.slane %v4194_v14, %v8642_v30 }
 0x364   : > { %v4229_v34 = vadd.f32 %v4226_v63, %v4211_v18  ;;  %v4230_v2 = vadd.f32 %v4227_v32, %v4215_v15  ;;  %v4231_v59 = vadd.f32 %v4228_v5, %v4219_v39  ;;  %v4241_v25 = vadd.f32 %v4238_v7, %v4211_v18 }
 0x365   : > { %v4242_v30 = vadd.f32 %v4239_v19, %v4215_v15  ;;  %v4243_v38 = vadd.f32 %v4240_v52, %v4219_v39  ;;  %v4253_v53 = vadd.f32 %v4250_v49, %v4211_v18  ;;  %v4254_v54 = vadd.f32 %v4251_v56, %v4215_v15 }
 0x366   : > { %4232 = vst [vmem:[%s6562_s14] sm:$0xff] %v4229_v34  ;;  %4233 = vst [vmem:[%s6562_s14 + $0x8] sm:$0xff] %v4230_v2  ;;  %v4255_v11 = vadd.f32 %v4252_v58, %v4219_v39  ;;  %v4265_v61 = vadd.f32 %v4262_v60, %v4211_v18  ;;  %v4266_v43 = vadd.f32 %v4263_v27, %v4215_v15 }
 0x367   : > { %4234 = vst [vmem:[%s6562_s14 + $0x10] sm:$0xff] %v4231_v59  ;;  %4653 = vst [vmem:[%s6562_s14 + $0x18] sm:$0xff] %v4241_v25  ;;  %v4267_v45 = vadd.f32 %v4264_v62, %v4219_v39  ;;  %v4277_v37 = vadd.f32 %v4274_v4, %v4211_v18  ;;  %v4278_v40 = vadd.f32 %v4275_v0, %v4215_v15 }
 0x368   : > { %4654 = vst [vmem:[%s6562_s14 + $0x20] sm:$0xff] %v4242_v30  ;;  %4655 = vst [vmem:[%s6562_s14 + $0x28] sm:$0xff] %v4243_v38  ;;  %v4279_v17 = vadd.f32 %v4276_v9, %v4219_v39  ;;  %v4289_v1 = vadd.f32 %v4286_v36, %v4211_v18  ;;  %v4290_v55 = vadd.f32 %v4287_v12, %v4215_v15 }
 0x369   : > { %4659 = vst [vmem:[%s6562_s14 + $0x30] sm:$0xff] %v4253_v53  ;;  %4660 = vst [vmem:[%s6562_s14 + $0x38] sm:$0xff] %v4254_v54  ;;  %v4291_v46 = vadd.f32 %v4288_v48, %v4219_v39  ;;  %v4301_v33 = vadd.f32 %v4298_v41, %v4211_v18  ;;  %v4302_v10 = vadd.f32 %v4299_v28, %v4215_v15 }
 0x36a   : > { %4661 = vst [vmem:[%s6562_s14 + $0x40] sm:$0xff] %v4255_v11  ;;  %4665 = vst [vmem:[%s6562_s14 + $0x48] sm:$0xff] %v4265_v61  ;;  %v4303_v29 = vadd.f32 %v4300_v42, %v4219_v39  ;;  %4313 = sbr.rel (!%p5099_p4) target bundleno = 891 (0x37b), region = 48 }
 0x36b   : > { %4666 = vst [vmem:[%s6562_s14 + $0x50] sm:$0xff] %v4266_v43  ;;  %4667 = vst [vmem:[%s6562_s14 + $0x58] sm:$0xff] %v4267_v45 }
 0x36c   : > { %4671 = vst [vmem:[%s6562_s14 + $0x60] sm:$0xff] %v4277_v37  ;;  %4672 = vst [vmem:[%s6562_s14 + $0x68] sm:$0xff] %v4278_v40 }
 0x36d   : > { %4673 = vst [vmem:[%s6562_s14 + $0x70] sm:$0xff] %v4279_v17  ;;  %4677 = vst [vmem:[%s6562_s14 + $0x78] sm:$0xff] %v4289_v1  ;;  %v4329_v31 = vld [vmem:[%s6562_s14] sm:$0xff] (%p5099_p4)  ;;  %v4331_v6 = vld [vmem:[%s6562_s14 + $0x8] sm:$0xff] (%p5099_p4) }
 0x36e   : > { %4678 = vst [vmem:[%s6562_s14 + $0x80] sm:$0xff] %v4290_v55  ;;  %4679 = vst [vmem:[%s6562_s14 + $0x88] sm:$0xff] %v4291_v46  ;;  %v4333_v57 = vld [vmem:[%s6562_s14 + $0x10] sm:$0xff] (%p5099_p4)  ;;  %v4335_v8 = vld [vmem:[%s6562_s14 + $0x18] sm:$0xff] (%p5099_p4) }
 0x36f   : > { %4683 = vst [vmem:[%s6562_s14 + $0x90] sm:$0xff] %v4301_v33  ;;  %4684 = vst [vmem:[%s6562_s14 + $0x98] sm:$0xff] %v4302_v10  ;;  %v4337_v47 = vld [vmem:[%s6562_s14 + $0x20] sm:$0xff] (%p5099_p4)  ;;  %v4339_v44 = vld [vmem:[%s6562_s14 + $0x28] sm:$0xff] (%p5099_p4) }
 0x370   : > { %4685 = vst [vmem:[%s6562_s14 + $0xa0] sm:$0xff] %v4303_v29  ;;  %v4341_v24 = vld [vmem:[%s6562_s14 + $0x30] sm:$0xff] (%p5099_p4)  ;;  %v4343_v13 = vld [vmem:[%s6562_s14 + $0x38] sm:$0xff] (%p5099_p4)  ;;  %4330 = vst [vmem:[%s7766_s30] sm:$0xff] (%p5099_p4), %v4329_v31 }
 0x371   : > { %v4345_v51 = vld [vmem:[%s6562_s14 + $0x40] sm:$0xff]  ;;  %4332 = vst [vmem:[%s7766_s30 + $0x8] sm:$0xff] %v4331_v6  ;;  %4334 = vst [vmem:[%s7766_s30 + $0x10] sm:$0xff] %v4333_v57  ;;  %v4347_v5 = vld [vmem:[%s6562_s14 + $0x48] sm:$0xff] }
 0x372   : > { %4336 = vst [vmem:[%s7766_s30 + $0x48] sm:$0xff] %v4335_v8  ;;  %4338 = vst [vmem:[%s7766_s30 + $0x50] sm:$0xff] %v4337_v47  ;;  %v4349_v52 = vld [vmem:[%s6562_s14 + $0x50] sm:$0xff]  ;;  %v4351_v26 = vld [vmem:[%s6562_s14 + $0x58] sm:$0xff] }
 0x373   : > { %4340 = vst [vmem:[%s7766_s30 + $0x58] sm:$0xff] %v4339_v44  ;;  %4342 = vst [vmem:[%s7766_s30 + $0x90] sm:$0xff] %v4341_v24  ;;  %v4353_v16 = vld [vmem:[%s6562_s14 + $0x60] sm:$0xff]  ;;  %v4355_v58 = vld [vmem:[%s6562_s14 + $0x68] sm:$0xff] }
 0x374   : > { %4344 = vst [vmem:[%s7766_s30 + $0x98] sm:$0xff] %v4343_v13  ;;  %4346 = vst [vmem:[%s7766_s30 + $0xa0] sm:$0xff] %v4345_v51  ;;  %v4357_v62 = vld [vmem:[%s6562_s14 + $0x70] sm:$0xff]  ;;  %v4359_v9 = vld [vmem:[%s6562_s14 + $0x78] sm:$0xff] }
 0x375   : > { %4348 = vst [vmem:[%s7766_s30 + $0xd8] sm:$0xff] %v4347_v5  ;;  %4350 = vst [vmem:[%s7766_s30 + $0xe0] sm:$0xff] %v4349_v52  ;;  %v4361_v22 = vld [vmem:[%s6562_s14 + $0x80] sm:$0xff]  ;;  %v4363_v35 = vld [vmem:[%s6562_s14 + $0x88] sm:$0xff] }
 0x376   : > { %4352 = vst [vmem:[%s7766_s30 + $0xe8] sm:$0xff] %v4351_v26  ;;  %4354 = vst [vmem:[%s7766_s30 + $0x120] sm:$0xff] %v4353_v16  ;;  %v4365_v50 = vld [vmem:[%s6562_s14 + $0x90] sm:$0xff]  ;;  %v4367_v48 = vld [vmem:[%s6562_s14 + $0x98] sm:$0xff] }
 0x377   : > { %4356 = vst [vmem:[%s7766_s30 + $0x128] sm:$0xff] %v4355_v58  ;;  %4358 = vst [vmem:[%s7766_s30 + $0x130] sm:$0xff] %v4357_v62  ;;  %v4369_v42 = vld [vmem:[%s6562_s14 + $0xa0] sm:$0xff] }
 0x378   : > { %4360 = vst [vmem:[%s7766_s30 + $0x168] sm:$0xff] %v4359_v9  ;;  %4362 = vst [vmem:[%s7766_s30 + $0x170] sm:$0xff] %v4361_v22 }
 0x379   : > { %4364 = vst [vmem:[%s7766_s30 + $0x178] sm:$0xff] %v4363_v35  ;;  %4366 = vst [vmem:[%s7766_s30 + $0x1b0] sm:$0xff] %v4365_v50 }
 0x37a   : > { %4368 = vst [vmem:[%s7766_s30 + $0x1b8] sm:$0xff] %v4367_v48  ;;  %4370 = vst [vmem:[%s7766_s30 + $0x1c0] sm:$0xff] %v4369_v42 }
 0x37b PF: > { %p16_p12 = scmp.ge.s32.totalorder %s5089_s29, 5   ;;  %s8646_s26 = smov %s5018_s27 }
 0x37c   : > { %s8647_s27 = smov %s5097_s9  ;;  %s8648_s28 = smov %s5089_s29 }
 0x37d   :  { %18 = sbr.rel (!%p16_p12) target bundleno = 5 (0x5), region = 266 }

</bundles_post_ra>
